<compile_context>
chip_gen: v5e
topology: v5e:2x2
jax: 0.10.0
libtpu: 0.0.40
codegen_flags: <defaults>
</compile_context>

<pallas_src>
import functools
import math

import jax
import jax.numpy as jnp
from jax.experimental import pallas as pl
from jax.experimental.pallas import tpu as pltpu

BN_EPS = 1e-5
IN_EPS = 1e-5
# BatchNorm(affine=False), inference mode, default running stats:
#   y = (x - 0) / sqrt(1 + eps)  -> folded into the conv weights.
BN_FOLD_SCALE = 1.0 / math.sqrt(1.0 + BN_EPS)

DEFAULT_TM = 512   # rows per M-tile for the fused matmul kernels (sweepable 256-1024)
VMEM_LIMIT = 32 * 1024 * 1024   # fits v5e/v6e/v7x scoped budgets with headroom


def _round_up(x, m):
    return ((x + m - 1) // m) * m


def _lane_pad(n):
    """Lane-friendly output width: multiples of 64 kept, else pad to mult of 128."""
    if n % 64 == 0:
        return n
    return _round_up(n, 128)


# --------------------------------------------------------------------------
# Pallas kernel 1: tiled fused matmul   out = act(A @ W + b)
# --------------------------------------------------------------------------
def _matmul_bias_act_kernel(a_ref, w_ref, b_ref, o_ref, *, activation):
    acc = jnp.dot(a_ref[...], w_ref[...], preferred_element_type=jnp.float32)
    y = acc + b_ref[...]
    if activation == "relu":
        y = jnp.maximum(y, 0.0)
    elif activation == "sigmoid":
        y = jax.nn.sigmoid(y)
    o_ref[...] = y


def fused_matmul(a, w, bias, activation=None, tm=DEFAULT_TM):
    """a: (M, K), w: (K, N), bias: (N,) -> act(a @ w + bias) as (M, N) f32."""
    M, K = a.shape
    K2, N = w.shape
    assert K == K2

    # Lane-pad the output channels (zero columns, sliced off below).
    n_pad = _lane_pad(N)
    if n_pad != N:
        w = jnp.pad(w, ((0, 0), (0, n_pad - N)))
        bias = jnp.pad(bias, (0, n_pad - N))

    # Pad the contraction dim to a sublane multiple (also fixes K=1 corner).
    k_pad = _round_up(K, 8)
    if k_pad != K:
        a = jnp.pad(a, ((0, 0), (0, k_pad - K)))
        w = jnp.pad(w, ((0, k_pad - K), (0, 0)))

    # Tile M (rows) -> software-pipelined grid.
    m_pad = _round_up(M, 8)
    tm_eff = min(tm, m_pad)
    m_pad = _round_up(m_pad, tm_eff)
    if m_pad != M:
        a = jnp.pad(a, ((0, m_pad - M), (0, 0)))

    a = a.astype(jnp.bfloat16)
    w = w.astype(jnp.bfloat16)
    bias = bias.reshape(1, n_pad).astype(jnp.float32)

    kernel = functools.partial(_matmul_bias_act_kernel, activation=activation)
    cost = pl.CostEstimate(
        flops=2 * m_pad * k_pad * n_pad,
        transcendentals=(m_pad * n_pad if activation == "sigmoid" else 0),
        bytes_accessed=(m_pad * k_pad * 2 + k_pad * n_pad * 2
                        + n_pad * 4 + m_pad * n_pad * 4),
    )
    out = pl.pallas_call(
        kernel,
        out_shape=jax.ShapeDtypeStruct((m_pad, n_pad), jnp.float32),
        grid=(m_pad // tm_eff,),
        in_specs=[
            pl.BlockSpec((tm_eff, k_pad), lambda i: (i, 0)),
            pl.BlockSpec((k_pad, n_pad), lambda i: (0, 0)),
            pl.BlockSpec((1, n_pad), lambda i: (0, 0)),
        ],
        out_specs=pl.BlockSpec((tm_eff, n_pad), lambda i: (i, 0)),
        compiler_params=pltpu.CompilerParams(
            dimension_semantics=("parallel",),
            vmem_limit_bytes=VMEM_LIMIT,
        ),
        cost_estimate=cost,
    )(a, w, bias)
    return out[:M, :N]


# --------------------------------------------------------------------------
# Pallas kernel 2: fused chain of dense (1x1-conv) layers in ONE kernel.
# Intermediate activations stay resident in VMEM/vregs (no HBM round trips).
# --------------------------------------------------------------------------
def _dense_chain_kernel(*refs, activations):
    a_ref = refs[0]
    o_ref = refs[-1]
    h = a_ref[...]
    for l, act in enumerate(activations):
        w = refs[1 + 2 * l][...]
        b = refs[2 + 2 * l][...]
        y = jnp.dot(h.astype(jnp.bfloat16), w,
                    preferred_element_type=jnp.float32) + b
        if act == "relu":
            y = jnp.maximum(y, 0.0)
        elif act == "sigmoid":
            y = jax.nn.sigmoid(y)
        h = y
    o_ref[...] = h


def dense_chain(x2d, weights, biases, activations, tm=DEFAULT_TM):
    """weights[l]: (C_l, C_{l+1}), biases[l]: (C_{l+1},). Only the final layer's
    output is lane-padded (and sliced off here)."""
    M, C0 = x2d.shape
    n_layers = len(weights)
    N = weights[-1].shape[1]
    n_pad = _lane_pad(N)

    ws, bs = [], []
    for l in range(n_layers):
        w = weights[l].astype(jnp.float32)
        b = biases[l].astype(jnp.float32)
        if l == n_layers - 1 and n_pad != N:
            w = jnp.pad(w, ((0, 0), (0, n_pad - N)))
            b = jnp.pad(b, (0, n_pad - N))
        ws.append(w.astype(jnp.bfloat16))
        bs.append(b.reshape(1, -1).astype(jnp.float32))

    m_pad = _round_up(M, 8)
    tm_eff = min(tm, m_pad)
    m_pad = _round_up(m_pad, tm_eff)
    a = x2d
    if m_pad != M:
        a = jnp.pad(a, ((0, m_pad - M), (0, 0)))
    a = a.astype(jnp.bfloat16)

    in_specs = [pl.BlockSpec((tm_eff, C0), lambda i: (i, 0))]
    operands = [a]
    flops = 0
    for w, b in zip(ws, bs):
        kin, kout = w.shape
        in_specs.append(pl.BlockSpec((kin, kout), lambda i: (0, 0)))
        in_specs.append(pl.BlockSpec((1, kout), lambda i: (0, 0)))
        operands.extend([w, b])
        flops += 2 * m_pad * kin * kout

    kernel = functools.partial(_dense_chain_kernel,
                               activations=tuple(activations))
    cost = pl.CostEstimate(
        flops=flops,
        transcendentals=(m_pad * n_pad if activations[-1] == "sigmoid" else 0),
        bytes_accessed=(m_pad * C0 * 2 + m_pad * n_pad * 4
                        + sum(w.size * 2 + b.size * 4 for w, b in zip(ws, bs))),
    )
    out = pl.pallas_call(
        kernel,
        out_shape=jax.ShapeDtypeStruct((m_pad, n_pad), jnp.float32),
        grid=(m_pad // tm_eff,),
        in_specs=in_specs,
        out_specs=pl.BlockSpec((tm_eff, n_pad), lambda i: (i, 0)),
        compiler_params=pltpu.CompilerParams(
            dimension_semantics=("parallel",),
            vmem_limit_bytes=VMEM_LIMIT,
        ),
        cost_estimate=cost,
    )(*operands)
    return out[:M, :N]


# --------------------------------------------------------------------------
# Conv2d wrapper: im2col (3x3 only) / direct reshape (1x1) + fused matmul
# --------------------------------------------------------------------------
def _im2col(x, kh, kw, stride, padding):
    """x: (B,H,W,C) -> patches (B,Ho,Wo,kh*kw*C); K index = (i*kw+j)*C + c.

    A single padded copy is made and kh*kw shifted strided views of it are
    concatenated (in bf16, so the duplicated traffic is halved).
    # TODO(synk): fully fuse im2col into the matmul kernel (K-tap grid axis
    # accumulating into a VMEM scratch) to remove the remaining kh*kw x HBM
    # duplication of activations — the last big bandwidth item from the review.
    """
    B, H, W, C = x.shape
    if padding:
        x = jnp.pad(x, ((0, 0), (padding, padding), (padding, padding), (0, 0)))
    Hp, Wp = H + 2 * padding, W + 2 * padding
    Ho = (Hp - kh) // stride + 1
    Wo = (Wp - kw) // stride + 1
    cols = []
    for i in range(kh):
        for j in range(kw):
            cols.append(x[:, i:i + stride * (Ho - 1) + 1:stride,
                             j:j + stride * (Wo - 1) + 1:stride, :])
    return jnp.concatenate(cols, axis=-1), Ho, Wo


def _dense_weight(w, cin, groups):
    """PyTorch conv weight (Co, Cin/groups, kh, kw) -> dense (kh*kw*Cin, Co).

    Grouped convs become ONE lane-dense matmul via a block-diagonal embedding;
    the zero blocks ride on otherwise-idle MXU columns."""
    co, cig, kh, kw = w.shape
    w = w.astype(jnp.float32)
    if groups == 1:
        return jnp.transpose(w, (2, 3, 1, 0)).reshape(kh * kw * cin, co)
    cog = co // groups
    wd = jnp.zeros((kh, kw, cin, co), jnp.float32)
    for g in range(groups):
        wg = jnp.transpose(w[g * cog:(g + 1) * cog], (2, 3, 1, 0))   # (kh,kw,cig,cog)
        wd = wd.at[:, :, g * cig:(g + 1) * cig, g * cog:(g + 1) * cog].set(wg)
    return wd.reshape(kh * kw * cin, co)


def conv_bn_act(x, w, bias=None, stride=1, padding=0, groups=1,
                batch_norm=False, activation=None):
    """Conv2d (+ folded BatchNorm(affine=False)) (+ activation). x: NHWC f32."""
    B, H, W_, Cin = x.shape
    Co, _, kh, kw = w.shape
    wm = _dense_weight(w, Cin, groups)
    b = jnp.zeros((Co,), jnp.float32) if bias is None else bias.astype(jnp.float32)
    if batch_norm:
        wm = wm * BN_FOLD_SCALE
        b = b * BN_FOLD_SCALE
    xb = x.astype(jnp.bfloat16)
    if kh == 1 and kw == 1 and stride == 1 and padding == 0:
        A = xb.reshape(B * H * W_, Cin)        # 1x1 conv: no im2col
        Ho, Wo = H, W_
    else:
        patches, Ho, Wo = _im2col(xb, kh, kw, stride, padding)
        A = patches.reshape(B * Ho * Wo, kh * kw * Cin)
    out = fused_matmul(A, wm, b, activation=activation)
    return out.reshape(B, Ho, Wo, Co)


# --------------------------------------------------------------------------
# Plain-JAX glue ops (cheap reshuffles / tiny reductions)
# --------------------------------------------------------------------------
def channel_shuffle_nhwc(x, groups):
    B, H, W, C = x.shape
    cpg = C // groups
    x = x.reshape(B, H, W, groups, cpg)
    x = jnp.transpose(x, (0, 1, 2, 4, 3))
    return x.reshape(B, H, W, C)


def instance_norm(x):
    mean = jnp.mean(x, axis=(1, 2), keepdims=True)
    var = jnp.mean((x - mean) ** 2, axis=(1, 2), keepdims=True)
    return (x - mean) / jnp.sqrt(var + IN_EPS)


def avg_pool(x, k):
    B, H, W, C = x.shape
    x = x.reshape(B, H // k, k, W // k, k, C)
    return x.mean(axis=(2, 4))


def bilinear_resize(x, oh, ow):
    """Matches F.interpolate(mode='bilinear', align_corners=False)."""
    B, H, W, C = x.shape

    def coords(o, n):
        scale = n / o
        src = (jnp.arange(o, dtype=jnp.float32) + 0.5) * scale - 0.5
        src = jnp.maximum(src, 0.0)
        i0 = jnp.floor(src).astype(jnp.int32)
        i0 = jnp.minimum(i0, n - 1)
        i1 = jnp.minimum(i0 + 1, n - 1)
        frac = src - i0.astype(jnp.float32)
        return i0, i1, frac

    y0, y1, fy = coords(oh, H)
    x0, x1, fx = coords(ow, W)
    fx = fx[None, None, :, None]
    fy = fy[None, :, None, None]

    r0 = x[:, y0]
    r1 = x[:, y1]
    top = r0[:, :, x0] * (1.0 - fx) + r0[:, :, x1] * fx
    bot = r1[:, :, x0] * (1.0 - fx) + r1[:, :, x1] * fx
    return top * (1.0 - fy) + bot * fy


def unfold2d(x, ws):
    """NHWC version of XFeatModel._unfold2d (channel order = (C, wy, wx))."""
    B, H, W, C = x.shape
    x = x.reshape(B, H // ws, ws, W // ws, ws, C)
    x = jnp.transpose(x, (0, 1, 3, 5, 2, 4))     # (B, H/ws, W/ws, C, ws, ws)
    return x.reshape(B, H // ws, W // ws, C * ws * ws)


# --------------------------------------------------------------------------
# Architecture (static config) + parameters (arrays only -> jit-friendly)
# --------------------------------------------------------------------------
# (cin, cout, kernel, stride, padding, groups, shuffle) per BasicLayer
ARCH = {
    "block1": ((1, 4, 3, 1, 1, 1, False), (4, 8, 3, 2, 1, 1, False),
               (8, 8, 3, 1, 1, 1, False), (8, 24, 3, 2, 1, 1, False)),
    "block2": ((24, 24, 3, 1, 1, 1, False), (24, 24, 3, 1, 1, 1, False)),
    "block3": ((24, 64, 3, 2, 1, 4, True), (64, 64, 3, 1, 1, 4, True),
               (64, 64, 1, 1, 0, 4, True)),
    "block4": ((64, 64, 3, 2, 1, 4, True), (64, 64, 3, 1, 1, 4, True),
               (64, 64, 3, 1, 1, 4, True)),
    "block5": ((64, 128, 3, 2, 1, 4, True), (128, 128, 3, 1, 1, 4, True),
               (128, 128, 3, 1, 1, 4, True), (128, 64, 1, 1, 0, 4, True)),
    "block_fusion": ((64, 64, 3, 1, 1, 4, True), (64, 64, 3, 1, 1, 4, True)),
    "heatmap_head": ((64, 64, 1, 1, 0, 1, False), (64, 64, 1, 1, 0, 1, False)),
    "keypoint_head": ((64, 64, 1, 1, 0, 1, False), (64, 64, 1, 1, 0, 1, False),
                      (64, 64, 1, 1, 0, 1, False)),
}


class ParamGen:
    def __init__(self, key):
        self.key = key

    def next(self, shape, scale):
        self.key, sub = jax.random.split(self.key)
        return jax.random.normal(sub, shape, jnp.float32) * scale


def init_params(key):
    pg = ParamGen(key)

    def conv_w(cin, cout, k, groups):
        fan_in = (cin // groups) * k * k
        return pg.next((cout, cin // groups, k, k), 1.0 / math.sqrt(fan_in))

    params = {name: [conv_w(ci, co, k, g) for (ci, co, k, _, _, g, _) in defs]
              for name, defs in ARCH.items()}
    params["skip1_w"] = pg.next((24, 1, 1, 1), 1.0)
    params["skip1_b"] = pg.next((24,), 0.1)
    params["fusion_w"] = pg.next((64, 64, 1, 1), 1.0 / 8.0)
    params["fusion_b"] = pg.next((64,), 0.1)
    params["heatmap_w"] = pg.next((1, 64, 1, 1), 1.0 / 8.0)
    params["heatmap_b"] = pg.next((1,), 0.1)
    params["keypoint_w"] = pg.next((65, 64, 1, 1), 1.0 / 8.0)
    params["keypoint_b"] = pg.next((65,), 0.1)
    # TODO(synk): fine_matcher (Linear/BatchNorm1d stack) is defined in the
    # PyTorch __init__ but never used in forward(); omitted here.
    return params


# --------------------------------------------------------------------------
# Model forward
# --------------------------------------------------------------------------
def seq_basic(ws, defs, x):
    for w, (_, _, _, stride, padding, groups, shuffle) in zip(ws, defs):
        x = conv_bn_act(x, w, bias=None, stride=stride, padding=padding,
                        groups=groups, batch_norm=True, activation="relu")
        if shuffle and groups > 1:
            x = channel_shuffle_nhwc(x, groups)
    return x


def apply_head(x, layer_ws, final_w, final_b, final_act):
    """Chain of 1x1 BasicLayers + final 1x1 conv, fused into ONE Pallas kernel."""
    B, H, W, C = x.shape
    weights, biases, acts = [], [], []
    for w in layer_ws:
        weights.append(_dense_weight(w, w.shape[1], 1) * BN_FOLD_SCALE)
        biases.append(jnp.zeros((w.shape[0],), jnp.float32))
        acts.append("relu")
    weights.append(_dense_weight(final_w, final_w.shape[1], 1))
    biases.append(final_b.astype(jnp.float32))
    acts.append(final_act)
    out = dense_chain(x.reshape(B * H * W, C), weights, biases, acts)
    return out.reshape(B, H, W, final_w.shape[0])


def xfeat_forward(params, x_nchw):
    x = jnp.transpose(x_nchw, (0, 2, 3, 1)).astype(jnp.float32)   # NCHW -> NHWC
    x = jnp.mean(x, axis=-1, keepdims=True)
    x = instance_norm(x)

    x1 = seq_basic(params["block1"], ARCH["block1"], x)
    skip = conv_bn_act(avg_pool(x, 4), params["skip1_w"], bias=params["skip1_b"])
    x2 = seq_basic(params["block2"], ARCH["block2"], x1 + skip)
    x3 = seq_basic(params["block3"], ARCH["block3"], x2)
    x4 = seq_basic(params["block4"], ARCH["block4"], x3)
    x5 = seq_basic(params["block5"], ARCH["block5"], x4)

    H3, W3 = x3.shape[1], x3.shape[2]
    x4u = bilinear_resize(x4, H3, W3)
    x5u = bilinear_resize(x5, H3, W3)

    f = seq_basic(params["block_fusion"], ARCH["block_fusion"], x3 + x4u + x5u)
    feats = conv_bn_act(f, params["fusion_w"], bias=params["fusion_b"])

    heatmap = apply_head(feats, params["heatmap_head"],
                         params["heatmap_w"], params["heatmap_b"], "sigmoid")

    kx = unfold2d(x, 8)
    keypoints = apply_head(kx, params["keypoint_head"],
                           params["keypoint_w"], params["keypoint_b"], None)

    to_nchw = lambda t: jnp.transpose(t, (0, 3, 1, 2))
    return to_nchw(feats), to_nchw(keypoints), to_nchw(heatmap)


# --------------------------------------------------------------------------
if __name__ == "__main__":
    key = jax.random.PRNGKey(0)
    pkey, xkey = jax.random.split(key)
    params = init_params(pkey)

    # small image: B=2, C=3, H=W=32 -> feats (2,64,4,4), kpts (2,65,4,4), heat (2,1,4,4)
    x = jax.random.normal(xkey, (2, 3, 32, 32), jnp.float32)

    forward = jax.jit(xfeat_forward)
    feats, keypoints, heatmap = forward(params, x)
    jax.block_until_ready((feats, keypoints, heatmap))

    assert feats.shape == (2, 64, 4, 4)
    assert keypoints.shape == (2, 65, 4, 4)
    assert heatmap.shape == (2, 1, 4, 4)
    assert bool(jnp.all(jnp.isfinite(feats)))
    assert bool(jnp.all(jnp.isfinite(keypoints)))
    assert bool(jnp.all(heatmap >= 0.0)) and bool(jnp.all(heatmap <= 1.0))
    print("KERNEL_OK")
</pallas_src>

<mosaic_0001>
module attributes {stable_mosaic.version = 11 : i64} {
  func.func @_matmul_bias_act_kernel(%arg0: i32, %arg1: memref<512x16xbf16, #tpu.memory_space<vmem>>, %arg2: memref<16x128xbf16, #tpu.memory_space<vmem>>, %arg3: memref<1x128xf32, #tpu.memory_space<vmem>>, %arg4: memref<512x128xf32, #tpu.memory_space<vmem>>) attributes {dimension_semantics = [#tpu.dimension_semantics<parallel>], iteration_bounds = array<i64: 4>, scalar_prefetch = 0 : i64, scratch_operands = 0 : i64, tpu.core_type = #tpu.core_type<tc>, window_params = [{transform_indices = @transform_0, window_bounds = array<i64: 512, 16>}, {pipeline_mode = #tpu.pipeline_mode<synchronous>, transform_indices = @transform_1, window_bounds = array<i64: 16, 128>}, {pipeline_mode = #tpu.pipeline_mode<synchronous>, transform_indices = @transform_2, window_bounds = array<i64: 1, 128>}, {transform_indices = @transform_3, window_bounds = array<i64: 512, 128>}]} {
    %c0 = arith.constant 0 : index
    %c0_0 = arith.constant 0 : index
    %0 = vector.load %arg1[%c0, %c0_0] : memref<512x16xbf16, #tpu.memory_space<vmem>>, vector<512x16xbf16>
    %c0_1 = arith.constant 0 : index
    %c0_2 = arith.constant 0 : index
    %1 = vector.load %arg2[%c0_1, %c0_2] : memref<16x128xbf16, #tpu.memory_space<vmem>>, vector<16x128xbf16>
    %cst = arith.constant dense<0.000000e+00> : vector<512x128xf32>
    %2 = tpu.matmul %0, %1, %cst {dimension_numbers = #tpu.dot_dimension_numbers<[1], [0], [0], [1], [0, 0, 1, 1], [], []>} : vector<512x16xbf16>, vector<16x128xbf16>, vector<512x128xf32> -> vector<512x128xf32>
    %c0_3 = arith.constant 0 : index
    %c0_4 = arith.constant 0 : index
    %3 = vector.load %arg3[%c0_3, %c0_4] : memref<1x128xf32, #tpu.memory_space<vmem>>, vector<1x128xf32>
    %4 = vector.broadcast %3 : vector<1x128xf32> to vector<512x128xf32>
    %5 = arith.addf %2, %4 : vector<512x128xf32>
    %cst_5 = arith.constant 0.000000e+00 : f32
    %6 = vector.broadcast %cst_5 : f32 to vector<512x128xf32>
    %7 = arith.maximumf %5, %6 : vector<512x128xf32>
    %c0_6 = arith.constant 0 : index
    %c0_7 = arith.constant 0 : index
    %8 = vector.load %arg4[%c0_6, %c0_7] : memref<512x128xf32, #tpu.memory_space<vmem>>, vector<512x128xf32>
    tpu.vector_store %arg4[%c0_6, %c0_7], %7 {strides = array<i32>} : memref<512x128xf32, #tpu.memory_space<vmem>>, vector<512x128xf32>,
    return
  }
  func.func @transform_0(%arg0: i32) -> (i32, i32) {
    %c0_i32 = arith.constant 0 : i32
    %c0_i32_0 = arith.constant 0 : i32
    return %arg0, %c0_i32 : i32, i32
  }
  func.func @transform_1(%arg0: i32) -> (i32, i32) {
    %c0_i32 = arith.constant 0 : i32
    %c0_i32_0 = arith.constant 0 : i32
    %c0_i32_1 = arith.constant 0 : i32
    return %c0_i32, %c0_i32_0 : i32, i32
  }
  func.func @transform_2(%arg0: i32) -> (i32, i32) {
    %c0_i32 = arith.constant 0 : i32
    %c0_i32_0 = arith.constant 0 : i32
    %c0_i32_1 = arith.constant 0 : i32
    return %c0_i32, %c0_i32_0 : i32, i32
  }
  func.func @transform_3(%arg0: i32) -> (i32, i32) {
    %c0_i32 = arith.constant 0 : i32
    %c0_i32_0 = arith.constant 0 : i32
    return %arg0, %c0_i32 : i32, i32
  }
}

module attributes {stable_mosaic.version = 11 : i64} {
  func.func @_matmul_bias_act_kernel(%arg0: i32, %arg1: memref<512x40xbf16, #tpu.memory_space<vmem>>, %arg2: memref<40x128xbf16, #tpu.memory_space<vmem>>, %arg3: memref<1x128xf32, #tpu.memory_space<vmem>>, %arg4: memref<512x128xf32, #tpu.memory_space<vmem>>) attributes {dimension_semantics = [#tpu.dimension_semantics<parallel>], iteration_bounds = array<i64: 1>, scalar_prefetch = 0 : i64, scratch_operands = 0 : i64, tpu.core_type = #tpu.core_type<tc>, window_params = [{transform_indices = @transform_0, window_bounds = array<i64: 512, 40>}, {pipeline_mode = #tpu.pipeline_mode<synchronous>, transform_indices = @transform_1, window_bounds = array<i64: 40, 128>}, {pipeline_mode = #tpu.pipeline_mode<synchronous>, transform_indices = @transform_2, window_bounds = array<i64: 1, 128>}, {transform_indices = @transform_3, window_bounds = array<i64: 512, 128>}]} {
    %c0 = arith.constant 0 : index
    %c0_0 = arith.constant 0 : index
    %0 = vector.load %arg1[%c0, %c0_0] : memref<512x40xbf16, #tpu.memory_space<vmem>>, vector<512x40xbf16>
    %c0_1 = arith.constant 0 : index
    %c0_2 = arith.constant 0 : index
    %1 = vector.load %arg2[%c0_1, %c0_2] : memref<40x128xbf16, #tpu.memory_space<vmem>>, vector<40x128xbf16>
    %cst = arith.constant dense<0.000000e+00> : vector<512x128xf32>
    %2 = tpu.matmul %0, %1, %cst {dimension_numbers = #tpu.dot_dimension_numbers<[1], [0], [0], [1], [0, 0, 1, 1], [], []>} : vector<512x40xbf16>, vector<40x128xbf16>, vector<512x128xf32> -> vector<512x128xf32>
    %c0_3 = arith.constant 0 : index
    %c0_4 = arith.constant 0 : index
    %3 = vector.load %arg3[%c0_3, %c0_4] : memref<1x128xf32, #tpu.memory_space<vmem>>, vector<1x128xf32>
    %4 = vector.broadcast %3 : vector<1x128xf32> to vector<512x128xf32>
    %5 = arith.addf %2, %4 : vector<512x128xf32>
    %cst_5 = arith.constant 0.000000e+00 : f32
    %6 = vector.broadcast %cst_5 : f32 to vector<512x128xf32>
    %7 = arith.maximumf %5, %6 : vector<512x128xf32>
    %c0_6 = arith.constant 0 : index
    %c0_7 = arith.constant 0 : index
    %8 = vector.load %arg4[%c0_6, %c0_7] : memref<512x128xf32, #tpu.memory_space<vmem>>, vector<512x128xf32>
    tpu.vector_store %arg4[%c0_6, %c0_7], %7 {strides = array<i32>} : memref<512x128xf32, #tpu.memory_space<vmem>>, vector<512x128xf32>,
    return
  }
  func.func @transform_0(%arg0: i32) -> (i32, i32) {
    %c0_i32 = arith.constant 0 : i32
    %c0_i32_0 = arith.constant 0 : i32
    return %arg0, %c0_i32 : i32, i32
  }
  func.func @transform_1(%arg0: i32) -> (i32, i32) {
    %c0_i32 = arith.constant 0 : i32
    %c0_i32_0 = arith.constant 0 : i32
    %c0_i32_1 = arith.constant 0 : i32
    return %c0_i32, %c0_i32_0 : i32, i32
  }
  func.func @transform_2(%arg0: i32) -> (i32, i32) {
    %c0_i32 = arith.constant 0 : i32
    %c0_i32_0 = arith.constant 0 : i32
    %c0_i32_1 = arith.constant 0 : i32
    return %c0_i32, %c0_i32_0 : i32, i32
  }
  func.func @transform_3(%arg0: i32) -> (i32, i32) {
    %c0_i32 = arith.constant 0 : i32
    %c0_i32_0 = arith.constant 0 : i32
    return %arg0, %c0_i32 : i32, i32
  }
}

module attributes {stable_mosaic.version = 11 : i64} {
  func.func @_matmul_bias_act_kernel(%arg0: i32, %arg1: memref<512x72xbf16, #tpu.memory_space<vmem>>, %arg2: memref<72x128xbf16, #tpu.memory_space<vmem>>, %arg3: memref<1x128xf32, #tpu.memory_space<vmem>>, %arg4: memref<512x128xf32, #tpu.memory_space<vmem>>) attributes {dimension_semantics = [#tpu.dimension_semantics<parallel>], iteration_bounds = array<i64: 1>, scalar_prefetch = 0 : i64, scratch_operands = 0 : i64, tpu.core_type = #tpu.core_type<tc>, window_params = [{transform_indices = @transform_0, window_bounds = array<i64: 512, 72>}, {pipeline_mode = #tpu.pipeline_mode<synchronous>, transform_indices = @transform_1, window_bounds = array<i64: 72, 128>}, {pipeline_mode = #tpu.pipeline_mode<synchronous>, transform_indices = @transform_2, window_bounds = array<i64: 1, 128>}, {transform_indices = @transform_3, window_bounds = array<i64: 512, 128>}]} {
    %c0 = arith.constant 0 : index
    %c0_0 = arith.constant 0 : index
    %0 = vector.load %arg1[%c0, %c0_0] : memref<512x72xbf16, #tpu.memory_space<vmem>>, vector<512x72xbf16>
    %c0_1 = arith.constant 0 : index
    %c0_2 = arith.constant 0 : index
    %1 = vector.load %arg2[%c0_1, %c0_2] : memref<72x128xbf16, #tpu.memory_space<vmem>>, vector<72x128xbf16>
    %cst = arith.constant dense<0.000000e+00> : vector<512x128xf32>
    %2 = tpu.matmul %0, %1, %cst {dimension_numbers = #tpu.dot_dimension_numbers<[1], [0], [0], [1], [0, 0, 1, 1], [], []>} : vector<512x72xbf16>, vector<72x128xbf16>, vector<512x128xf32> -> vector<512x128xf32>
    %c0_3 = arith.constant 0 : index
    %c0_4 = arith.constant 0 : index
    %3 = vector.load %arg3[%c0_3, %c0_4] : memref<1x128xf32, #tpu.memory_space<vmem>>, vector<1x128xf32>
    %4 = vector.broadcast %3 : vector<1x128xf32> to vector<512x128xf32>
    %5 = arith.addf %2, %4 : vector<512x128xf32>
    %cst_5 = arith.constant 0.000000e+00 : f32
    %6 = vector.broadcast %cst_5 : f32 to vector<512x128xf32>
    %7 = arith.maximumf %5, %6 : vector<512x128xf32>
    %c0_6 = arith.constant 0 : index
    %c0_7 = arith.constant 0 : index
    %8 = vector.load %arg4[%c0_6, %c0_7] : memref<512x128xf32, #tpu.memory_space<vmem>>, vector<512x128xf32>
    tpu.vector_store %arg4[%c0_6, %c0_7], %7 {strides = array<i32>} : memref<512x128xf32, #tpu.memory_space<vmem>>, vector<512x128xf32>,
    return
  }
  func.func @transform_0(%arg0: i32) -> (i32, i32) {
    %c0_i32 = arith.constant 0 : i32
    %c0_i32_0 = arith.constant 0 : i32
    return %arg0, %c0_i32 : i32, i32
  }
  func.func @transform_1(%arg0: i32) -> (i32, i32) {
    %c0_i32 = arith.constant 0 : i32
    %c0_i32_0 = arith.constant 0 : i32
    %c0_i32_1 = arith.constant 0 : i32
    return %c0_i32, %c0_i32_0 : i32, i32
  }
  func.func @transform_2(%arg0: i32) -> (i32, i32) {
    %c0_i32 = arith.constant 0 : i32
    %c0_i32_0 = arith.constant 0 : i32
    %c0_i32_1 = arith.constant 0 : i32
    return %c0_i32, %c0_i32_0 : i32, i32
  }
  func.func @transform_3(%arg0: i32) -> (i32, i32) {
    %c0_i32 = arith.constant 0 : i32
    %c0_i32_0 = arith.constant 0 : i32
    return %arg0, %c0_i32 : i32, i32
  }
}

module attributes {stable_mosaic.version = 11 : i64} {
  func.func @_matmul_bias_act_kernel(%arg0: i32, %arg1: memref<128x72xbf16, #tpu.memory_space<vmem>>, %arg2: memref<72x128xbf16, #tpu.memory_space<vmem>>, %arg3: memref<1x128xf32, #tpu.memory_space<vmem>>, %arg4: memref<128x128xf32, #tpu.memory_space<vmem>>) attributes {dimension_semantics = [#tpu.dimension_semantics<parallel>], iteration_bounds = array<i64: 1>, scalar_prefetch = 0 : i64, scratch_operands = 0 : i64, tpu.core_type = #tpu.core_type<tc>, window_params = [{transform_indices = @transform_0, window_bounds = array<i64: 128, 72>}, {pipeline_mode = #tpu.pipeline_mode<synchronous>, transform_indices = @transform_1, window_bounds = array<i64: 72, 128>}, {pipeline_mode = #tpu.pipeline_mode<synchronous>, transform_indices = @transform_2, window_bounds = array<i64: 1, 128>}, {transform_indices = @transform_3, window_bounds = array<i64: 128, 128>}]} {
    %c0 = arith.constant 0 : index
    %c0_0 = arith.constant 0 : index
    %0 = vector.load %arg1[%c0, %c0_0] : memref<128x72xbf16, #tpu.memory_space<vmem>>, vector<128x72xbf16>
    %c0_1 = arith.constant 0 : index
    %c0_2 = arith.constant 0 : index
    %1 = vector.load %arg2[%c0_1, %c0_2] : memref<72x128xbf16, #tpu.memory_space<vmem>>, vector<72x128xbf16>
    %cst = arith.constant dense<0.000000e+00> : vector<128x128xf32>
    %2 = tpu.matmul %0, %1, %cst {dimension_numbers = #tpu.dot_dimension_numbers<[1], [0], [0], [1], [0, 0, 1, 1], [], []>} : vector<128x72xbf16>, vector<72x128xbf16>, vector<128x128xf32> -> vector<128x128xf32>
    %c0_3 = arith.constant 0 : index
    %c0_4 = arith.constant 0 : index
    %3 = vector.load %arg3[%c0_3, %c0_4] : memref<1x128xf32, #tpu.memory_space<vmem>>, vector<1x128xf32>
    %4 = vector.broadcast %3 : vector<1x128xf32> to vector<128x128xf32>
    %5 = arith.addf %2, %4 : vector<128x128xf32>
    %cst_5 = arith.constant 0.000000e+00 : f32
    %6 = vector.broadcast %cst_5 : f32 to vector<128x128xf32>
    %7 = arith.maximumf %5, %6 : vector<128x128xf32>
    %c0_6 = arith.constant 0 : index
    %c0_7 = arith.constant 0 : index
    %8 = vector.load %arg4[%c0_6, %c0_7] : memref<128x128xf32, #tpu.memory_space<vmem>>, vector<128x128xf32>
    tpu.vector_store %arg4[%c0_6, %c0_7], %7 {strides = array<i32>} : memref<128x128xf32, #tpu.memory_space<vmem>>, vector<128x128xf32>,
    return
  }
  func.func @transform_0(%arg0: i32) -> (i32, i32) {
    %c0_i32 = arith.constant 0 : i32
    %c0_i32_0 = arith.constant 0 : i32
    return %arg0, %c0_i32 : i32, i32
  }
  func.func @transform_1(%arg0: i32) -> (i32, i32) {
    %c0_i32 = arith.constant 0 : i32
    %c0_i32_0 = arith.constant 0 : i32
    %c0_i32_1 = arith.constant 0 : i32
    return %c0_i32, %c0_i32_0 : i32, i32
  }
  func.func @transform_2(%arg0: i32) -> (i32, i32) {
    %c0_i32 = arith.constant 0 : i32
    %c0_i32_0 = arith.constant 0 : i32
    %c0_i32_1 = arith.constant 0 : i32
    return %c0_i32, %c0_i32_0 : i32, i32
  }
  func.func @transform_3(%arg0: i32) -> (i32, i32) {
    %c0_i32 = arith.constant 0 : i32
    %c0_i32_0 = arith.constant 0 : i32
    return %arg0, %c0_i32 : i32, i32
  }
}

module attributes {stable_mosaic.version = 11 : i64} {
  func.func @_matmul_bias_act_kernel(%arg0: i32, %arg1: memref<128x8xbf16, #tpu.memory_space<vmem>>, %arg2: memref<8x128xbf16, #tpu.memory_space<vmem>>, %arg3: memref<1x128xf32, #tpu.memory_space<vmem>>, %arg4: memref<128x128xf32, #tpu.memory_space<vmem>>) attributes {dimension_semantics = [#tpu.dimension_semantics<parallel>], iteration_bounds = array<i64: 1>, scalar_prefetch = 0 : i64, scratch_operands = 0 : i64, tpu.core_type = #tpu.core_type<tc>, window_params = [{transform_indices = @transform_0, window_bounds = array<i64: 128, 8>}, {pipeline_mode = #tpu.pipeline_mode<synchronous>, transform_indices = @transform_1, window_bounds = array<i64: 8, 128>}, {pipeline_mode = #tpu.pipeline_mode<synchronous>, transform_indices = @transform_2, window_bounds = array<i64: 1, 128>}, {transform_indices = @transform_3, window_bounds = array<i64: 128, 128>}]} {
    %c0 = arith.constant 0 : index
    %c0_0 = arith.constant 0 : index
    %0 = vector.load %arg1[%c0, %c0_0] : memref<128x8xbf16, #tpu.memory_space<vmem>>, vector<128x8xbf16>
    %c0_1 = arith.constant 0 : index
    %c0_2 = arith.constant 0 : index
    %1 = vector.load %arg2[%c0_1, %c0_2] : memref<8x128xbf16, #tpu.memory_space<vmem>>, vector<8x128xbf16>
    %cst = arith.constant dense<0.000000e+00> : vector<128x128xf32>
    %2 = tpu.matmul %0, %1, %cst {dimension_numbers = #tpu.dot_dimension_numbers<[1], [0], [0], [1], [0, 0, 1, 1], [], []>} : vector<128x8xbf16>, vector<8x128xbf16>, vector<128x128xf32> -> vector<128x128xf32>
    %c0_3 = arith.constant 0 : index
    %c0_4 = arith.constant 0 : index
    %3 = vector.load %arg3[%c0_3, %c0_4] : memref<1x128xf32, #tpu.memory_space<vmem>>, vector<1x128xf32>
    %4 = vector.broadcast %3 : vector<1x128xf32> to vector<128x128xf32>
    %5 = arith.addf %2, %4 : vector<128x128xf32>
    %c0_5 = arith.constant 0 : index
    %c0_6 = arith.constant 0 : index
    %6 = vector.load %arg4[%c0_5, %c0_6] : memref<128x128xf32, #tpu.memory_space<vmem>>, vector<128x128xf32>
    tpu.vector_store %arg4[%c0_5, %c0_6], %5 {strides = array<i32>} : memref<128x128xf32, #tpu.memory_space<vmem>>, vector<128x128xf32>,
    return
  }
  func.func @transform_0(%arg0: i32) -> (i32, i32) {
    %c0_i32 = arith.constant 0 : i32
    %c0_i32_0 = arith.constant 0 : i32
    return %arg0, %c0_i32 : i32, i32
  }
  func.func @transform_1(%arg0: i32) -> (i32, i32) {
    %c0_i32 = arith.constant 0 : i32
    %c0_i32_0 = arith.constant 0 : i32
    %c0_i32_1 = arith.constant 0 : i32
    return %c0_i32, %c0_i32_0 : i32, i32
  }
  func.func @transform_2(%arg0: i32) -> (i32, i32) {
    %c0_i32 = arith.constant 0 : i32
    %c0_i32_0 = arith.constant 0 : i32
    %c0_i32_1 = arith.constant 0 : i32
    return %c0_i32, %c0_i32_0 : i32, i32
  }
  func.func @transform_3(%arg0: i32) -> (i32, i32) {
    %c0_i32 = arith.constant 0 : i32
    %c0_i32_0 = arith.constant 0 : i32
    return %arg0, %c0_i32 : i32, i32
  }
}

module attributes {stable_mosaic.version = 11 : i64} {
  func.func @_matmul_bias_act_kernel(%arg0: i32, %arg1: memref<128x216xbf16, #tpu.memory_space<vmem>>, %arg2: memref<216x128xbf16, #tpu.memory_space<vmem>>, %arg3: memref<1x128xf32, #tpu.memory_space<vmem>>, %arg4: memref<128x128xf32, #tpu.memory_space<vmem>>) attributes {dimension_semantics = [#tpu.dimension_semantics<parallel>], iteration_bounds = array<i64: 1>, scalar_prefetch = 0 : i64, scratch_operands = 0 : i64, tpu.core_type = #tpu.core_type<tc>, window_params = [{transform_indices = @transform_0, window_bounds = array<i64: 128, 216>}, {pipeline_mode = #tpu.pipeline_mode<synchronous>, transform_indices = @transform_1, window_bounds = array<i64: 216, 128>}, {pipeline_mode = #tpu.pipeline_mode<synchronous>, transform_indices = @transform_2, window_bounds = array<i64: 1, 128>}, {transform_indices = @transform_3, window_bounds = array<i64: 128, 128>}]} {
    %c0 = arith.constant 0 : index
    %c0_0 = arith.constant 0 : index
    %0 = vector.load %arg1[%c0, %c0_0] : memref<128x216xbf16, #tpu.memory_space<vmem>>, vector<128x216xbf16>
    %c0_1 = arith.constant 0 : index
    %c0_2 = arith.constant 0 : index
    %1 = vector.load %arg2[%c0_1, %c0_2] : memref<216x128xbf16, #tpu.memory_space<vmem>>, vector<216x128xbf16>
    %cst = arith.constant dense<0.000000e+00> : vector<128x128xf32>
    %2 = tpu.matmul %0, %1, %cst {dimension_numbers = #tpu.dot_dimension_numbers<[1], [0], [0], [1], [0, 0, 1, 1], [], []>} : vector<128x216xbf16>, vector<216x128xbf16>, vector<128x128xf32> -> vector<128x128xf32>
    %c0_3 = arith.constant 0 : index
    %c0_4 = arith.constant 0 : index
    %3 = vector.load %arg3[%c0_3, %c0_4] : memref<1x128xf32, #tpu.memory_space<vmem>>, vector<1x128xf32>
    %4 = vector.broadcast %3 : vector<1x128xf32> to vector<128x128xf32>
    %5 = arith.addf %2, %4 : vector<128x128xf32>
    %cst_5 = arith.constant 0.000000e+00 : f32
    %6 = vector.broadcast %cst_5 : f32 to vector<128x128xf32>
    %7 = arith.maximumf %5, %6 : vector<128x128xf32>
    %c0_6 = arith.constant 0 : index
    %c0_7 = arith.constant 0 : index
    %8 = vector.load %arg4[%c0_6, %c0_7] : memref<128x128xf32, #tpu.memory_space<vmem>>, vector<128x128xf32>
    tpu.vector_store %arg4[%c0_6, %c0_7], %7 {strides = array<i32>} : memref<128x128xf32, #tpu.memory_space<vmem>>, vector<128x128xf32>,
    return
  }
  func.func @transform_0(%arg0: i32) -> (i32, i32) {
    %c0_i32 = arith.constant 0 : i32
    %c0_i32_0 = arith.constant 0 : i32
    return %arg0, %c0_i32 : i32, i32
  }
  func.func @transform_1(%arg0: i32) -> (i32, i32) {
    %c0_i32 = arith.constant 0 : i32
    %c0_i32_0 = arith.constant 0 : i32
    %c0_i32_1 = arith.constant 0 : i32
    return %c0_i32, %c0_i32_0 : i32, i32
  }
  func.func @transform_2(%arg0: i32) -> (i32, i32) {
    %c0_i32 = arith.constant 0 : i32
    %c0_i32_0 = arith.constant 0 : i32
    %c0_i32_1 = arith.constant 0 : i32
    return %c0_i32, %c0_i32_0 : i32, i32
  }
  func.func @transform_3(%arg0: i32) -> (i32, i32) {
    %c0_i32 = arith.constant 0 : i32
    %c0_i32_0 = arith.constant 0 : i32
    return %arg0, %c0_i32 : i32, i32
  }
}

module attributes {stable_mosaic.version = 11 : i64} {
  func.func @_matmul_bias_act_kernel(%arg0: i32, %arg1: memref<32x216xbf16, #tpu.memory_space<vmem>>, %arg2: memref<216x64xbf16, #tpu.memory_space<vmem>>, %arg3: memref<1x64xf32, #tpu.memory_space<vmem>>, %arg4: memref<32x64xf32, #tpu.memory_space<vmem>>) attributes {dimension_semantics = [#tpu.dimension_semantics<parallel>], iteration_bounds = array<i64: 1>, scalar_prefetch = 0 : i64, scratch_operands = 0 : i64, tpu.core_type = #tpu.core_type<tc>, window_params = [{transform_indices = @transform_0, window_bounds = array<i64: 32, 216>}, {pipeline_mode = #tpu.pipeline_mode<synchronous>, transform_indices = @transform_1, window_bounds = array<i64: 216, 64>}, {pipeline_mode = #tpu.pipeline_mode<synchronous>, transform_indices = @transform_2, window_bounds = array<i64: 1, 64>}, {transform_indices = @transform_3, window_bounds = array<i64: 32, 64>}]} {
    %c0 = arith.constant 0 : index
    %c0_0 = arith.constant 0 : index
    %0 = vector.load %arg1[%c0, %c0_0] : memref<32x216xbf16, #tpu.memory_space<vmem>>, vector<32x216xbf16>
    %c0_1 = arith.constant 0 : index
    %c0_2 = arith.constant 0 : index
    %1 = vector.load %arg2[%c0_1, %c0_2] : memref<216x64xbf16, #tpu.memory_space<vmem>>, vector<216x64xbf16>
    %cst = arith.constant dense<0.000000e+00> : vector<32x64xf32>
    %2 = tpu.matmul %0, %1, %cst {dimension_numbers = #tpu.dot_dimension_numbers<[1], [0], [0], [1], [0, 0, 1, 1], [], []>} : vector<32x216xbf16>, vector<216x64xbf16>, vector<32x64xf32> -> vector<32x64xf32>
    %c0_3 = arith.constant 0 : index
    %c0_4 = arith.constant 0 : index
    %3 = vector.load %arg3[%c0_3, %c0_4] : memref<1x64xf32, #tpu.memory_space<vmem>>, vector<1x64xf32>
    %4 = vector.broadcast %3 : vector<1x64xf32> to vector<32x64xf32>
    %5 = arith.addf %2, %4 : vector<32x64xf32>
    %cst_5 = arith.constant 0.000000e+00 : f32
    %6 = vector.broadcast %cst_5 : f32 to vector<32x64xf32>
    %7 = arith.maximumf %5, %6 : vector<32x64xf32>
    %c0_6 = arith.constant 0 : index
    %c0_7 = arith.constant 0 : index
    %8 = vector.load %arg4[%c0_6, %c0_7] : memref<32x64xf32, #tpu.memory_space<vmem>>, vector<32x64xf32>
    tpu.vector_store %arg4[%c0_6, %c0_7], %7 {strides = array<i32>} : memref<32x64xf32, #tpu.memory_space<vmem>>, vector<32x64xf32>,
    return
  }
  func.func @transform_0(%arg0: i32) -> (i32, i32) {
    %c0_i32 = arith.constant 0 : i32
    %c0_i32_0 = arith.constant 0 : i32
    return %arg0, %c0_i32 : i32, i32
  }
  func.func @transform_1(%arg0: i32) -> (i32, i32) {
    %c0_i32 = arith.constant 0 : i32
    %c0_i32_0 = arith.constant 0 : i32
    %c0_i32_1 = arith.constant 0 : i32
    return %c0_i32, %c0_i32_0 : i32, i32
  }
  func.func @transform_2(%arg0: i32) -> (i32, i32) {
    %c0_i32 = arith.constant 0 : i32
    %c0_i32_0 = arith.constant 0 : i32
    %c0_i32_1 = arith.constant 0 : i32
    return %c0_i32, %c0_i32_0 : i32, i32
  }
  func.func @transform_3(%arg0: i32) -> (i32, i32) {
    %c0_i32 = arith.constant 0 : i32
    %c0_i32_0 = arith.constant 0 : i32
    return %arg0, %c0_i32 : i32, i32
  }
}

module attributes {stable_mosaic.version = 11 : i64} {
  func.func @_matmul_bias_act_kernel(%arg0: i32, %arg1: memref<32x576xbf16, #tpu.memory_space<vmem>>, %arg2: memref<576x64xbf16, #tpu.memory_space<vmem>>, %arg3: memref<1x64xf32, #tpu.memory_space<vmem>>, %arg4: memref<32x64xf32, #tpu.memory_space<vmem>>) attributes {dimension_semantics = [#tpu.dimension_semantics<parallel>], iteration_bounds = array<i64: 1>, scalar_prefetch = 0 : i64, scratch_operands = 0 : i64, tpu.core_type = #tpu.core_type<tc>, window_params = [{transform_indices = @transform_0, window_bounds = array<i64: 32, 576>}, {pipeline_mode = #tpu.pipeline_mode<synchronous>, transform_indices = @transform_1, window_bounds = array<i64: 576, 64>}, {pipeline_mode = #tpu.pipeline_mode<synchronous>, transform_indices = @transform_2, window_bounds = array<i64: 1, 64>}, {transform_indices = @transform_3, window_bounds = array<i64: 32, 64>}]} {
    %c0 = arith.constant 0 : index
    %c0_0 = arith.constant 0 : index
    %0 = vector.load %arg1[%c0, %c0_0] : memref<32x576xbf16, #tpu.memory_space<vmem>>, vector<32x576xbf16>
    %c0_1 = arith.constant 0 : index
    %c0_2 = arith.constant 0 : index
    %1 = vector.load %arg2[%c0_1, %c0_2] : memref<576x64xbf16, #tpu.memory_space<vmem>>, vector<576x64xbf16>
    %cst = arith.constant dense<0.000000e+00> : vector<32x64xf32>
    %2 = tpu.matmul %0, %1, %cst {dimension_numbers = #tpu.dot_dimension_numbers<[1], [0], [0], [1], [0, 0, 1, 1], [], []>} : vector<32x576xbf16>, vector<576x64xbf16>, vector<32x64xf32> -> vector<32x64xf32>
    %c0_3 = arith.constant 0 : index
    %c0_4 = arith.constant 0 : index
    %3 = vector.load %arg3[%c0_3, %c0_4] : memref<1x64xf32, #tpu.memory_space<vmem>>, vector<1x64xf32>
    %4 = vector.broadcast %3 : vector<1x64xf32> to vector<32x64xf32>
    %5 = arith.addf %2, %4 : vector<32x64xf32>
    %cst_5 = arith.constant 0.000000e+00 : f32
    %6 = vector.broadcast %cst_5 : f32 to vector<32x64xf32>
    %7 = arith.maximumf %5, %6 : vector<32x64xf32>
    %c0_6 = arith.constant 0 : index
    %c0_7 = arith.constant 0 : index
    %8 = vector.load %arg4[%c0_6, %c0_7] : memref<32x64xf32, #tpu.memory_space<vmem>>, vector<32x64xf32>
    tpu.vector_store %arg4[%c0_6, %c0_7], %7 {strides = array<i32>} : memref<32x64xf32, #tpu.memory_space<vmem>>, vector<32x64xf32>,
    return
  }
  func.func @transform_0(%arg0: i32) -> (i32, i32) {
    %c0_i32 = arith.constant 0 : i32
    %c0_i32_0 = arith.constant 0 : i32
    return %arg0, %c0_i32 : i32, i32
  }
  func.func @transform_1(%arg0: i32) -> (i32, i32) {
    %c0_i32 = arith.constant 0 : i32
    %c0_i32_0 = arith.constant 0 : i32
    %c0_i32_1 = arith.constant 0 : i32
    return %c0_i32, %c0_i32_0 : i32, i32
  }
  func.func @transform_2(%arg0: i32) -> (i32, i32) {
    %c0_i32 = arith.constant 0 : i32
    %c0_i32_0 = arith.constant 0 : i32
    %c0_i32_1 = arith.constant 0 : i32
    return %c0_i32, %c0_i32_0 : i32, i32
  }
  func.func @transform_3(%arg0: i32) -> (i32, i32) {
    %c0_i32 = arith.constant 0 : i32
    %c0_i32_0 = arith.constant 0 : i32
    return %arg0, %c0_i32 : i32, i32
  }
}

module attributes {stable_mosaic.version = 11 : i64} {
  func.func @_matmul_bias_act_kernel(%arg0: i32, %arg1: memref<32x64xbf16, #tpu.memory_space<vmem>>, %arg2: memref<64x64xbf16, #tpu.memory_space<vmem>>, %arg3: memref<1x64xf32, #tpu.memory_space<vmem>>, %arg4: memref<32x64xf32, #tpu.memory_space<vmem>>) attributes {dimension_semantics = [#tpu.dimension_semantics<parallel>], iteration_bounds = array<i64: 1>, scalar_prefetch = 0 : i64, scratch_operands = 0 : i64, tpu.core_type = #tpu.core_type<tc>, window_params = [{transform_indices = @transform_0, window_bounds = array<i64: 32, 64>}, {pipeline_mode = #tpu.pipeline_mode<synchronous>, transform_indices = @transform_1, window_bounds = array<i64: 64, 64>}, {pipeline_mode = #tpu.pipeline_mode<synchronous>, transform_indices = @transform_2, window_bounds = array<i64: 1, 64>}, {transform_indices = @transform_3, window_bounds = array<i64: 32, 64>}]} {
    %c0 = arith.constant 0 : index
    %c0_0 = arith.constant 0 : index
    %0 = vector.load %arg1[%c0, %c0_0] : memref<32x64xbf16, #tpu.memory_space<vmem>>, vector<32x64xbf16>
    %c0_1 = arith.constant 0 : index
    %c0_2 = arith.constant 0 : index
    %1 = vector.load %arg2[%c0_1, %c0_2] : memref<64x64xbf16, #tpu.memory_space<vmem>>, vector<64x64xbf16>
    %cst = arith.constant dense<0.000000e+00> : vector<32x64xf32>
    %2 = tpu.matmul %0, %1, %cst {dimension_numbers = #tpu.dot_dimension_numbers<[1], [0], [0], [1], [0, 0, 1, 1], [], []>} : vector<32x64xbf16>, vector<64x64xbf16>, vector<32x64xf32> -> vector<32x64xf32>
    %c0_3 = arith.constant 0 : index
    %c0_4 = arith.constant 0 : index
    %3 = vector.load %arg3[%c0_3, %c0_4] : memref<1x64xf32, #tpu.memory_space<vmem>>, vector<1x64xf32>
    %4 = vector.broadcast %3 : vector<1x64xf32> to vector<32x64xf32>
    %5 = arith.addf %2, %4 : vector<32x64xf32>
    %cst_5 = arith.constant 0.000000e+00 : f32
    %6 = vector.broadcast %cst_5 : f32 to vector<32x64xf32>
    %7 = arith.maximumf %5, %6 : vector<32x64xf32>
    %c0_6 = arith.constant 0 : index
    %c0_7 = arith.constant 0 : index
    %8 = vector.load %arg4[%c0_6, %c0_7] : memref<32x64xf32, #tpu.memory_space<vmem>>, vector<32x64xf32>
    tpu.vector_store %arg4[%c0_6, %c0_7], %7 {strides = array<i32>} : memref<32x64xf32, #tpu.memory_space<vmem>>, vector<32x64xf32>,
    return
  }
  func.func @transform_0(%arg0: i32) -> (i32, i32) {
    %c0_i32 = arith.constant 0 : i32
    %c0_i32_0 = arith.constant 0 : i32
    return %arg0, %c0_i32 : i32, i32
  }
  func.func @transform_1(%arg0: i32) -> (i32, i32) {
    %c0_i32 = arith.constant 0 : i32
    %c0_i32_0 = arith.constant 0 : i32
    %c0_i32_1 = arith.constant 0 : i32
    return %c0_i32, %c0_i32_0 : i32, i32
  }
  func.func @transform_2(%arg0: i32) -> (i32, i32) {
    %c0_i32 = arith.constant 0 : i32
    %c0_i32_0 = arith.constant 0 : i32
    %c0_i32_1 = arith.constant 0 : i32
    return %c0_i32, %c0_i32_0 : i32, i32
  }
  func.func @transform_3(%arg0: i32) -> (i32, i32) {
    %c0_i32 = arith.constant 0 : i32
    %c0_i32_0 = arith.constant 0 : i32
    return %arg0, %c0_i32 : i32, i32
  }
}

module attributes {stable_mosaic.version = 11 : i64} {
  func.func @_matmul_bias_act_kernel(%arg0: i32, %arg1: memref<8x576xbf16, #tpu.memory_space<vmem>>, %arg2: memref<576x64xbf16, #tpu.memory_space<vmem>>, %arg3: memref<1x64xf32, #tpu.memory_space<vmem>>, %arg4: memref<8x64xf32, #tpu.memory_space<vmem>>) attributes {dimension_semantics = [#tpu.dimension_semantics<parallel>], iteration_bounds = array<i64: 1>, scalar_prefetch = 0 : i64, scratch_operands = 0 : i64, tpu.core_type = #tpu.core_type<tc>, window_params = [{transform_indices = @transform_0, window_bounds = array<i64: 8, 576>}, {pipeline_mode = #tpu.pipeline_mode<synchronous>, transform_indices = @transform_1, window_bounds = array<i64: 576, 64>}, {pipeline_mode = #tpu.pipeline_mode<synchronous>, transform_indices = @transform_2, window_bounds = array<i64: 1, 64>}, {transform_indices = @transform_3, window_bounds = array<i64: 8, 64>}]} {
    %c0 = arith.constant 0 : index
    %c0_0 = arith.constant 0 : index
    %0 = vector.load %arg1[%c0, %c0_0] : memref<8x576xbf16, #tpu.memory_space<vmem>>, vector<8x576xbf16>
    %c0_1 = arith.constant 0 : index
    %c0_2 = arith.constant 0 : index
    %1 = vector.load %arg2[%c0_1, %c0_2] : memref<576x64xbf16, #tpu.memory_space<vmem>>, vector<576x64xbf16>
    %cst = arith.constant dense<0.000000e+00> : vector<8x64xf32>
    %2 = tpu.matmul %0, %1, %cst {dimension_numbers = #tpu.dot_dimension_numbers<[1], [0], [0], [1], [0, 0, 1, 1], [], []>} : vector<8x576xbf16>, vector<576x64xbf16>, vector<8x64xf32> -> vector<8x64xf32>
    %c0_3 = arith.constant 0 : index
    %c0_4 = arith.constant 0 : index
    %3 = vector.load %arg3[%c0_3, %c0_4] : memref<1x64xf32, #tpu.memory_space<vmem>>, vector<1x64xf32>
    %4 = vector.broadcast %3 : vector<1x64xf32> to vector<8x64xf32>
    %5 = arith.addf %2, %4 : vector<8x64xf32>
    %cst_5 = arith.constant 0.000000e+00 : f32
    %6 = vector.broadcast %cst_5 : f32 to vector<8x64xf32>
    %7 = arith.maximumf %5, %6 : vector<8x64xf32>
    %c0_6 = arith.constant 0 : index
    %c0_7 = arith.constant 0 : index
    %8 = vector.load %arg4[%c0_6, %c0_7] : memref<8x64xf32, #tpu.memory_space<vmem>>, vector<8x64xf32>
    tpu.vector_store %arg4[%c0_6, %c0_7], %7 {strides = array<i32>} : memref<8x64xf32, #tpu.memory_space<vmem>>, vector<8x64xf32>,
    return
  }
  func.func @transform_0(%arg0: i32) -> (i32, i32) {
    %c0_i32 = arith.constant 0 : i32
    %c0_i32_0 = arith.constant 0 : i32
    return %arg0, %c0_i32 : i32, i32
  }
  func.func @transform_1(%arg0: i32) -> (i32, i32) {
    %c0_i32 = arith.constant 0 : i32
    %c0_i32_0 = arith.constant 0 : i32
    %c0_i32_1 = arith.constant 0 : i32
    return %c0_i32, %c0_i32_0 : i32, i32
  }
  func.func @transform_2(%arg0: i32) -> (i32, i32) {
    %c0_i32 = arith.constant 0 : i32
    %c0_i32_0 = arith.constant 0 : i32
    %c0_i32_1 = arith.constant 0 : i32
    return %c0_i32, %c0_i32_0 : i32, i32
  }
  func.func @transform_3(%arg0: i32) -> (i32, i32) {
    %c0_i32 = arith.constant 0 : i32
    %c0_i32_0 = arith.constant 0 : i32
    return %arg0, %c0_i32 : i32, i32
  }
}

module attributes {stable_mosaic.version = 11 : i64} {
  func.func @_matmul_bias_act_kernel(%arg0: i32, %arg1: memref<8x576xbf16, #tpu.memory_space<vmem>>, %arg2: memref<576x128xbf16, #tpu.memory_space<vmem>>, %arg3: memref<1x128xf32, #tpu.memory_space<vmem>>, %arg4: memref<8x128xf32, #tpu.memory_space<vmem>>) attributes {dimension_semantics = [#tpu.dimension_semantics<parallel>], iteration_bounds = array<i64: 1>, scalar_prefetch = 0 : i64, scratch_operands = 0 : i64, tpu.core_type = #tpu.core_type<tc>, window_params = [{transform_indices = @transform_0, window_bounds = array<i64: 8, 576>}, {pipeline_mode = #tpu.pipeline_mode<synchronous>, transform_indices = @transform_1, window_bounds = array<i64: 576, 128>}, {pipeline_mode = #tpu.pipeline_mode<synchronous>, transform_indices = @transform_2, window_bounds = array<i64: 1, 128>}, {transform_indices = @transform_3, window_bounds = array<i64: 8, 128>}]} {
    %c0 = arith.constant 0 : index
    %c0_0 = arith.constant 0 : index
    %0 = vector.load %arg1[%c0, %c0_0] : memref<8x576xbf16, #tpu.memory_space<vmem>>, vector<8x576xbf16>
    %c0_1 = arith.constant 0 : index
    %c0_2 = arith.constant 0 : index
    %1 = vector.load %arg2[%c0_1, %c0_2] : memref<576x128xbf16, #tpu.memory_space<vmem>>, vector<576x128xbf16>
    %cst = arith.constant dense<0.000000e+00> : vector<8x128xf32>
    %2 = tpu.matmul %0, %1, %cst {dimension_numbers = #tpu.dot_dimension_numbers<[1], [0], [0], [1], [0, 0, 1, 1], [], []>} : vector<8x576xbf16>, vector<576x128xbf16>, vector<8x128xf32> -> vector<8x128xf32>
    %c0_3 = arith.constant 0 : index
    %c0_4 = arith.constant 0 : index
    %3 = vector.load %arg3[%c0_3, %c0_4] : memref<1x128xf32, #tpu.memory_space<vmem>>, vector<1x128xf32>
    %4 = vector.broadcast %3 : vector<1x128xf32> to vector<8x128xf32>
    %5 = arith.addf %2, %4 : vector<8x128xf32>
    %cst_5 = arith.constant 0.000000e+00 : f32
    %6 = vector.broadcast %cst_5 : f32 to vector<8x128xf32>
    %7 = arith.maximumf %5, %6 : vector<8x128xf32>
    %c0_6 = arith.constant 0 : index
    %c0_7 = arith.constant 0 : index
    %8 = vector.load %arg4[%c0_6, %c0_7] : memref<8x128xf32, #tpu.memory_space<vmem>>, vector<8x128xf32>
    tpu.vector_store %arg4[%c0_6, %c0_7], %7 {strides = array<i32>} : memref<8x128xf32, #tpu.memory_space<vmem>>, vector<8x128xf32>,
    return
  }
  func.func @transform_0(%arg0: i32) -> (i32, i32) {
    %c0_i32 = arith.constant 0 : i32
    %c0_i32_0 = arith.constant 0 : i32
    return %arg0, %c0_i32 : i32, i32
  }
  func.func @transform_1(%arg0: i32) -> (i32, i32) {
    %c0_i32 = arith.constant 0 : i32
    %c0_i32_0 = arith.constant 0 : i32
    %c0_i32_1 = arith.constant 0 : i32
    return %c0_i32, %c0_i32_0 : i32, i32
  }
  func.func @transform_2(%arg0: i32) -> (i32, i32) {
    %c0_i32 = arith.constant 0 : i32
    %c0_i32_0 = arith.constant 0 : i32
    %c0_i32_1 = arith.constant 0 : i32
    return %c0_i32, %c0_i32_0 : i32, i32
  }
  func.func @transform_3(%arg0: i32) -> (i32, i32) {
    %c0_i32 = arith.constant 0 : i32
    %c0_i32_0 = arith.constant 0 : i32
    return %arg0, %c0_i32 : i32, i32
  }
}

module attributes {stable_mosaic.version = 11 : i64} {
  func.func @_matmul_bias_act_kernel(%arg0: i32, %arg1: memref<8x1152xbf16, #tpu.memory_space<vmem>>, %arg2: memref<1152x128xbf16, #tpu.memory_space<vmem>>, %arg3: memref<1x128xf32, #tpu.memory_space<vmem>>, %arg4: memref<8x128xf32, #tpu.memory_space<vmem>>) attributes {dimension_semantics = [#tpu.dimension_semantics<parallel>], iteration_bounds = array<i64: 1>, scalar_prefetch = 0 : i64, scratch_operands = 0 : i64, tpu.core_type = #tpu.core_type<tc>, window_params = [{transform_indices = @transform_0, window_bounds = array<i64: 8, 1152>}, {pipeline_mode = #tpu.pipeline_mode<synchronous>, transform_indices = @transform_1, window_bounds = array<i64: 1152, 128>}, {pipeline_mode = #tpu.pipeline_mode<synchronous>, transform_indices = @transform_2, window_bounds = array<i64: 1, 128>}, {transform_indices = @transform_3, window_bounds = array<i64: 8, 128>}]} {
    %c0 = arith.constant 0 : index
    %c0_0 = arith.constant 0 : index
    %0 = vector.load %arg1[%c0, %c0_0] : memref<8x1152xbf16, #tpu.memory_space<vmem>>, vector<8x1152xbf16>
    %c0_1 = arith.constant 0 : index
    %c0_2 = arith.constant 0 : index
    %1 = vector.load %arg2[%c0_1, %c0_2] : memref<1152x128xbf16, #tpu.memory_space<vmem>>, vector<1152x128xbf16>
    %cst = arith.constant dense<0.000000e+00> : vector<8x128xf32>
    %2 = tpu.matmul %0, %1, %cst {dimension_numbers = #tpu.dot_dimension_numbers<[1], [0], [0], [1], [0, 0, 1, 1], [], []>} : vector<8x1152xbf16>, vector<1152x128xbf16>, vector<8x128xf32> -> vector<8x128xf32>
    %c0_3 = arith.constant 0 : index
    %c0_4 = arith.constant 0 : index
    %3 = vector.load %arg3[%c0_3, %c0_4] : memref<1x128xf32, #tpu.memory_space<vmem>>, vector<1x128xf32>
    %4 = vector.broadcast %3 : vector<1x128xf32> to vector<8x128xf32>
    %5 = arith.addf %2, %4 : vector<8x128xf32>
    %cst_5 = arith.constant 0.000000e+00 : f32
    %6 = vector.broadcast %cst_5 : f32 to vector<8x128xf32>
    %7 = arith.maximumf %5, %6 : vector<8x128xf32>
    %c0_6 = arith.constant 0 : index
    %c0_7 = arith.constant 0 : index
    %8 = vector.load %arg4[%c0_6, %c0_7] : memref<8x128xf32, #tpu.memory_space<vmem>>, vector<8x128xf32>
    tpu.vector_store %arg4[%c0_6, %c0_7], %7 {strides = array<i32>} : memref<8x128xf32, #tpu.memory_space<vmem>>, vector<8x128xf32>,
    return
  }
  func.func @transform_0(%arg0: i32) -> (i32, i32) {
    %c0_i32 = arith.constant 0 : i32
    %c0_i32_0 = arith.constant 0 : i32
    return %arg0, %c0_i32 : i32, i32
  }
  func.func @transform_1(%arg0: i32) -> (i32, i32) {
    %c0_i32 = arith.constant 0 : i32
    %c0_i32_0 = arith.constant 0 : i32
    %c0_i32_1 = arith.constant 0 : i32
    return %c0_i32, %c0_i32_0 : i32, i32
  }
  func.func @transform_2(%arg0: i32) -> (i32, i32) {
    %c0_i32 = arith.constant 0 : i32
    %c0_i32_0 = arith.constant 0 : i32
    %c0_i32_1 = arith.constant 0 : i32
    return %c0_i32, %c0_i32_0 : i32, i32
  }
  func.func @transform_3(%arg0: i32) -> (i32, i32) {
    %c0_i32 = arith.constant 0 : i32
    %c0_i32_0 = arith.constant 0 : i32
    return %arg0, %c0_i32 : i32, i32
  }
}

module attributes {stable_mosaic.version = 11 : i64} {
  func.func @_matmul_bias_act_kernel(%arg0: i32, %arg1: memref<8x128xbf16, #tpu.memory_space<vmem>>, %arg2: memref<128x64xbf16, #tpu.memory_space<vmem>>, %arg3: memref<1x64xf32, #tpu.memory_space<vmem>>, %arg4: memref<8x64xf32, #tpu.memory_space<vmem>>) attributes {dimension_semantics = [#tpu.dimension_semantics<parallel>], iteration_bounds = array<i64: 1>, scalar_prefetch = 0 : i64, scratch_operands = 0 : i64, tpu.core_type = #tpu.core_type<tc>, window_params = [{transform_indices = @transform_0, window_bounds = array<i64: 8, 128>}, {pipeline_mode = #tpu.pipeline_mode<synchronous>, transform_indices = @transform_1, window_bounds = array<i64: 128, 64>}, {pipeline_mode = #tpu.pipeline_mode<synchronous>, transform_indices = @transform_2, window_bounds = array<i64: 1, 64>}, {transform_indices = @transform_3, window_bounds = array<i64: 8, 64>}]} {
    %c0 = arith.constant 0 : index
    %c0_0 = arith.constant 0 : index
    %0 = vector.load %arg1[%c0, %c0_0] : memref<8x128xbf16, #tpu.memory_space<vmem>>, vector<8x128xbf16>
    %c0_1 = arith.constant 0 : index
    %c0_2 = arith.constant 0 : index
    %1 = vector.load %arg2[%c0_1, %c0_2] : memref<128x64xbf16, #tpu.memory_space<vmem>>, vector<128x64xbf16>
    %cst = arith.constant dense<0.000000e+00> : vector<8x64xf32>
    %2 = tpu.matmul %0, %1, %cst {dimension_numbers = #tpu.dot_dimension_numbers<[1], [0], [0], [1], [0, 0, 1, 1], [], []>} : vector<8x128xbf16>, vector<128x64xbf16>, vector<8x64xf32> -> vector<8x64xf32>
    %c0_3 = arith.constant 0 : index
    %c0_4 = arith.constant 0 : index
    %3 = vector.load %arg3[%c0_3, %c0_4] : memref<1x64xf32, #tpu.memory_space<vmem>>, vector<1x64xf32>
    %4 = vector.broadcast %3 : vector<1x64xf32> to vector<8x64xf32>
    %5 = arith.addf %2, %4 : vector<8x64xf32>
    %cst_5 = arith.constant 0.000000e+00 : f32
    %6 = vector.broadcast %cst_5 : f32 to vector<8x64xf32>
    %7 = arith.maximumf %5, %6 : vector<8x64xf32>
    %c0_6 = arith.constant 0 : index
    %c0_7 = arith.constant 0 : index
    %8 = vector.load %arg4[%c0_6, %c0_7] : memref<8x64xf32, #tpu.memory_space<vmem>>, vector<8x64xf32>
    tpu.vector_store %arg4[%c0_6, %c0_7], %7 {strides = array<i32>} : memref<8x64xf32, #tpu.memory_space<vmem>>, vector<8x64xf32>,
    return
  }
  func.func @transform_0(%arg0: i32) -> (i32, i32) {
    %c0_i32 = arith.constant 0 : i32
    %c0_i32_0 = arith.constant 0 : i32
    return %arg0, %c0_i32 : i32, i32
  }
  func.func @transform_1(%arg0: i32) -> (i32, i32) {
    %c0_i32 = arith.constant 0 : i32
    %c0_i32_0 = arith.constant 0 : i32
    %c0_i32_1 = arith.constant 0 : i32
    return %c0_i32, %c0_i32_0 : i32, i32
  }
  func.func @transform_2(%arg0: i32) -> (i32, i32) {
    %c0_i32 = arith.constant 0 : i32
    %c0_i32_0 = arith.constant 0 : i32
    %c0_i32_1 = arith.constant 0 : i32
    return %c0_i32, %c0_i32_0 : i32, i32
  }
  func.func @transform_3(%arg0: i32) -> (i32, i32) {
    %c0_i32 = arith.constant 0 : i32
    %c0_i32_0 = arith.constant 0 : i32
    return %arg0, %c0_i32 : i32, i32
  }
}

module attributes {stable_mosaic.version = 11 : i64} {
  func.func @_matmul_bias_act_kernel(%arg0: i32, %arg1: memref<32x64xbf16, #tpu.memory_space<vmem>>, %arg2: memref<64x64xbf16, #tpu.memory_space<vmem>>, %arg3: memref<1x64xf32, #tpu.memory_space<vmem>>, %arg4: memref<32x64xf32, #tpu.memory_space<vmem>>) attributes {dimension_semantics = [#tpu.dimension_semantics<parallel>], iteration_bounds = array<i64: 1>, scalar_prefetch = 0 : i64, scratch_operands = 0 : i64, tpu.core_type = #tpu.core_type<tc>, window_params = [{transform_indices = @transform_0, window_bounds = array<i64: 32, 64>}, {pipeline_mode = #tpu.pipeline_mode<synchronous>, transform_indices = @transform_1, window_bounds = array<i64: 64, 64>}, {pipeline_mode = #tpu.pipeline_mode<synchronous>, transform_indices = @transform_2, window_bounds = array<i64: 1, 64>}, {transform_indices = @transform_3, window_bounds = array<i64: 32, 64>}]} {
    %c0 = arith.constant 0 : index
    %c0_0 = arith.constant 0 : index
    %0 = vector.load %arg1[%c0, %c0_0] : memref<32x64xbf16, #tpu.memory_space<vmem>>, vector<32x64xbf16>
    %c0_1 = arith.constant 0 : index
    %c0_2 = arith.constant 0 : index
    %1 = vector.load %arg2[%c0_1, %c0_2] : memref<64x64xbf16, #tpu.memory_space<vmem>>, vector<64x64xbf16>
    %cst = arith.constant dense<0.000000e+00> : vector<32x64xf32>
    %2 = tpu.matmul %0, %1, %cst {dimension_numbers = #tpu.dot_dimension_numbers<[1], [0], [0], [1], [0, 0, 1, 1], [], []>} : vector<32x64xbf16>, vector<64x64xbf16>, vector<32x64xf32> -> vector<32x64xf32>
    %c0_3 = arith.constant 0 : index
    %c0_4 = arith.constant 0 : index
    %3 = vector.load %arg3[%c0_3, %c0_4] : memref<1x64xf32, #tpu.memory_space<vmem>>, vector<1x64xf32>
    %4 = vector.broadcast %3 : vector<1x64xf32> to vector<32x64xf32>
    %5 = arith.addf %2, %4 : vector<32x64xf32>
    %c0_5 = arith.constant 0 : index
    %c0_6 = arith.constant 0 : index
    %6 = vector.load %arg4[%c0_5, %c0_6] : memref<32x64xf32, #tpu.memory_space<vmem>>, vector<32x64xf32>
    tpu.vector_store %arg4[%c0_5, %c0_6], %5 {strides = array<i32>} : memref<32x64xf32, #tpu.memory_space<vmem>>, vector<32x64xf32>,
    return
  }
  func.func @transform_0(%arg0: i32) -> (i32, i32) {
    %c0_i32 = arith.constant 0 : i32
    %c0_i32_0 = arith.constant 0 : i32
    return %arg0, %c0_i32 : i32, i32
  }
  func.func @transform_1(%arg0: i32) -> (i32, i32) {
    %c0_i32 = arith.constant 0 : i32
    %c0_i32_0 = arith.constant 0 : i32
    %c0_i32_1 = arith.constant 0 : i32
    return %c0_i32, %c0_i32_0 : i32, i32
  }
  func.func @transform_2(%arg0: i32) -> (i32, i32) {
    %c0_i32 = arith.constant 0 : i32
    %c0_i32_0 = arith.constant 0 : i32
    %c0_i32_1 = arith.constant 0 : i32
    return %c0_i32, %c0_i32_0 : i32, i32
  }
  func.func @transform_3(%arg0: i32) -> (i32, i32) {
    %c0_i32 = arith.constant 0 : i32
    %c0_i32_0 = arith.constant 0 : i32
    return %arg0, %c0_i32 : i32, i32
  }
}

module attributes {stable_mosaic.version = 11 : i64} {
  func.func @_dense_chain_kernel(%arg0: i32, %arg1: memref<32x64xbf16, #tpu.memory_space<vmem>>, %arg2: memref<64x64xbf16, #tpu.memory_space<vmem>>, %arg3: memref<1x64xf32, #tpu.memory_space<vmem>>, %arg4: memref<64x64xbf16, #tpu.memory_space<vmem>>, %arg5: memref<1x64xf32, #tpu.memory_space<vmem>>, %arg6: memref<64x128xbf16, #tpu.memory_space<vmem>>, %arg7: memref<1x128xf32, #tpu.memory_space<vmem>>, %arg8: memref<32x128xf32, #tpu.memory_space<vmem>>) attributes {dimension_semantics = [#tpu.dimension_semantics<parallel>], iteration_bounds = array<i64: 1>, scalar_prefetch = 0 : i64, scratch_operands = 0 : i64, tpu.core_type = #tpu.core_type<tc>, window_params = [{transform_indices = @transform_0, window_bounds = array<i64: 32, 64>}, {pipeline_mode = #tpu.pipeline_mode<synchronous>, transform_indices = @transform_1, window_bounds = array<i64: 64, 64>}, {pipeline_mode = #tpu.pipeline_mode<synchronous>, transform_indices = @transform_2, window_bounds = array<i64: 1, 64>}, {pipeline_mode = #tpu.pipeline_mode<synchronous>, transform_indices = @transform_3, window_bounds = array<i64: 64, 64>}, {pipeline_mode = #tpu.pipeline_mode<synchronous>, transform_indices = @transform_4, window_bounds = array<i64: 1, 64>}, {pipeline_mode = #tpu.pipeline_mode<synchronous>, transform_indices = @transform_5, window_bounds = array<i64: 64, 128>}, {pipeline_mode = #tpu.pipeline_mode<synchronous>, transform_indices = @transform_6, window_bounds = array<i64: 1, 128>}, {transform_indices = @transform_7, window_bounds = array<i64: 32, 128>}]} {
    %c0 = arith.constant 0 : index
    %c0_0 = arith.constant 0 : index
    %0 = vector.load %arg1[%c0, %c0_0] : memref<32x64xbf16, #tpu.memory_space<vmem>>, vector<32x64xbf16>
    %c0_1 = arith.constant 0 : index
    %c0_2 = arith.constant 0 : index
    %1 = vector.load %arg2[%c0_1, %c0_2] : memref<64x64xbf16, #tpu.memory_space<vmem>>, vector<64x64xbf16>
    %c0_3 = arith.constant 0 : index
    %c0_4 = arith.constant 0 : index
    %2 = vector.load %arg3[%c0_3, %c0_4] : memref<1x64xf32, #tpu.memory_space<vmem>>, vector<1x64xf32>
    %cst = arith.constant dense<0.000000e+00> : vector<32x64xf32>
    %3 = tpu.matmul %0, %1, %cst {dimension_numbers = #tpu.dot_dimension_numbers<[1], [0], [0], [1], [0, 0, 1, 1], [], []>} : vector<32x64xbf16>, vector<64x64xbf16>, vector<32x64xf32> -> vector<32x64xf32>
    %4 = vector.broadcast %2 : vector<1x64xf32> to vector<32x64xf32>
    %5 = arith.addf %3, %4 : vector<32x64xf32>
    %cst_5 = arith.constant 0.000000e+00 : f32
    %6 = vector.broadcast %cst_5 : f32 to vector<32x64xf32>
    %7 = arith.maximumf %5, %6 : vector<32x64xf32>
    %c0_6 = arith.constant 0 : index
    %c0_7 = arith.constant 0 : index
    %8 = vector.load %arg4[%c0_6, %c0_7] : memref<64x64xbf16, #tpu.memory_space<vmem>>, vector<64x64xbf16>
    %c0_8 = arith.constant 0 : index
    %c0_9 = arith.constant 0 : index
    %9 = vector.load %arg5[%c0_8, %c0_9] : memref<1x64xf32, #tpu.memory_space<vmem>>, vector<1x64xf32>
    %10 = arith.truncf %7 : vector<32x64xf32> to vector<32x64xbf16>
    %cst_10 = arith.constant dense<0.000000e+00> : vector<32x64xf32>
    %11 = tpu.matmul %10, %8, %cst_10 {dimension_numbers = #tpu.dot_dimension_numbers<[1], [0], [0], [1], [0, 0, 1, 1], [], []>} : vector<32x64xbf16>, vector<64x64xbf16>, vector<32x64xf32> -> vector<32x64xf32>
    %12 = vector.broadcast %9 : vector<1x64xf32> to vector<32x64xf32>
    %13 = arith.addf %11, %12 : vector<32x64xf32>
    %cst_11 = arith.constant 0.000000e+00 : f32
    %14 = vector.broadcast %cst_11 : f32 to vector<32x64xf32>
    %15 = arith.maximumf %13, %14 : vector<32x64xf32>
    %c0_12 = arith.constant 0 : index
    %c0_13 = arith.constant 0 : index
    %16 = vector.load %arg6[%c0_12, %c0_13] : memref<64x128xbf16, #tpu.memory_space<vmem>>, vector<64x128xbf16>
    %c0_14 = arith.constant 0 : index
    %c0_15 = arith.constant 0 : index
    %17 = vector.load %arg7[%c0_14, %c0_15] : memref<1x128xf32, #tpu.memory_space<vmem>>, vector<1x128xf32>
    %18 = arith.truncf %15 : vector<32x64xf32> to vector<32x64xbf16>
    %cst_16 = arith.constant dense<0.000000e+00> : vector<32x128xf32>
    %19 = tpu.matmul %18, %16, %cst_16 {dimension_numbers = #tpu.dot_dimension_numbers<[1], [0], [0], [1], [0, 0, 1, 1], [], []>} : vector<32x64xbf16>, vector<64x128xbf16>, vector<32x128xf32> -> vector<32x128xf32>
    %20 = vector.broadcast %17 : vector<1x128xf32> to vector<32x128xf32>
    %21 = arith.addf %19, %20 : vector<32x128xf32>
    %22 = arith.negf %21 : vector<32x128xf32>
    %23 = math.exp %22 : vector<32x128xf32>
    %cst_17 = arith.constant 1.000000e+00 : f32
    %24 = vector.broadcast %cst_17 : f32 to vector<32x128xf32>
    %25 = arith.addf %24, %23 : vector<32x128xf32>
    %26 = arith.divf %24, %25 : vector<32x128xf32>
    %c0_18 = arith.constant 0 : index
    %c0_19 = arith.constant 0 : index
    %27 = vector.load %arg8[%c0_18, %c0_19] : memref<32x128xf32, #tpu.memory_space<vmem>>, vector<32x128xf32>
    tpu.vector_store %arg8[%c0_18, %c0_19], %26 {strides = array<i32>} : memref<32x128xf32, #tpu.memory_space<vmem>>, vector<32x128xf32>,
    return
  }
  func.func @transform_0(%arg0: i32) -> (i32, i32) {
    %c0_i32 = arith.constant 0 : i32
    %c0_i32_0 = arith.constant 0 : i32
    return %arg0, %c0_i32 : i32, i32
  }
  func.func @transform_1(%arg0: i32) -> (i32, i32) {
    %c0_i32 = arith.constant 0 : i32
    %c0_i32_0 = arith.constant 0 : i32
    %c0_i32_1 = arith.constant 0 : i32
    return %c0_i32, %c0_i32_0 : i32, i32
  }
  func.func @transform_2(%arg0: i32) -> (i32, i32) {
    %c0_i32 = arith.constant 0 : i32
    %c0_i32_0 = arith.constant 0 : i32
    %c0_i32_1 = arith.constant 0 : i32
    return %c0_i32, %c0_i32_0 : i32, i32
  }
  func.func @transform_3(%arg0: i32) -> (i32, i32) {
    %c0_i32 = arith.constant 0 : i32
    %c0_i32_0 = arith.constant 0 : i32
    %c0_i32_1 = arith.constant 0 : i32
    return %c0_i32, %c0_i32_0 : i32, i32
  }
  func.func @transform_4(%arg0: i32) -> (i32, i32) {
    %c0_i32 = arith.constant 0 : i32
    %c0_i32_0 = arith.constant 0 : i32
    %c0_i32_1 = arith.constant 0 : i32
    return %c0_i32, %c0_i32_0 : i32, i32
  }
  func.func @transform_5(%arg0: i32) -> (i32, i32) {
    %c0_i32 = arith.constant 0 : i32
    %c0_i32_0 = arith.constant 0 : i32
    %c0_i32_1 = arith.constant 0 : i32
    return %c0_i32, %c0_i32_0 : i32, i32
  }
  func.func @transform_6(%arg0: i32) -> (i32, i32) {
    %c0_i32 = arith.constant 0 : i32
    %c0_i32_0 = arith.constant 0 : i32
    %c0_i32_1 = arith.constant 0 : i32
    return %c0_i32, %c0_i32_0 : i32, i32
  }
  func.func @transform_7(%arg0: i32) -> (i32, i32) {
    %c0_i32 = arith.constant 0 : i32
    %c0_i32_0 = arith.constant 0 : i32
    return %arg0, %c0_i32 : i32, i32
  }
}

module attributes {stable_mosaic.version = 11 : i64} {
  func.func @_dense_chain_kernel(%arg0: i32, %arg1: memref<32x64xbf16, #tpu.memory_space<vmem>>, %arg2: memref<64x64xbf16, #tpu.memory_space<vmem>>, %arg3: memref<1x64xf32, #tpu.memory_space<vmem>>, %arg4: memref<64x64xbf16, #tpu.memory_space<vmem>>, %arg5: memref<1x64xf32, #tpu.memory_space<vmem>>, %arg6: memref<64x64xbf16, #tpu.memory_space<vmem>>, %arg7: memref<1x64xf32, #tpu.memory_space<vmem>>, %arg8: memref<64x128xbf16, #tpu.memory_space<vmem>>, %arg9: memref<1x128xf32, #tpu.memory_space<vmem>>, %arg10: memref<32x128xf32, #tpu.memory_space<vmem>>) attributes {dimension_semantics = [#tpu.dimension_semantics<parallel>], iteration_bounds = array<i64: 1>, scalar_prefetch = 0 : i64, scratch_operands = 0 : i64, tpu.core_type = #tpu.core_type<tc>, window_params = [{transform_indices = @transform_0, window_bounds = array<i64: 32, 64>}, {pipeline_mode = #tpu.pipeline_mode<synchronous>, transform_indices = @transform_1, window_bounds = array<i64: 64, 64>}, {pipeline_mode = #tpu.pipeline_mode<synchronous>, transform_indices = @transform_2, window_bounds = array<i64: 1, 64>}, {pipeline_mode = #tpu.pipeline_mode<synchronous>, transform_indices = @transform_3, window_bounds = array<i64: 64, 64>}, {pipeline_mode = #tpu.pipeline_mode<synchronous>, transform_indices = @transform_4, window_bounds = array<i64: 1, 64>}, {pipeline_mode = #tpu.pipeline_mode<synchronous>, transform_indices = @transform_5, window_bounds = array<i64: 64, 64>}, {pipeline_mode = #tpu.pipeline_mode<synchronous>, transform_indices = @transform_6, window_bounds = array<i64: 1, 64>}, {pipeline_mode = #tpu.pipeline_mode<synchronous>, transform_indices = @transform_7, window_bounds = array<i64: 64, 128>}, {pipeline_mode = #tpu.pipeline_mode<synchronous>, transform_indices = @transform_8, window_bounds = array<i64: 1, 128>}, {transform_indices = @transform_9, window_bounds = array<i64: 32, 128>}]} {
    %c0 = arith.constant 0 : index
    %c0_0 = arith.constant 0 : index
    %0 = vector.load %arg1[%c0, %c0_0] : memref<32x64xbf16, #tpu.memory_space<vmem>>, vector<32x64xbf16>
    %c0_1 = arith.constant 0 : index
    %c0_2 = arith.constant 0 : index
    %1 = vector.load %arg2[%c0_1, %c0_2] : memref<64x64xbf16, #tpu.memory_space<vmem>>, vector<64x64xbf16>
    %c0_3 = arith.constant 0 : index
    %c0_4 = arith.constant 0 : index
    %2 = vector.load %arg3[%c0_3, %c0_4] : memref<1x64xf32, #tpu.memory_space<vmem>>, vector<1x64xf32>
    %cst = arith.constant dense<0.000000e+00> : vector<32x64xf32>
    %3 = tpu.matmul %0, %1, %cst {dimension_numbers = #tpu.dot_dimension_numbers<[1], [0], [0], [1], [0, 0, 1, 1], [], []>} : vector<32x64xbf16>, vector<64x64xbf16>, vector<32x64xf32> -> vector<32x64xf32>
    %4 = vector.broadcast %2 : vector<1x64xf32> to vector<32x64xf32>
    %5 = arith.addf %3, %4 : vector<32x64xf32>
    %cst_5 = arith.constant 0.000000e+00 : f32
    %6 = vector.broadcast %cst_5 : f32 to vector<32x64xf32>
    %7 = arith.maximumf %5, %6 : vector<32x64xf32>
    %c0_6 = arith.constant 0 : index
    %c0_7 = arith.constant 0 : index
    %8 = vector.load %arg4[%c0_6, %c0_7] : memref<64x64xbf16, #tpu.memory_space<vmem>>, vector<64x64xbf16>
    %c0_8 = arith.constant 0 : index
    %c0_9 = arith.constant 0 : index
    %9 = vector.load %arg5[%c0_8, %c0_9] : memref<1x64xf32, #tpu.memory_space<vmem>>, vector<1x64xf32>
    %10 = arith.truncf %7 : vector<32x64xf32> to vector<32x64xbf16>
    %cst_10 = arith.constant dense<0.000000e+00> : vector<32x64xf32>
    %11 = tpu.matmul %10, %8, %cst_10 {dimension_numbers = #tpu.dot_dimension_numbers<[1], [0], [0], [1], [0, 0, 1, 1], [], []>} : vector<32x64xbf16>, vector<64x64xbf16>, vector<32x64xf32> -> vector<32x64xf32>
    %12 = vector.broadcast %9 : vector<1x64xf32> to vector<32x64xf32>
    %13 = arith.addf %11, %12 : vector<32x64xf32>
    %cst_11 = arith.constant 0.000000e+00 : f32
    %14 = vector.broadcast %cst_11 : f32 to vector<32x64xf32>
    %15 = arith.maximumf %13, %14 : vector<32x64xf32>
    %c0_12 = arith.constant 0 : index
    %c0_13 = arith.constant 0 : index
    %16 = vector.load %arg6[%c0_12, %c0_13] : memref<64x64xbf16, #tpu.memory_space<vmem>>, vector<64x64xbf16>
    %c0_14 = arith.constant 0 : index
    %c0_15 = arith.constant 0 : index
    %17 = vector.load %arg7[%c0_14, %c0_15] : memref<1x64xf32, #tpu.memory_space<vmem>>, vector<1x64xf32>
    %18 = arith.truncf %15 : vector<32x64xf32> to vector<32x64xbf16>
    %cst_16 = arith.constant dense<0.000000e+00> : vector<32x64xf32>
    %19 = tpu.matmul %18, %16, %cst_16 {dimension_numbers = #tpu.dot_dimension_numbers<[1], [0], [0], [1], [0, 0, 1, 1], [], []>} : vector<32x64xbf16>, vector<64x64xbf16>, vector<32x64xf32> -> vector<32x64xf32>
    %20 = vector.broadcast %17 : vector<1x64xf32> to vector<32x64xf32>
    %21 = arith.addf %19, %20 : vector<32x64xf32>
    %cst_17 = arith.constant 0.000000e+00 : f32
    %22 = vector.broadcast %cst_17 : f32 to vector<32x64xf32>
    %23 = arith.maximumf %21, %22 : vector<32x64xf32>
    %c0_18 = arith.constant 0 : index
    %c0_19 = arith.constant 0 : index
    %24 = vector.load %arg8[%c0_18, %c0_19] : memref<64x128xbf16, #tpu.memory_space<vmem>>, vector<64x128xbf16>
    %c0_20 = arith.constant 0 : index
    %c0_21 = arith.constant 0 : index
    %25 = vector.load %arg9[%c0_20, %c0_21] : memref<1x128xf32, #tpu.memory_space<vmem>>, vector<1x128xf32>
    %26 = arith.truncf %23 : vector<32x64xf32> to vector<32x64xbf16>
    %cst_22 = arith.constant dense<0.000000e+00> : vector<32x128xf32>
    %27 = tpu.matmul %26, %24, %cst_22 {dimension_numbers = #tpu.dot_dimension_numbers<[1], [0], [0], [1], [0, 0, 1, 1], [], []>} : vector<32x64xbf16>, vector<64x128xbf16>, vector<32x128xf32> -> vector<32x128xf32>
    %28 = vector.broadcast %25 : vector<1x128xf32> to vector<32x128xf32>
    %29 = arith.addf %27, %28 : vector<32x128xf32>
    %c0_23 = arith.constant 0 : index
    %c0_24 = arith.constant 0 : index
    %30 = vector.load %arg10[%c0_23, %c0_24] : memref<32x128xf32, #tpu.memory_space<vmem>>, vector<32x128xf32>
    tpu.vector_store %arg10[%c0_23, %c0_24], %29 {strides = array<i32>} : memref<32x128xf32, #tpu.memory_space<vmem>>, vector<32x128xf32>,
    return
  }
  func.func @transform_0(%arg0: i32) -> (i32, i32) {
    %c0_i32 = arith.constant 0 : i32
    %c0_i32_0 = arith.constant 0 : i32
    return %arg0, %c0_i32 : i32, i32
  }
  func.func @transform_1(%arg0: i32) -> (i32, i32) {
    %c0_i32 = arith.constant 0 : i32
    %c0_i32_0 = arith.constant 0 : i32
    %c0_i32_1 = arith.constant 0 : i32
    return %c0_i32, %c0_i32_0 : i32, i32
  }
  func.func @transform_2(%arg0: i32) -> (i32, i32) {
    %c0_i32 = arith.constant 0 : i32
    %c0_i32_0 = arith.constant 0 : i32
    %c0_i32_1 = arith.constant 0 : i32
    return %c0_i32, %c0_i32_0 : i32, i32
  }
  func.func @transform_3(%arg0: i32) -> (i32, i32) {
    %c0_i32 = arith.constant 0 : i32
    %c0_i32_0 = arith.constant 0 : i32
    %c0_i32_1 = arith.constant 0 : i32
    return %c0_i32, %c0_i32_0 : i32, i32
  }
  func.func @transform_4(%arg0: i32) -> (i32, i32) {
    %c0_i32 = arith.constant 0 : i32
    %c0_i32_0 = arith.constant 0 : i32
    %c0_i32_1 = arith.constant 0 : i32
    return %c0_i32, %c0_i32_0 : i32, i32
  }
  func.func @transform_5(%arg0: i32) -> (i32, i32) {
    %c0_i32 = arith.constant 0 : i32
    %c0_i32_0 = arith.constant 0 : i32
    %c0_i32_1 = arith.constant 0 : i32
    return %c0_i32, %c0_i32_0 : i32, i32
  }
  func.func @transform_6(%arg0: i32) -> (i32, i32) {
    %c0_i32 = arith.constant 0 : i32
    %c0_i32_0 = arith.constant 0 : i32
    %c0_i32_1 = arith.constant 0 : i32
    return %c0_i32, %c0_i32_0 : i32, i32
  }
  func.func @transform_7(%arg0: i32) -> (i32, i32) {
    %c0_i32 = arith.constant 0 : i32
    %c0_i32_0 = arith.constant 0 : i32
    %c0_i32_1 = arith.constant 0 : i32
    return %c0_i32, %c0_i32_0 : i32, i32
  }
  func.func @transform_8(%arg0: i32) -> (i32, i32) {
    %c0_i32 = arith.constant 0 : i32
    %c0_i32_0 = arith.constant 0 : i32
    %c0_i32_1 = arith.constant 0 : i32
    return %c0_i32, %c0_i32_0 : i32, i32
  }
  func.func @transform_9(%arg0: i32) -> (i32, i32) {
    %c0_i32 = arith.constant 0 : i32
    %c0_i32_0 = arith.constant 0 : i32
    return %arg0, %c0_i32 : i32, i32
  }
}

</mosaic_0001>

<bundles_post_ra>
// kernel: xfeat_forward.22
= control target key start
LH: loop header
LB: loop body
LE: loop exit
PB: predicated region body
PF: predicated region fallthrough
CT: control target
= control target key end

     0   :  { %s1109_s12 = smov 0   ;;  %s1334_s0 = inlined_call_operand.vmem [shape: bf16[2048,16], index: 0, kind: input, shape index: {}]   ;;  %s1335_s1 = inlined_call_operand.vmem [shape: bf16[16,128], index: 1, kind: input, shape index: {}]   ;;  %s1336_s2 = inlined_call_operand.vmem [shape: f32[1,128], index: 2, kind: input, shape index: {}]   ;;  %s1337_s3 = inlined_call_operand.vmem [shape: f32[2048,128], index: 3, kind: output, shape index: {}]  }
   0x1 LB: > { %s861_s13 = sadd.s32 4294967295, %s1087_s12   ;;  %p865_p0 = scmp.ge.s32.totalorder %s1087_s12, 1  ;;  %s1087_s12 = sphi %s1109_s12, %s13_s12  }
   0x2   : > { %p138_p1 = scmp.lt.s32.totalorder %s1087_s12, 5 }
   0x4   : > { %p139_p2 = pnand %p865_p0, %p138_p1 }
   0x5   : > { %s866_s16 = sshll.u32 (!%p139_p2), %s861_s13, 6 }
   0x6   : > { %142 = sbr.rel (%p139_p2) target bundleno = 275 (0x113), region = 32  ;;  %p163_p3 = scmp.lt.s32.totalorder (!%p139_p2), %s866_s16, 255 }
   0xb   : > { %v1068_v0 = vld [vmem:[%s1335_s1] sm:$0xff]  ;;  %s1339_s16 = smov (!%p163_p3, %s866_s16), 255  ;;  %vm411_vm0 = vcmask 130048  }
   0xc   : > { %515 = vmatpush.bf16.msra.mxu0 %v1068_v0  ;;  %1069 = vmatpush.bf16.msra.mxu1 %v1068_v0  ;;  %s867_s17 = sshll.u32 %s1339_s16, 2  ;;  %v1195_v33 = vld [vmem:[%s1336_s2] ss:$0 sm:$0xff]  ;;  %s869_s23 = sshll.u32 %s1339_s16, 3 }
   0xd   : > { %1070 = vmatpush.bf16.msra.mxu2 %v1068_v0  ;;  %1071 = vmatpush.bf16.msra.mxu3 %v1068_v0  ;;  %s1126_s20 = scalar_lea.vmem %s1334_s0, %s867_s17  ;;  %s1203_s26 = scalar_lea.vmem %s1337_s3, %s869_s23 }
   0xe   : > { %v1036_v1 = vld [vmem:[%s1126_s20] sm:$0xff]  ;;  %v1037_v5 = vld [vmem:[%s1126_s20 + $0x8] sm:$0xff]  ;;  %v1038_v9 = vld [vmem:[%s1126_s20 + $0x10] sm:$0xff] }
   0xf   : > { %v1044_v2 = vld [vmem:[%s1126_s20 + $0x40] sm:$0xff]  ;;  %1002 = vmatmul.msk.bf16.vlgmr.msra.gmra.mxu0 %vm411_vm0, %v1036_v1  ;;  %v1045_v6 = vld [vmem:[%s1126_s20 + $0x48] sm:$0xff]  ;;  %v1046_v10 = vld [vmem:[%s1126_s20 + $0x50] sm:$0xff] }
  0x10   : > { %v1052_v3 = vld [vmem:[%s1126_s20 + $0x80] sm:$0xff]  ;;  %1010 = vmatmul.msk.bf16.vlgmr.msra.gmra.mxu1 %vm411_vm0, %v1044_v2  ;;  %v1053_v7 = vld [vmem:[%s1126_s20 + $0x88] sm:$0xff]  ;;  %v1054_v11 = vld [vmem:[%s1126_s20 + $0x90] sm:$0xff] }
  0x11   : > { %v1060_v4 = vld [vmem:[%s1126_s20 + $0xc0] sm:$0xff]  ;;  %1018 = vmatmul.msk.bf16.vlgmr.msra.gmra.mxu2 %vm411_vm0, %v1052_v3  ;;  %v1061_v8 = vld [vmem:[%s1126_s20 + $0xc8] sm:$0xff]  ;;  %v1062_v12 = vld [vmem:[%s1126_s20 + $0xd0] sm:$0xff] }
  0x12   : > { %1026 = vmatmul.msk.bf16.vlgmr.msra.gmra.mxu3 %vm411_vm0, %v1060_v4  ;;  %v1039_v13 = vld [vmem:[%s1126_s20 + $0x18] sm:$0xff]  ;;  %v1040_v17 = vld [vmem:[%s1126_s20 + $0x20] sm:$0xff]  ;;  %v1041_v21 = vld [vmem:[%s1126_s20 + $0x28] sm:$0xff] }
  0x13   : > { %v1047_v14 = vld [vmem:[%s1126_s20 + $0x58] sm:$0xff]  ;;  %v1048_v18 = vld [vmem:[%s1126_s20 + $0x60] sm:$0xff]  ;;  %v1049_v22 = vld [vmem:[%s1126_s20 + $0x68] sm:$0xff] }
  0x14   : > { %v1055_v15 = vld [vmem:[%s1126_s20 + $0x98] sm:$0xff]  ;;  %v1056_v19 = vld [vmem:[%s1126_s20 + $0xa0] sm:$0xff]  ;;  %v1057_v23 = vld [vmem:[%s1126_s20 + $0xa8] sm:$0xff] }
  0x15   : > { %v1063_v16 = vld [vmem:[%s1126_s20 + $0xd8] sm:$0xff]  ;;  %v1064_v20 = vld [vmem:[%s1126_s20 + $0xe0] sm:$0xff]  ;;  %v1065_v24 = vld [vmem:[%s1126_s20 + $0xe8] sm:$0xff] }
  0x16   : > { %v1042_v25 = vld [vmem:[%s1126_s20 + $0x30] sm:$0xff]  ;;  %v1043_v29 = vld [vmem:[%s1126_s20 + $0x38] sm:$0xff] }
  0x17   : > { %v1050_v26 = vld [vmem:[%s1126_s20 + $0x70] sm:$0xff]  ;;  %v1051_v30 = vld [vmem:[%s1126_s20 + $0x78] sm:$0xff] }
  0x18   : > { %v1058_v27 = vld [vmem:[%s1126_s20 + $0xb0] sm:$0xff]  ;;  %v1059_v31 = vld [vmem:[%s1126_s20 + $0xb8] sm:$0xff] }
  0x19   : > { %v1066_v28 = vld [vmem:[%s1126_s20 + $0xf0] sm:$0xff]  ;;  %v1067_v32 = vld [vmem:[%s1126_s20 + $0xf8] sm:$0xff] }
  0x1f   : > { %1003 = vmatmul.msk.bf16.gmra.mxu0 %vm411_vm0, %v1037_v5 }
  0x20   : > { %1011 = vmatmul.msk.bf16.gmra.mxu1 %vm411_vm0, %v1045_v6 }
  0x21   : > { %1019 = vmatmul.msk.bf16.gmra.mxu2 %vm411_vm0, %v1053_v7 }
  0x22   : > { %1027 = vmatmul.msk.bf16.gmra.mxu3 %vm411_vm0, %v1061_v8 }
  0x2f   : > { %1004 = vmatmul.msk.bf16.gmra.mxu0 %vm411_vm0, %v1038_v9 }
  0x30   : > { %1012 = vmatmul.msk.bf16.gmra.mxu1 %vm411_vm0, %v1046_v10 }
  0x31   : > { %1020 = vmatmul.msk.bf16.gmra.mxu2 %vm411_vm0, %v1054_v11 }
  0x32   : > { %1028 = vmatmul.msk.bf16.gmra.mxu3 %vm411_vm0, %v1062_v12 }
  0x3f   : > { %1005 = vmatmul.msk.bf16.gmra.mxu0 %vm411_vm0, %v1039_v13 }
  0x40   : > { %1013 = vmatmul.msk.bf16.gmra.mxu1 %vm411_vm0, %v1047_v14 }
  0x41   : > { %1021 = vmatmul.msk.bf16.gmra.mxu2 %vm411_vm0, %v1055_v15 }
  0x42   : > { %1029 = vmatmul.msk.bf16.gmra.mxu3 %vm411_vm0, %v1063_v16 }
  0x4f   : > { %1006 = vmatmul.msk.bf16.gmra.mxu0 %vm411_vm0, %v1040_v17 }
  0x50   : > { %1014 = vmatmul.msk.bf16.gmra.mxu1 %vm411_vm0, %v1048_v18 }
  0x51   : > { %1022 = vmatmul.msk.bf16.gmra.mxu2 %vm411_vm0, %v1056_v19 }
  0x52   : > { %1030 = vmatmul.msk.bf16.gmra.mxu3 %vm411_vm0, %v1064_v20 }
  0x5f   : > { %1007 = vmatmul.msk.bf16.gmra.mxu0 %vm411_vm0, %v1041_v21 }
  0x60   : > { %1015 = vmatmul.msk.bf16.gmra.mxu1 %vm411_vm0, %v1049_v22 }
  0x61   : > { %1023 = vmatmul.msk.bf16.gmra.mxu2 %vm411_vm0, %v1057_v23 }
  0x62   : > { %1031 = vmatmul.msk.bf16.gmra.mxu3 %vm411_vm0, %v1065_v24 }
  0x6f   : > { %1008 = vmatmul.msk.bf16.gmra.mxu0 %vm411_vm0, %v1042_v25 }
  0x70   : > { %1016 = vmatmul.msk.bf16.gmra.mxu1 %vm411_vm0, %v1050_v26 }
  0x71   : > { %1024 = vmatmul.msk.bf16.gmra.mxu2 %vm411_vm0, %v1058_v27 }
  0x72   : > { %1032 = vmatmul.msk.bf16.gmra.mxu3 %vm411_vm0, %v1066_v28 }
  0x7f   : > { %1009 = vmatmul.msk.bf16.gmra.mxu0 %vm411_vm0, %v1043_v29 }
  0x80   : > { %1017 = vmatmul.msk.bf16.gmra.mxu1 %vm411_vm0, %v1051_v30 }
  0x81   : > { %1025 = vmatmul.msk.bf16.gmra.mxu2 %vm411_vm0, %v1059_v31 }
  0x82   : > { %1033 = vmatmul.msk.bf16.gmra.mxu3 %vm411_vm0, %v1067_v32 }
  0x8c   : > { %v517_v34 = vpop.f32.mrf.mxu0 }
  0x8d   : > { %v557_v35 = vpop.f32.mrf.mxu1  ;;  %v518_v36 = vadd.f32 %v1195_v33, %v517_v34 }
  0x8e   : > { %v558_v37 = vadd.f32 %v1195_v33, %v557_v35 }
  0x8f   : > { %v677_v38 = vmax.f32 %v518_v36, 0.0 }
  0x90   : > { %v693_v39 = vmax.f32 %v558_v37, 0.0 }
  0x91   : > { %741 = vst [vmem:[%s1203_s26] sm:$0xff] %v677_v38 }
  0x92   : > { %757 = vst [vmem:[%s1203_s26 + $0x80] sm:$0xff] %v693_v39 }
  0x94   : > { %v597_v40 = vpop.f32.mrf.mxu2  ;;  %v519_v44 = vpop.f32.mrf.mxu0 }
  0x95   : > { %v637_v41 = vpop.f32.mrf.mxu3  ;;  %v598_v42 = vadd.f32 %v1195_v33, %v597_v40  ;;  %v559_v45 = vpop.f32.mrf.mxu1  ;;  %v520_v46 = vadd.f32 %v1195_v33, %v519_v44 }
  0x96   : > { %v638_v43 = vadd.f32 %v1195_v33, %v637_v41  ;;  %v560_v47 = vadd.f32 %v1195_v33, %v559_v45 }
  0x97   : > { %v709_v48 = vmax.f32 %v598_v42, 0.0  ;;  %v678_v50 = vmax.f32 %v520_v46, 0.0 }
  0x98   : > { %v725_v49 = vmax.f32 %v638_v43, 0.0  ;;  %v694_v51 = vmax.f32 %v560_v47, 0.0 }
  0x99   : > { %773 = vst [vmem:[%s1203_s26 + $0x100] sm:$0xff] %v709_v48 }
  0x9a   : > { %789 = vst [vmem:[%s1203_s26 + $0x180] sm:$0xff] %v725_v49 }
  0x9b   : > { %742 = vst [vmem:[%s1203_s26 + $0x8] sm:$0xff] %v678_v50 }
  0x9c   : > { %758 = vst [vmem:[%s1203_s26 + $0x88] sm:$0xff] %v694_v51  ;;  %v599_v52 = vpop.f32.mrf.mxu2  ;;  %v522_v56 = vpop.f32.mrf.mxu0 }
  0x9d   : > { %v639_v53 = vpop.f32.mrf.mxu3  ;;  %v600_v54 = vadd.f32 %v1195_v33, %v599_v52  ;;  %v562_v57 = vpop.f32.mrf.mxu1  ;;  %v523_v58 = vadd.f32 %v1195_v33, %v522_v56 }
  0x9e   : > { %v640_v55 = vadd.f32 %v1195_v33, %v639_v53  ;;  %v563_v59 = vadd.f32 %v1195_v33, %v562_v57 }
  0x9f   : > { %v710_v60 = vmax.f32 %v600_v54, 0.0  ;;  %v679_v62 = vmax.f32 %v523_v58, 0.0 }
  0xa0   : > { %v726_v61 = vmax.f32 %v640_v55, 0.0  ;;  %v695_v63 = vmax.f32 %v563_v59, 0.0 }
  0xa1   : > { %774 = vst [vmem:[%s1203_s26 + $0x108] sm:$0xff] %v710_v60 }
  0xa2   : > { %790 = vst [vmem:[%s1203_s26 + $0x188] sm:$0xff] %v726_v61 }
  0xa3   : > { %743 = vst [vmem:[%s1203_s26 + $0x10] sm:$0xff] %v679_v62 }
  0xa4   : > { %759 = vst [vmem:[%s1203_s26 + $0x90] sm:$0xff] %v695_v63  ;;  %v602_v0 = vpop.f32.mrf.mxu2  ;;  %v524_v4 = vpop.f32.mrf.mxu0 }
  0xa5   : > { %v642_v1 = vpop.f32.mrf.mxu3  ;;  %v603_v2 = vadd.f32 %v1195_v33, %v602_v0  ;;  %v564_v5 = vpop.f32.mrf.mxu1  ;;  %v525_v6 = vadd.f32 %v1195_v33, %v524_v4 }
  0xa6   : > { %v643_v3 = vadd.f32 %v1195_v33, %v642_v1  ;;  %v565_v7 = vadd.f32 %v1195_v33, %v564_v5 }
  0xa7   : > { %v711_v8 = vmax.f32 %v603_v2, 0.0  ;;  %v680_v10 = vmax.f32 %v525_v6, 0.0 }
  0xa8   : > { %v727_v9 = vmax.f32 %v643_v3, 0.0  ;;  %v696_v11 = vmax.f32 %v565_v7, 0.0 }
  0xa9   : > { %775 = vst [vmem:[%s1203_s26 + $0x110] sm:$0xff] %v711_v8 }
  0xaa   : > { %791 = vst [vmem:[%s1203_s26 + $0x190] sm:$0xff] %v727_v9 }
  0xab   : > { %744 = vst [vmem:[%s1203_s26 + $0x18] sm:$0xff] %v680_v10 }
  0xac   : > { %760 = vst [vmem:[%s1203_s26 + $0x98] sm:$0xff] %v696_v11  ;;  %v604_v12 = vpop.f32.mrf.mxu2  ;;  %v527_v16 = vpop.f32.mrf.mxu0 }
  0xad   : > { %v644_v13 = vpop.f32.mrf.mxu3  ;;  %v605_v14 = vadd.f32 %v1195_v33, %v604_v12  ;;  %v567_v17 = vpop.f32.mrf.mxu1  ;;  %v528_v18 = vadd.f32 %v1195_v33, %v527_v16 }
  0xae   : > { %v645_v15 = vadd.f32 %v1195_v33, %v644_v13  ;;  %v568_v19 = vadd.f32 %v1195_v33, %v567_v17 }
  0xaf   : > { %v712_v20 = vmax.f32 %v605_v14, 0.0  ;;  %v681_v22 = vmax.f32 %v528_v18, 0.0 }
  0xb0   : > { %v728_v21 = vmax.f32 %v645_v15, 0.0  ;;  %v697_v23 = vmax.f32 %v568_v19, 0.0 }
  0xb1   : > { %776 = vst [vmem:[%s1203_s26 + $0x118] sm:$0xff] %v712_v20 }
  0xb2   : > { %792 = vst [vmem:[%s1203_s26 + $0x198] sm:$0xff] %v728_v21 }
  0xb3   : > { %745 = vst [vmem:[%s1203_s26 + $0x20] sm:$0xff] %v681_v22 }
  0xb4   : > { %761 = vst [vmem:[%s1203_s26 + $0xa0] sm:$0xff] %v697_v23  ;;  %v607_v24 = vpop.f32.mrf.mxu2  ;;  %v529_v28 = vpop.f32.mrf.mxu0 }
  0xb5   : > { %v647_v25 = vpop.f32.mrf.mxu3  ;;  %v608_v26 = vadd.f32 %v1195_v33, %v607_v24  ;;  %v569_v29 = vpop.f32.mrf.mxu1  ;;  %v530_v30 = vadd.f32 %v1195_v33, %v529_v28 }
  0xb6   : > { %v648_v27 = vadd.f32 %v1195_v33, %v647_v25  ;;  %v570_v31 = vadd.f32 %v1195_v33, %v569_v29 }
  0xb7   : > { %v713_v32 = vmax.f32 %v608_v26, 0.0  ;;  %v682_v35 = vmax.f32 %v530_v30, 0.0 }
  0xb8   : > { %v729_v34 = vmax.f32 %v648_v27, 0.0  ;;  %v698_v36 = vmax.f32 %v570_v31, 0.0 }
  0xb9   : > { %777 = vst [vmem:[%s1203_s26 + $0x120] sm:$0xff] %v713_v32 }
  0xba   : > { %793 = vst [vmem:[%s1203_s26 + $0x1a0] sm:$0xff] %v729_v34 }
  0xbb   : > { %746 = vst [vmem:[%s1203_s26 + $0x28] sm:$0xff] %v682_v35 }
  0xbc   : > { %762 = vst [vmem:[%s1203_s26 + $0xa8] sm:$0xff] %v698_v36  ;;  %v609_v37 = vpop.f32.mrf.mxu2  ;;  %v532_v41 = vpop.f32.mrf.mxu0 }
  0xbd   : > { %v649_v38 = vpop.f32.mrf.mxu3  ;;  %v610_v39 = vadd.f32 %v1195_v33, %v609_v37  ;;  %v572_v42 = vpop.f32.mrf.mxu1  ;;  %v533_v43 = vadd.f32 %v1195_v33, %v532_v41 }
  0xbe   : > { %v650_v40 = vadd.f32 %v1195_v33, %v649_v38  ;;  %v573_v44 = vadd.f32 %v1195_v33, %v572_v42 }
  0xbf   : > { %v714_v45 = vmax.f32 %v610_v39, 0.0  ;;  %v683_v47 = vmax.f32 %v533_v43, 0.0 }
  0xc0   : > { %v730_v46 = vmax.f32 %v650_v40, 0.0  ;;  %v699_v48 = vmax.f32 %v573_v44, 0.0 }
  0xc1   : > { %778 = vst [vmem:[%s1203_s26 + $0x128] sm:$0xff] %v714_v45 }
  0xc2   : > { %794 = vst [vmem:[%s1203_s26 + $0x1a8] sm:$0xff] %v730_v46 }
  0xc3   : > { %747 = vst [vmem:[%s1203_s26 + $0x30] sm:$0xff] %v683_v47 }
  0xc4   : > { %763 = vst [vmem:[%s1203_s26 + $0xb0] sm:$0xff] %v699_v48  ;;  %v612_v49 = vpop.f32.mrf.mxu2  ;;  %v534_v53 = vpop.f32.mrf.mxu0 }
  0xc5   : > { %v652_v50 = vpop.f32.mrf.mxu3  ;;  %v613_v51 = vadd.f32 %v1195_v33, %v612_v49  ;;  %v574_v54 = vpop.f32.mrf.mxu1  ;;  %v535_v55 = vadd.f32 %v1195_v33, %v534_v53 }
  0xc6   : > { %v653_v52 = vadd.f32 %v1195_v33, %v652_v50  ;;  %v575_v56 = vadd.f32 %v1195_v33, %v574_v54 }
  0xc7   : > { %v715_v57 = vmax.f32 %v613_v51, 0.0  ;;  %v684_v59 = vmax.f32 %v535_v55, 0.0 }
  0xc8   : > { %v731_v58 = vmax.f32 %v653_v52, 0.0  ;;  %v700_v60 = vmax.f32 %v575_v56, 0.0 }
  0xc9   : > { %779 = vst [vmem:[%s1203_s26 + $0x130] sm:$0xff] %v715_v57 }
  0xca   : > { %795 = vst [vmem:[%s1203_s26 + $0x1b0] sm:$0xff] %v731_v58 }
  0xcb   : > { %748 = vst [vmem:[%s1203_s26 + $0x38] sm:$0xff] %v684_v59 }
  0xcc   : > { %764 = vst [vmem:[%s1203_s26 + $0xb8] sm:$0xff] %v700_v60  ;;  %v614_v61 = vpop.f32.mrf.mxu2  ;;  %v537_v1 = vpop.f32.mrf.mxu0 }
  0xcd   : > { %v654_v62 = vpop.f32.mrf.mxu3  ;;  %v615_v63 = vadd.f32 %v1195_v33, %v614_v61  ;;  %v577_v2 = vpop.f32.mrf.mxu1  ;;  %v538_v3 = vadd.f32 %v1195_v33, %v537_v1 }
  0xce   : > { %v655_v0 = vadd.f32 %v1195_v33, %v654_v62  ;;  %v578_v4 = vadd.f32 %v1195_v33, %v577_v2 }
  0xcf   : > { %v716_v5 = vmax.f32 %v615_v63, 0.0  ;;  %v685_v7 = vmax.f32 %v538_v3, 0.0 }
  0xd0   : > { %v732_v6 = vmax.f32 %v655_v0, 0.0  ;;  %v701_v8 = vmax.f32 %v578_v4, 0.0 }
  0xd1   : > { %780 = vst [vmem:[%s1203_s26 + $0x138] sm:$0xff] %v716_v5 }
  0xd2   : > { %796 = vst [vmem:[%s1203_s26 + $0x1b8] sm:$0xff] %v732_v6 }
  0xd3   : > { %749 = vst [vmem:[%s1203_s26 + $0x40] sm:$0xff] %v685_v7 }
  0xd4   : > { %765 = vst [vmem:[%s1203_s26 + $0xc0] sm:$0xff] %v701_v8  ;;  %v617_v9 = vpop.f32.mrf.mxu2  ;;  %v539_v13 = vpop.f32.mrf.mxu0 }
  0xd5   : > { %v657_v10 = vpop.f32.mrf.mxu3  ;;  %v618_v11 = vadd.f32 %v1195_v33, %v617_v9  ;;  %v579_v14 = vpop.f32.mrf.mxu1  ;;  %v540_v15 = vadd.f32 %v1195_v33, %v539_v13 }
  0xd6   : > { %v658_v12 = vadd.f32 %v1195_v33, %v657_v10  ;;  %v580_v16 = vadd.f32 %v1195_v33, %v579_v14 }
  0xd7   : > { %v717_v17 = vmax.f32 %v618_v11, 0.0  ;;  %v686_v19 = vmax.f32 %v540_v15, 0.0 }
  0xd8   : > { %v733_v18 = vmax.f32 %v658_v12, 0.0  ;;  %v702_v20 = vmax.f32 %v580_v16, 0.0 }
  0xd9   : > { %781 = vst [vmem:[%s1203_s26 + $0x140] sm:$0xff] %v717_v17 }
  0xda   : > { %797 = vst [vmem:[%s1203_s26 + $0x1c0] sm:$0xff] %v733_v18 }
  0xdb   : > { %750 = vst [vmem:[%s1203_s26 + $0x48] sm:$0xff] %v686_v19 }
  0xdc   : > { %766 = vst [vmem:[%s1203_s26 + $0xc8] sm:$0xff] %v702_v20  ;;  %v619_v21 = vpop.f32.mrf.mxu2  ;;  %v542_v25 = vpop.f32.mrf.mxu0 }
  0xdd   : > { %v659_v22 = vpop.f32.mrf.mxu3  ;;  %v620_v23 = vadd.f32 %v1195_v33, %v619_v21  ;;  %v582_v26 = vpop.f32.mrf.mxu1  ;;  %v543_v27 = vadd.f32 %v1195_v33, %v542_v25 }
  0xde   : > { %v660_v24 = vadd.f32 %v1195_v33, %v659_v22  ;;  %v583_v28 = vadd.f32 %v1195_v33, %v582_v26 }
  0xdf   : > { %v718_v29 = vmax.f32 %v620_v23, 0.0  ;;  %v687_v31 = vmax.f32 %v543_v27, 0.0 }
  0xe0   : > { %v734_v30 = vmax.f32 %v660_v24, 0.0  ;;  %v703_v32 = vmax.f32 %v583_v28, 0.0 }
  0xe1   : > { %782 = vst [vmem:[%s1203_s26 + $0x148] sm:$0xff] %v718_v29 }
  0xe2   : > { %798 = vst [vmem:[%s1203_s26 + $0x1c8] sm:$0xff] %v734_v30 }
  0xe3   : > { %751 = vst [vmem:[%s1203_s26 + $0x50] sm:$0xff] %v687_v31 }
  0xe4   : > { %767 = vst [vmem:[%s1203_s26 + $0xd0] sm:$0xff] %v703_v32  ;;  %v622_v34 = vpop.f32.mrf.mxu2  ;;  %v544_v38 = vpop.f32.mrf.mxu0 }
  0xe5   : > { %v662_v35 = vpop.f32.mrf.mxu3  ;;  %v623_v36 = vadd.f32 %v1195_v33, %v622_v34  ;;  %v584_v39 = vpop.f32.mrf.mxu1  ;;  %v545_v40 = vadd.f32 %v1195_v33, %v544_v38 }
  0xe6   : > { %v663_v37 = vadd.f32 %v1195_v33, %v662_v35  ;;  %v585_v41 = vadd.f32 %v1195_v33, %v584_v39 }
  0xe7   : > { %v719_v42 = vmax.f32 %v623_v36, 0.0  ;;  %v688_v44 = vmax.f32 %v545_v40, 0.0 }
  0xe8   : > { %v735_v43 = vmax.f32 %v663_v37, 0.0  ;;  %v704_v45 = vmax.f32 %v585_v41, 0.0 }
  0xe9   : > { %783 = vst [vmem:[%s1203_s26 + $0x150] sm:$0xff] %v719_v42 }
  0xea   : > { %799 = vst [vmem:[%s1203_s26 + $0x1d0] sm:$0xff] %v735_v43 }
  0xeb   : > { %752 = vst [vmem:[%s1203_s26 + $0x58] sm:$0xff] %v688_v44 }
  0xec   : > { %768 = vst [vmem:[%s1203_s26 + $0xd8] sm:$0xff] %v704_v45  ;;  %v624_v46 = vpop.f32.mrf.mxu2  ;;  %v547_v50 = vpop.f32.mrf.mxu0 }
  0xed   : > { %v664_v47 = vpop.f32.mrf.mxu3  ;;  %v625_v48 = vadd.f32 %v1195_v33, %v624_v46  ;;  %v587_v51 = vpop.f32.mrf.mxu1  ;;  %v548_v52 = vadd.f32 %v1195_v33, %v547_v50 }
  0xee   : > { %v665_v49 = vadd.f32 %v1195_v33, %v664_v47  ;;  %v588_v53 = vadd.f32 %v1195_v33, %v587_v51 }
  0xef   : > { %v720_v54 = vmax.f32 %v625_v48, 0.0  ;;  %v689_v56 = vmax.f32 %v548_v52, 0.0 }
  0xf0   : > { %v736_v55 = vmax.f32 %v665_v49, 0.0  ;;  %v705_v57 = vmax.f32 %v588_v53, 0.0 }
  0xf1   : > { %784 = vst [vmem:[%s1203_s26 + $0x158] sm:$0xff] %v720_v54 }
  0xf2   : > { %800 = vst [vmem:[%s1203_s26 + $0x1d8] sm:$0xff] %v736_v55 }
  0xf3   : > { %753 = vst [vmem:[%s1203_s26 + $0x60] sm:$0xff] %v689_v56 }
  0xf4   : > { %769 = vst [vmem:[%s1203_s26 + $0xe0] sm:$0xff] %v705_v57  ;;  %v627_v58 = vpop.f32.mrf.mxu2  ;;  %v549_v62 = vpop.f32.mrf.mxu0 }
  0xf5   : > { %v667_v59 = vpop.f32.mrf.mxu3  ;;  %v628_v60 = vadd.f32 %v1195_v33, %v627_v58  ;;  %v589_v63 = vpop.f32.mrf.mxu1  ;;  %v550_v0 = vadd.f32 %v1195_v33, %v549_v62 }
  0xf6   : > { %v668_v61 = vadd.f32 %v1195_v33, %v667_v59  ;;  %v590_v1 = vadd.f32 %v1195_v33, %v589_v63 }
  0xf7   : > { %v721_v2 = vmax.f32 %v628_v60, 0.0  ;;  %v690_v4 = vmax.f32 %v550_v0, 0.0 }
  0xf8   : > { %v737_v3 = vmax.f32 %v668_v61, 0.0  ;;  %v706_v5 = vmax.f32 %v590_v1, 0.0 }
  0xf9   : > { %785 = vst [vmem:[%s1203_s26 + $0x160] sm:$0xff] %v721_v2 }
  0xfa   : > { %801 = vst [vmem:[%s1203_s26 + $0x1e0] sm:$0xff] %v737_v3 }
  0xfb   : > { %754 = vst [vmem:[%s1203_s26 + $0x68] sm:$0xff] %v690_v4 }
  0xfc   : > { %770 = vst [vmem:[%s1203_s26 + $0xe8] sm:$0xff] %v706_v5  ;;  %v629_v6 = vpop.f32.mrf.mxu2  ;;  %v552_v10 = vpop.f32.mrf.mxu0 }
  0xfd   : > { %v669_v7 = vpop.f32.mrf.mxu3  ;;  %v630_v8 = vadd.f32 %v1195_v33, %v629_v6  ;;  %v592_v11 = vpop.f32.mrf.mxu1  ;;  %v553_v12 = vadd.f32 %v1195_v33, %v552_v10 }
  0xfe   : > { %v670_v9 = vadd.f32 %v1195_v33, %v669_v7  ;;  %v593_v13 = vadd.f32 %v1195_v33, %v592_v11 }
  0xff   : > { %v722_v14 = vmax.f32 %v630_v8, 0.0  ;;  %v691_v16 = vmax.f32 %v553_v12, 0.0 }
 0x100   : > { %v738_v15 = vmax.f32 %v670_v9, 0.0  ;;  %v707_v17 = vmax.f32 %v593_v13, 0.0 }
 0x101   : > { %786 = vst [vmem:[%s1203_s26 + $0x168] sm:$0xff] %v722_v14 }
 0x102   : > { %802 = vst [vmem:[%s1203_s26 + $0x1e8] sm:$0xff] %v738_v15 }
 0x103   : > { %755 = vst [vmem:[%s1203_s26 + $0x70] sm:$0xff] %v691_v16 }
 0x104   : > { %771 = vst [vmem:[%s1203_s26 + $0xf0] sm:$0xff] %v707_v17  ;;  %v632_v18 = vpop.f32.mrf.mxu2  ;;  %v554_v22 = vpop.f32.mrf.mxu0 }
 0x105   : > { %v672_v19 = vpop.f32.mrf.mxu3  ;;  %v633_v20 = vadd.f32 %v1195_v33, %v632_v18  ;;  %v594_v23 = vpop.f32.mrf.mxu1  ;;  %v555_v24 = vadd.f32 %v1195_v33, %v554_v22 }
 0x106   : > { %v673_v21 = vadd.f32 %v1195_v33, %v672_v19  ;;  %v595_v25 = vadd.f32 %v1195_v33, %v594_v23 }
 0x107   : > { %v723_v26 = vmax.f32 %v633_v20, 0.0  ;;  %v692_v28 = vmax.f32 %v555_v24, 0.0 }
 0x108   : > { %v739_v27 = vmax.f32 %v673_v21, 0.0  ;;  %v708_v29 = vmax.f32 %v595_v25, 0.0 }
 0x109   : > { %787 = vst [vmem:[%s1203_s26 + $0x170] sm:$0xff] %v723_v26 }
 0x10a   : > { %803 = vst [vmem:[%s1203_s26 + $0x1f0] sm:$0xff] %v739_v27 }
 0x10b   : > { %756 = vst [vmem:[%s1203_s26 + $0x78] sm:$0xff] %v692_v28 }
 0x10c   : > { %772 = vst [vmem:[%s1203_s26 + $0xf8] sm:$0xff] %v708_v29  ;;  %v634_v30 = vpop.f32.mrf.mxu2 }
 0x10d   : > { %v674_v31 = vpop.f32.mrf.mxu3  ;;  %v635_v32 = vadd.f32 %v1195_v33, %v634_v30 }
 0x10e   : > { %v675_v34 = vadd.f32 %v1195_v33, %v674_v31 }
 0x10f   : > { %v724_v35 = vmax.f32 %v635_v32, 0.0 }
 0x110   : > { %v740_v36 = vmax.f32 %v675_v34, 0.0 }
 0x111   : > { %788 = vst [vmem:[%s1203_s26 + $0x178] sm:$0xff] %v724_v35 }
 0x112   : > { %804 = vst [vmem:[%s1203_s26 + $0x1f8] sm:$0xff] %v740_v36 }
 0x113 PF: > { %s13_s12 = sadd.s32 1, %s1087_s12  }
 0x114   : > { %p10_p4 = scmp.ge.s32.totalorder %s13_s12, 6  }
 0x116   :  { %12 = sbr.rel (!%p10_p4) target bundleno = 1 (0x1), region = 62 }

// kernel: xfeat_forward.23
= control target key start
LH: loop header
LB: loop body
LE: loop exit
PB: predicated region body
PF: predicated region fallthrough
CT: control target
= control target key end

     0   :  { %vm360_vm0 = vcmask 1043456   ;;  %vm263_vm1 = vcmask 326656   ;;  %s1295_s1 = inlined_call_operand.vmem [shape: bf16[40,128], index: 1, kind: input, shape index: {}]   ;;  %s1296_s2 = inlined_call_operand.vmem [shape: f32[1,128], index: 2, kind: input, shape index: {}]   ;;  %s1297_s0 = inlined_call_operand.vmem [shape: bf16[512,40], index: 0, kind: input, shape index: {}]   ;;  %s1298_s3 = inlined_call_operand.vmem [shape: f32[512,128], index: 3, kind: output, shape index: {}]  }
   0x1   :  { %v83_v0 = vld [vmem:[%s1295_s1 + $0x10] sm:$0xf]  ;;  %v866_v4 = vld [vmem:[%s1295_s1 + $0x8] sm:$0xff]  ;;  %v865_v5 = vld [vmem:[%s1295_s1] sm:$0xff] }
   0x2   :  { %v257_v1 = vunpack.c.l.b16 %v83_v0  ;;  %v833_v6 = vld [vmem:[%s1297_s0] sm:$0xff]  ;;  %v834_v10 = vld [vmem:[%s1297_s0 + $0x8] sm:$0xff]  ;;  %v835_v14 = vld [vmem:[%s1297_s0 + $0x10] sm:$0xff] }
   0x3   :  { %v841_v7 = vld [vmem:[%s1297_s0 + $0x40] sm:$0xff]  ;;  %v842_v11 = vld [vmem:[%s1297_s0 + $0x48] sm:$0xff]  ;;  %v843_v15 = vld [vmem:[%s1297_s0 + $0x50] sm:$0xff] }
   0x4   :  { %v260_v2 = vpack.c.b16 %v257_v1, %v257_v1  ;;  %v849_v8 = vld [vmem:[%s1297_s0 + $0x80] sm:$0xff]  ;;  %v850_v12 = vld [vmem:[%s1297_s0 + $0x88] sm:$0xff]  ;;  %v851_v16 = vld [vmem:[%s1297_s0 + $0x90] sm:$0xff] }
   0x5   :  { %v857_v9 = vld [vmem:[%s1297_s0 + $0xc0] sm:$0xff]  ;;  %v858_v13 = vld [vmem:[%s1297_s0 + $0xc8] sm:$0xff]  ;;  %v859_v17 = vld [vmem:[%s1297_s0 + $0xd0] sm:$0xff] }
   0x6   :  { %v362_v3 = vsel %vm360_vm0, %v260_v2, 0  ;;  %v836_v18 = vld [vmem:[%s1297_s0 + $0x18] sm:$0xff]  ;;  %v837_v22 = vld [vmem:[%s1297_s0 + $0x20] sm:$0xff]  ;;  %v838_v26 = vld [vmem:[%s1297_s0 + $0x28] sm:$0xff] }
   0x7   :  { %369 = vmatpush.bf16.msra.mxu0 %v362_v3  ;;  %867 = vmatpush.bf16.msra.mxu1 %v362_v3  ;;  %v844_v19 = vld [vmem:[%s1297_s0 + $0x58] sm:$0xff]  ;;  %v845_v23 = vld [vmem:[%s1297_s0 + $0x60] sm:$0xff]  ;;  %v846_v27 = vld [vmem:[%s1297_s0 + $0x68] sm:$0xff] }
   0x8   :  { %868 = vmatpush.bf16.msra.mxu2 %v362_v3  ;;  %869 = vmatpush.bf16.msra.mxu3 %v362_v3  ;;  %v852_v20 = vld [vmem:[%s1297_s0 + $0x98] sm:$0xff]  ;;  %v853_v24 = vld [vmem:[%s1297_s0 + $0xa0] sm:$0xff]  ;;  %v854_v28 = vld [vmem:[%s1297_s0 + $0xa8] sm:$0xff] }
   0x9   :  { %v860_v21 = vld [vmem:[%s1297_s0 + $0xd8] sm:$0xff]  ;;  %v861_v25 = vld [vmem:[%s1297_s0 + $0xe0] sm:$0xff]  ;;  %v862_v29 = vld [vmem:[%s1297_s0 + $0xe8] sm:$0xff] }
   0xa   :  { %v839_v30 = vld [vmem:[%s1297_s0 + $0x30] sm:$0xff]  ;;  %v840_v34 = vld [vmem:[%s1297_s0 + $0x38] sm:$0xff]  ;;  %v1037_v38 = vld [vmem:[%s1296_s2] ss:$0 sm:$0xff] }
   0xb   :  { %370 = vmatpush.bf16.msra.mxu0 %v866_v4  ;;  %870 = vmatpush.bf16.msra.mxu1 %v866_v4  ;;  %v847_v31 = vld [vmem:[%s1297_s0 + $0x70] sm:$0xff]  ;;  %v848_v35 = vld [vmem:[%s1297_s0 + $0x78] sm:$0xff] }
   0xc   :  { %871 = vmatpush.bf16.msra.mxu2 %v866_v4  ;;  %872 = vmatpush.bf16.msra.mxu3 %v866_v4  ;;  %v855_v32 = vld [vmem:[%s1297_s0 + $0xb0] sm:$0xff]  ;;  %v856_v36 = vld [vmem:[%s1297_s0 + $0xb8] sm:$0xff] }
   0xd   :  { %v863_v33 = vld [vmem:[%s1297_s0 + $0xf0] sm:$0xff]  ;;  %v864_v37 = vld [vmem:[%s1297_s0 + $0xf8] sm:$0xff] }
   0xf   :  { %371 = vmatpush.bf16.msra.mxu0 %v865_v5  ;;  %873 = vmatpush.bf16.msra.mxu1 %v865_v5 }
  0x10   :  { %874 = vmatpush.bf16.msra.mxu2 %v865_v5  ;;  %875 = vmatpush.bf16.msra.mxu3 %v865_v5 }
  0x12   :  { %801 = vmatmul.msk.bf16.vlgmr.msra.gmra.mxu0 %vm263_vm1, %v833_v6  ;;  %809 = vmatmul.msk.bf16.vlgmr.msra.gmra.mxu1 %vm263_vm1, %v841_v7 }
  0x13   :  { %817 = vmatmul.msk.bf16.vlgmr.msra.gmra.mxu2 %vm263_vm1, %v849_v8  ;;  %825 = vmatmul.msk.bf16.vlgmr.msra.gmra.mxu3 %vm263_vm1, %v857_v9 }
  0x22   :  { %802 = vmatmul.msk.bf16.gmra.mxu0 %vm263_vm1, %v834_v10  ;;  %810 = vmatmul.msk.bf16.gmra.mxu1 %vm263_vm1, %v842_v11 }
  0x23   :  { %818 = vmatmul.msk.bf16.gmra.mxu2 %vm263_vm1, %v850_v12  ;;  %826 = vmatmul.msk.bf16.gmra.mxu3 %vm263_vm1, %v858_v13 }
  0x32   :  { %803 = vmatmul.msk.bf16.gmra.mxu0 %vm263_vm1, %v835_v14  ;;  %811 = vmatmul.msk.bf16.gmra.mxu1 %vm263_vm1, %v843_v15 }
  0x33   :  { %819 = vmatmul.msk.bf16.gmra.mxu2 %vm263_vm1, %v851_v16  ;;  %827 = vmatmul.msk.bf16.gmra.mxu3 %vm263_vm1, %v859_v17 }
  0x42   :  { %804 = vmatmul.msk.bf16.gmra.mxu0 %vm263_vm1, %v836_v18  ;;  %812 = vmatmul.msk.bf16.gmra.mxu1 %vm263_vm1, %v844_v19 }
  0x43   :  { %820 = vmatmul.msk.bf16.gmra.mxu2 %vm263_vm1, %v852_v20  ;;  %828 = vmatmul.msk.bf16.gmra.mxu3 %vm263_vm1, %v860_v21 }
  0x52   :  { %805 = vmatmul.msk.bf16.gmra.mxu0 %vm263_vm1, %v837_v22  ;;  %813 = vmatmul.msk.bf16.gmra.mxu1 %vm263_vm1, %v845_v23 }
  0x53   :  { %821 = vmatmul.msk.bf16.gmra.mxu2 %vm263_vm1, %v853_v24  ;;  %829 = vmatmul.msk.bf16.gmra.mxu3 %vm263_vm1, %v861_v25 }
  0x62   :  { %806 = vmatmul.msk.bf16.gmra.mxu0 %vm263_vm1, %v838_v26  ;;  %814 = vmatmul.msk.bf16.gmra.mxu1 %vm263_vm1, %v846_v27 }
  0x63   :  { %822 = vmatmul.msk.bf16.gmra.mxu2 %vm263_vm1, %v854_v28  ;;  %830 = vmatmul.msk.bf16.gmra.mxu3 %vm263_vm1, %v862_v29 }
  0x72   :  { %807 = vmatmul.msk.bf16.gmra.mxu0 %vm263_vm1, %v839_v30  ;;  %815 = vmatmul.msk.bf16.gmra.mxu1 %vm263_vm1, %v847_v31 }
  0x73   :  { %823 = vmatmul.msk.bf16.gmra.mxu2 %vm263_vm1, %v855_v32  ;;  %831 = vmatmul.msk.bf16.gmra.mxu3 %vm263_vm1, %v863_v33 }
  0x82   :  { %808 = vmatmul.msk.bf16.gmra.mxu0 %vm263_vm1, %v840_v34  ;;  %816 = vmatmul.msk.bf16.gmra.mxu1 %vm263_vm1, %v848_v35 }
  0x83   :  { %824 = vmatmul.msk.bf16.gmra.mxu2 %vm263_vm1, %v856_v36  ;;  %832 = vmatmul.msk.bf16.gmra.mxu3 %vm263_vm1, %v864_v37 }
  0x8f   :  { %v373_v39 = vpop.f32.mrf.mxu0  ;;  %v413_v40 = vpop.f32.mrf.mxu1 }
  0x90   :  { %v374_v41 = vadd.f32 %v1037_v38, %v373_v39  ;;  %v414_v42 = vadd.f32 %v1037_v38, %v413_v40 }
  0x92   :  { %v533_v43 = vmax.f32 %v374_v41, 0.0  ;;  %v549_v44 = vmax.f32 %v414_v42, 0.0 }
  0x94   :  { %597 = vst [vmem:[%s1298_s3] sm:$0xff] %v533_v43 }
  0x95   :  { %613 = vst [vmem:[%s1298_s3 + $0x80] sm:$0xff] %v549_v44 }
  0x96   :  { %v453_v45 = vpop.f32.mrf.mxu2  ;;  %v493_v46 = vpop.f32.mrf.mxu3 }
  0x97   :  { %v454_v47 = vadd.f32 %v1037_v38, %v453_v45  ;;  %v494_v48 = vadd.f32 %v1037_v38, %v493_v46  ;;  %v375_v49 = vpop.f32.mrf.mxu0  ;;  %v415_v50 = vpop.f32.mrf.mxu1 }
  0x98   :  { %v376_v51 = vadd.f32 %v1037_v38, %v375_v49  ;;  %v416_v52 = vadd.f32 %v1037_v38, %v415_v50 }
  0x99   :  { %v565_v53 = vmax.f32 %v454_v47, 0.0  ;;  %v581_v54 = vmax.f32 %v494_v48, 0.0 }
  0x9a   :  { %v534_v55 = vmax.f32 %v376_v51, 0.0  ;;  %v550_v56 = vmax.f32 %v416_v52, 0.0 }
  0x9b   :  { %629 = vst [vmem:[%s1298_s3 + $0x100] sm:$0xff] %v565_v53 }
  0x9c   :  { %645 = vst [vmem:[%s1298_s3 + $0x180] sm:$0xff] %v581_v54 }
  0x9d   :  { %598 = vst [vmem:[%s1298_s3 + $0x8] sm:$0xff] %v534_v55 }
  0x9e   :  { %614 = vst [vmem:[%s1298_s3 + $0x88] sm:$0xff] %v550_v56  ;;  %v455_v57 = vpop.f32.mrf.mxu2  ;;  %v495_v58 = vpop.f32.mrf.mxu3 }
  0x9f   :  { %v456_v59 = vadd.f32 %v1037_v38, %v455_v57  ;;  %v496_v60 = vadd.f32 %v1037_v38, %v495_v58  ;;  %v378_v61 = vpop.f32.mrf.mxu0  ;;  %v418_v62 = vpop.f32.mrf.mxu1 }
  0xa0   :  { %v379_v63 = vadd.f32 %v1037_v38, %v378_v61  ;;  %v419_v0 = vadd.f32 %v1037_v38, %v418_v62 }
  0xa1   :  { %v566_v1 = vmax.f32 %v456_v59, 0.0  ;;  %v582_v2 = vmax.f32 %v496_v60, 0.0 }
  0xa2   :  { %v535_v3 = vmax.f32 %v379_v63, 0.0  ;;  %v551_v4 = vmax.f32 %v419_v0, 0.0 }
  0xa3   :  { %630 = vst [vmem:[%s1298_s3 + $0x108] sm:$0xff] %v566_v1 }
  0xa4   :  { %646 = vst [vmem:[%s1298_s3 + $0x188] sm:$0xff] %v582_v2 }
  0xa5   :  { %599 = vst [vmem:[%s1298_s3 + $0x10] sm:$0xff] %v535_v3 }
  0xa6   :  { %615 = vst [vmem:[%s1298_s3 + $0x90] sm:$0xff] %v551_v4  ;;  %v458_v5 = vpop.f32.mrf.mxu2  ;;  %v498_v6 = vpop.f32.mrf.mxu3 }
  0xa7   :  { %v459_v7 = vadd.f32 %v1037_v38, %v458_v5  ;;  %v499_v8 = vadd.f32 %v1037_v38, %v498_v6  ;;  %v380_v9 = vpop.f32.mrf.mxu0  ;;  %v420_v10 = vpop.f32.mrf.mxu1 }
  0xa8   :  { %v381_v11 = vadd.f32 %v1037_v38, %v380_v9  ;;  %v421_v12 = vadd.f32 %v1037_v38, %v420_v10 }
  0xa9   :  { %v567_v13 = vmax.f32 %v459_v7, 0.0  ;;  %v583_v14 = vmax.f32 %v499_v8, 0.0 }
  0xaa   :  { %v536_v15 = vmax.f32 %v381_v11, 0.0  ;;  %v552_v16 = vmax.f32 %v421_v12, 0.0 }
  0xab   :  { %631 = vst [vmem:[%s1298_s3 + $0x110] sm:$0xff] %v567_v13 }
  0xac   :  { %647 = vst [vmem:[%s1298_s3 + $0x190] sm:$0xff] %v583_v14 }
  0xad   :  { %600 = vst [vmem:[%s1298_s3 + $0x18] sm:$0xff] %v536_v15 }
  0xae   :  { %616 = vst [vmem:[%s1298_s3 + $0x98] sm:$0xff] %v552_v16  ;;  %v460_v17 = vpop.f32.mrf.mxu2  ;;  %v500_v18 = vpop.f32.mrf.mxu3 }
  0xaf   :  { %v461_v19 = vadd.f32 %v1037_v38, %v460_v17  ;;  %v501_v20 = vadd.f32 %v1037_v38, %v500_v18  ;;  %v383_v21 = vpop.f32.mrf.mxu0  ;;  %v423_v22 = vpop.f32.mrf.mxu1 }
  0xb0   :  { %v384_v23 = vadd.f32 %v1037_v38, %v383_v21  ;;  %v424_v24 = vadd.f32 %v1037_v38, %v423_v22 }
  0xb1   :  { %v568_v25 = vmax.f32 %v461_v19, 0.0  ;;  %v584_v26 = vmax.f32 %v501_v20, 0.0 }
  0xb2   :  { %v537_v27 = vmax.f32 %v384_v23, 0.0  ;;  %v553_v28 = vmax.f32 %v424_v24, 0.0 }
  0xb3   :  { %632 = vst [vmem:[%s1298_s3 + $0x118] sm:$0xff] %v568_v25 }
  0xb4   :  { %648 = vst [vmem:[%s1298_s3 + $0x198] sm:$0xff] %v584_v26 }
  0xb5   :  { %601 = vst [vmem:[%s1298_s3 + $0x20] sm:$0xff] %v537_v27 }
  0xb6   :  { %617 = vst [vmem:[%s1298_s3 + $0xa0] sm:$0xff] %v553_v28  ;;  %v463_v29 = vpop.f32.mrf.mxu2  ;;  %v503_v30 = vpop.f32.mrf.mxu3 }
  0xb7   :  { %v464_v31 = vadd.f32 %v1037_v38, %v463_v29  ;;  %v504_v32 = vadd.f32 %v1037_v38, %v503_v30  ;;  %v385_v33 = vpop.f32.mrf.mxu0  ;;  %v425_v34 = vpop.f32.mrf.mxu1 }
  0xb8   :  { %v386_v35 = vadd.f32 %v1037_v38, %v385_v33  ;;  %v426_v36 = vadd.f32 %v1037_v38, %v425_v34 }
  0xb9   :  { %v569_v37 = vmax.f32 %v464_v31, 0.0  ;;  %v585_v39 = vmax.f32 %v504_v32, 0.0 }
  0xba   :  { %v538_v40 = vmax.f32 %v386_v35, 0.0  ;;  %v554_v41 = vmax.f32 %v426_v36, 0.0 }
  0xbb   :  { %633 = vst [vmem:[%s1298_s3 + $0x120] sm:$0xff] %v569_v37 }
  0xbc   :  { %649 = vst [vmem:[%s1298_s3 + $0x1a0] sm:$0xff] %v585_v39 }
  0xbd   :  { %602 = vst [vmem:[%s1298_s3 + $0x28] sm:$0xff] %v538_v40 }
  0xbe   :  { %618 = vst [vmem:[%s1298_s3 + $0xa8] sm:$0xff] %v554_v41  ;;  %v465_v42 = vpop.f32.mrf.mxu2  ;;  %v505_v43 = vpop.f32.mrf.mxu3 }
  0xbf   :  { %v466_v44 = vadd.f32 %v1037_v38, %v465_v42  ;;  %v506_v45 = vadd.f32 %v1037_v38, %v505_v43  ;;  %v388_v46 = vpop.f32.mrf.mxu0  ;;  %v428_v47 = vpop.f32.mrf.mxu1 }
  0xc0   :  { %v389_v48 = vadd.f32 %v1037_v38, %v388_v46  ;;  %v429_v49 = vadd.f32 %v1037_v38, %v428_v47 }
  0xc1   :  { %v570_v50 = vmax.f32 %v466_v44, 0.0  ;;  %v586_v51 = vmax.f32 %v506_v45, 0.0 }
  0xc2   :  { %v539_v52 = vmax.f32 %v389_v48, 0.0  ;;  %v555_v53 = vmax.f32 %v429_v49, 0.0 }
  0xc3   :  { %634 = vst [vmem:[%s1298_s3 + $0x128] sm:$0xff] %v570_v50 }
  0xc4   :  { %650 = vst [vmem:[%s1298_s3 + $0x1a8] sm:$0xff] %v586_v51 }
  0xc5   :  { %603 = vst [vmem:[%s1298_s3 + $0x30] sm:$0xff] %v539_v52 }
  0xc6   :  { %619 = vst [vmem:[%s1298_s3 + $0xb0] sm:$0xff] %v555_v53  ;;  %v468_v54 = vpop.f32.mrf.mxu2  ;;  %v508_v55 = vpop.f32.mrf.mxu3 }
  0xc7   :  { %v469_v56 = vadd.f32 %v1037_v38, %v468_v54  ;;  %v509_v57 = vadd.f32 %v1037_v38, %v508_v55  ;;  %v390_v58 = vpop.f32.mrf.mxu0  ;;  %v430_v59 = vpop.f32.mrf.mxu1 }
  0xc8   :  { %v391_v60 = vadd.f32 %v1037_v38, %v390_v58  ;;  %v431_v61 = vadd.f32 %v1037_v38, %v430_v59 }
  0xc9   :  { %v571_v62 = vmax.f32 %v469_v56, 0.0  ;;  %v587_v63 = vmax.f32 %v509_v57, 0.0 }
  0xca   :  { %v540_v0 = vmax.f32 %v391_v60, 0.0  ;;  %v556_v1 = vmax.f32 %v431_v61, 0.0 }
  0xcb   :  { %635 = vst [vmem:[%s1298_s3 + $0x130] sm:$0xff] %v571_v62 }
  0xcc   :  { %651 = vst [vmem:[%s1298_s3 + $0x1b0] sm:$0xff] %v587_v63 }
  0xcd   :  { %604 = vst [vmem:[%s1298_s3 + $0x38] sm:$0xff] %v540_v0 }
  0xce   :  { %620 = vst [vmem:[%s1298_s3 + $0xb8] sm:$0xff] %v556_v1  ;;  %v470_v2 = vpop.f32.mrf.mxu2  ;;  %v510_v3 = vpop.f32.mrf.mxu3 }
  0xcf   :  { %v471_v4 = vadd.f32 %v1037_v38, %v470_v2  ;;  %v511_v5 = vadd.f32 %v1037_v38, %v510_v3  ;;  %v393_v6 = vpop.f32.mrf.mxu0  ;;  %v433_v7 = vpop.f32.mrf.mxu1 }
  0xd0   :  { %v394_v8 = vadd.f32 %v1037_v38, %v393_v6  ;;  %v434_v9 = vadd.f32 %v1037_v38, %v433_v7 }
  0xd1   :  { %v572_v10 = vmax.f32 %v471_v4, 0.0  ;;  %v588_v11 = vmax.f32 %v511_v5, 0.0 }
  0xd2   :  { %v541_v12 = vmax.f32 %v394_v8, 0.0  ;;  %v557_v13 = vmax.f32 %v434_v9, 0.0 }
  0xd3   :  { %636 = vst [vmem:[%s1298_s3 + $0x138] sm:$0xff] %v572_v10 }
  0xd4   :  { %652 = vst [vmem:[%s1298_s3 + $0x1b8] sm:$0xff] %v588_v11 }
  0xd5   :  { %605 = vst [vmem:[%s1298_s3 + $0x40] sm:$0xff] %v541_v12 }
  0xd6   :  { %621 = vst [vmem:[%s1298_s3 + $0xc0] sm:$0xff] %v557_v13  ;;  %v473_v14 = vpop.f32.mrf.mxu2  ;;  %v513_v15 = vpop.f32.mrf.mxu3 }
  0xd7   :  { %v474_v16 = vadd.f32 %v1037_v38, %v473_v14  ;;  %v514_v17 = vadd.f32 %v1037_v38, %v513_v15  ;;  %v395_v18 = vpop.f32.mrf.mxu0  ;;  %v435_v19 = vpop.f32.mrf.mxu1 }
  0xd8   :  { %v396_v20 = vadd.f32 %v1037_v38, %v395_v18  ;;  %v436_v21 = vadd.f32 %v1037_v38, %v435_v19 }
  0xd9   :  { %v573_v22 = vmax.f32 %v474_v16, 0.0  ;;  %v589_v23 = vmax.f32 %v514_v17, 0.0 }
  0xda   :  { %v542_v24 = vmax.f32 %v396_v20, 0.0  ;;  %v558_v25 = vmax.f32 %v436_v21, 0.0 }
  0xdb   :  { %637 = vst [vmem:[%s1298_s3 + $0x140] sm:$0xff] %v573_v22 }
  0xdc   :  { %653 = vst [vmem:[%s1298_s3 + $0x1c0] sm:$0xff] %v589_v23 }
  0xdd   :  { %606 = vst [vmem:[%s1298_s3 + $0x48] sm:$0xff] %v542_v24 }
  0xde   :  { %622 = vst [vmem:[%s1298_s3 + $0xc8] sm:$0xff] %v558_v25  ;;  %v475_v26 = vpop.f32.mrf.mxu2  ;;  %v515_v27 = vpop.f32.mrf.mxu3 }
  0xdf   :  { %v476_v28 = vadd.f32 %v1037_v38, %v475_v26  ;;  %v516_v29 = vadd.f32 %v1037_v38, %v515_v27  ;;  %v398_v30 = vpop.f32.mrf.mxu0  ;;  %v438_v31 = vpop.f32.mrf.mxu1 }
  0xe0   :  { %v399_v32 = vadd.f32 %v1037_v38, %v398_v30  ;;  %v439_v33 = vadd.f32 %v1037_v38, %v438_v31 }
  0xe1   :  { %v574_v34 = vmax.f32 %v476_v28, 0.0  ;;  %v590_v35 = vmax.f32 %v516_v29, 0.0 }
  0xe2   :  { %v543_v36 = vmax.f32 %v399_v32, 0.0  ;;  %v559_v37 = vmax.f32 %v439_v33, 0.0 }
  0xe3   :  { %638 = vst [vmem:[%s1298_s3 + $0x148] sm:$0xff] %v574_v34 }
  0xe4   :  { %654 = vst [vmem:[%s1298_s3 + $0x1c8] sm:$0xff] %v590_v35 }
  0xe5   :  { %607 = vst [vmem:[%s1298_s3 + $0x50] sm:$0xff] %v543_v36 }
  0xe6   :  { %623 = vst [vmem:[%s1298_s3 + $0xd0] sm:$0xff] %v559_v37  ;;  %v478_v39 = vpop.f32.mrf.mxu2  ;;  %v518_v40 = vpop.f32.mrf.mxu3 }
  0xe7   :  { %v479_v41 = vadd.f32 %v1037_v38, %v478_v39  ;;  %v519_v42 = vadd.f32 %v1037_v38, %v518_v40  ;;  %v400_v43 = vpop.f32.mrf.mxu0  ;;  %v440_v44 = vpop.f32.mrf.mxu1 }
  0xe8   :  { %v401_v45 = vadd.f32 %v1037_v38, %v400_v43  ;;  %v441_v46 = vadd.f32 %v1037_v38, %v440_v44 }
  0xe9   :  { %v575_v47 = vmax.f32 %v479_v41, 0.0  ;;  %v591_v48 = vmax.f32 %v519_v42, 0.0 }
  0xea   :  { %v544_v49 = vmax.f32 %v401_v45, 0.0  ;;  %v560_v50 = vmax.f32 %v441_v46, 0.0 }
  0xeb   :  { %639 = vst [vmem:[%s1298_s3 + $0x150] sm:$0xff] %v575_v47 }
  0xec   :  { %655 = vst [vmem:[%s1298_s3 + $0x1d0] sm:$0xff] %v591_v48 }
  0xed   :  { %608 = vst [vmem:[%s1298_s3 + $0x58] sm:$0xff] %v544_v49 }
  0xee   :  { %624 = vst [vmem:[%s1298_s3 + $0xd8] sm:$0xff] %v560_v50  ;;  %v480_v51 = vpop.f32.mrf.mxu2  ;;  %v520_v52 = vpop.f32.mrf.mxu3 }
  0xef   :  { %v481_v53 = vadd.f32 %v1037_v38, %v480_v51  ;;  %v521_v54 = vadd.f32 %v1037_v38, %v520_v52  ;;  %v403_v55 = vpop.f32.mrf.mxu0  ;;  %v443_v56 = vpop.f32.mrf.mxu1 }
  0xf0   :  { %v404_v57 = vadd.f32 %v1037_v38, %v403_v55  ;;  %v444_v58 = vadd.f32 %v1037_v38, %v443_v56 }
  0xf1   :  { %v576_v59 = vmax.f32 %v481_v53, 0.0  ;;  %v592_v60 = vmax.f32 %v521_v54, 0.0 }
  0xf2   :  { %v545_v61 = vmax.f32 %v404_v57, 0.0  ;;  %v561_v62 = vmax.f32 %v444_v58, 0.0 }
  0xf3   :  { %640 = vst [vmem:[%s1298_s3 + $0x158] sm:$0xff] %v576_v59 }
  0xf4   :  { %656 = vst [vmem:[%s1298_s3 + $0x1d8] sm:$0xff] %v592_v60 }
  0xf5   :  { %609 = vst [vmem:[%s1298_s3 + $0x60] sm:$0xff] %v545_v61 }
  0xf6   :  { %625 = vst [vmem:[%s1298_s3 + $0xe0] sm:$0xff] %v561_v62  ;;  %v483_v63 = vpop.f32.mrf.mxu2  ;;  %v523_v0 = vpop.f32.mrf.mxu3 }
  0xf7   :  { %v484_v1 = vadd.f32 %v1037_v38, %v483_v63  ;;  %v524_v2 = vadd.f32 %v1037_v38, %v523_v0  ;;  %v405_v3 = vpop.f32.mrf.mxu0  ;;  %v445_v4 = vpop.f32.mrf.mxu1 }
  0xf8   :  { %v406_v5 = vadd.f32 %v1037_v38, %v405_v3  ;;  %v446_v6 = vadd.f32 %v1037_v38, %v445_v4 }
  0xf9   :  { %v577_v7 = vmax.f32 %v484_v1, 0.0  ;;  %v593_v8 = vmax.f32 %v524_v2, 0.0 }
  0xfa   :  { %v546_v9 = vmax.f32 %v406_v5, 0.0  ;;  %v562_v10 = vmax.f32 %v446_v6, 0.0 }
  0xfb   :  { %641 = vst [vmem:[%s1298_s3 + $0x160] sm:$0xff] %v577_v7 }
  0xfc   :  { %657 = vst [vmem:[%s1298_s3 + $0x1e0] sm:$0xff] %v593_v8 }
  0xfd   :  { %610 = vst [vmem:[%s1298_s3 + $0x68] sm:$0xff] %v546_v9 }
  0xfe   :  { %626 = vst [vmem:[%s1298_s3 + $0xe8] sm:$0xff] %v562_v10  ;;  %v485_v11 = vpop.f32.mrf.mxu2  ;;  %v525_v12 = vpop.f32.mrf.mxu3 }
  0xff   :  { %v486_v13 = vadd.f32 %v1037_v38, %v485_v11  ;;  %v526_v14 = vadd.f32 %v1037_v38, %v525_v12  ;;  %v408_v15 = vpop.f32.mrf.mxu0  ;;  %v448_v16 = vpop.f32.mrf.mxu1 }
 0x100   :  { %v409_v17 = vadd.f32 %v1037_v38, %v408_v15  ;;  %v449_v18 = vadd.f32 %v1037_v38, %v448_v16 }
 0x101   :  { %v578_v19 = vmax.f32 %v486_v13, 0.0  ;;  %v594_v20 = vmax.f32 %v526_v14, 0.0 }
 0x102   :  { %v547_v21 = vmax.f32 %v409_v17, 0.0  ;;  %v563_v22 = vmax.f32 %v449_v18, 0.0 }
 0x103   :  { %642 = vst [vmem:[%s1298_s3 + $0x168] sm:$0xff] %v578_v19 }
 0x104   :  { %658 = vst [vmem:[%s1298_s3 + $0x1e8] sm:$0xff] %v594_v20 }
 0x105   :  { %611 = vst [vmem:[%s1298_s3 + $0x70] sm:$0xff] %v547_v21 }
 0x106   :  { %627 = vst [vmem:[%s1298_s3 + $0xf0] sm:$0xff] %v563_v22  ;;  %v488_v23 = vpop.f32.mrf.mxu2  ;;  %v528_v24 = vpop.f32.mrf.mxu3 }
 0x107   :  { %v489_v25 = vadd.f32 %v1037_v38, %v488_v23  ;;  %v529_v26 = vadd.f32 %v1037_v38, %v528_v24  ;;  %v410_v27 = vpop.f32.mrf.mxu0  ;;  %v450_v28 = vpop.f32.mrf.mxu1 }
 0x108   :  { %v411_v29 = vadd.f32 %v1037_v38, %v410_v27  ;;  %v451_v30 = vadd.f32 %v1037_v38, %v450_v28 }
 0x109   :  { %v579_v31 = vmax.f32 %v489_v25, 0.0  ;;  %v595_v32 = vmax.f32 %v529_v26, 0.0 }
 0x10a   :  { %v548_v33 = vmax.f32 %v411_v29, 0.0  ;;  %v564_v34 = vmax.f32 %v451_v30, 0.0 }
 0x10b   :  { %643 = vst [vmem:[%s1298_s3 + $0x170] sm:$0xff] %v579_v31 }
 0x10c   :  { %659 = vst [vmem:[%s1298_s3 + $0x1f0] sm:$0xff] %v595_v32 }
 0x10d   :  { %612 = vst [vmem:[%s1298_s3 + $0x78] sm:$0xff] %v548_v33 }
 0x10e   :  { %628 = vst [vmem:[%s1298_s3 + $0xf8] sm:$0xff] %v564_v34  ;;  %v490_v35 = vpop.f32.mrf.mxu2  ;;  %v530_v36 = vpop.f32.mrf.mxu3 }
 0x10f   :  { %v491_v37 = vadd.f32 %v1037_v38, %v490_v35  ;;  %v531_v39 = vadd.f32 %v1037_v38, %v530_v36 }
 0x111   :  { %v580_v40 = vmax.f32 %v491_v37, 0.0  ;;  %v596_v41 = vmax.f32 %v531_v39, 0.0 }
 0x113   :  { %644 = vst [vmem:[%s1298_s3 + $0x178] sm:$0xff] %v580_v40 }
 0x114   :  { %660 = vst [vmem:[%s1298_s3 + $0x1f8] sm:$0xff] %v596_v41 }

// kernel: xfeat_forward.24
= control target key start
LH: loop header
LB: loop body
LE: loop exit
PB: predicated region body
PF: predicated region fallthrough
CT: control target
= control target key end

     0   :  { %vm376_vm0 = vcmask 1043456   ;;  %vm279_vm1 = vcmask 588800   ;;  %s1333_s1 = inlined_call_operand.vmem [shape: bf16[72,128], index: 1, kind: input, shape index: {}]   ;;  %s1334_s2 = inlined_call_operand.vmem [shape: f32[1,128], index: 2, kind: input, shape index: {}]   ;;  %s1335_s0 = inlined_call_operand.vmem [shape: bf16[512,72], index: 0, kind: input, shape index: {}]   ;;  %s1336_s3 = inlined_call_operand.vmem [shape: f32[512,128], index: 3, kind: output, shape index: {}]  }
   0x1   :  { %v87_v0 = vld [vmem:[%s1333_s1 + $0x20] sm:$0xf]  ;;  %v892_v4 = vld [vmem:[%s1333_s1 + $0x18] sm:$0xff]  ;;  %v891_v5 = vld [vmem:[%s1333_s1 + $0x10] sm:$0xff] }
   0x2   :  { %v269_v1 = vunpack.c.l.b16 %v87_v0  ;;  %v890_v6 = vld [vmem:[%s1333_s1 + $0x8] sm:$0xff]  ;;  %v889_v7 = vld [vmem:[%s1333_s1] sm:$0xff]  ;;  %v859_v16 = vld [vmem:[%s1335_s0 + $0x10] sm:$0xff] }
   0x3   :  { %v857_v8 = vld [vmem:[%s1335_s0] sm:$0xff]  ;;  %v858_v12 = vld [vmem:[%s1335_s0 + $0x8] sm:$0xff]  ;;  %v867_v17 = vld [vmem:[%s1335_s0 + $0x50] sm:$0xff] }
   0x4   :  { %v274_v2 = vpack.c.b16 %v269_v1, %v269_v1  ;;  %v865_v9 = vld [vmem:[%s1335_s0 + $0x40] sm:$0xff]  ;;  %v866_v13 = vld [vmem:[%s1335_s0 + $0x48] sm:$0xff]  ;;  %v875_v18 = vld [vmem:[%s1335_s0 + $0x90] sm:$0xff] }
   0x5   :  { %v873_v10 = vld [vmem:[%s1335_s0 + $0x80] sm:$0xff]  ;;  %v874_v14 = vld [vmem:[%s1335_s0 + $0x88] sm:$0xff]  ;;  %v883_v19 = vld [vmem:[%s1335_s0 + $0xd0] sm:$0xff] }
   0x6   :  { %v378_v3 = vsel %vm376_vm0, %v274_v2, 0  ;;  %v881_v11 = vld [vmem:[%s1335_s0 + $0xc0] sm:$0xff]  ;;  %v882_v15 = vld [vmem:[%s1335_s0 + $0xc8] sm:$0xff]  ;;  %v860_v20 = vld [vmem:[%s1335_s0 + $0x18] sm:$0xff] }
   0x7   :  { %383 = vmatpush.bf16.msra.mxu0 %v378_v3  ;;  %893 = vmatpush.bf16.msra.mxu1 %v378_v3  ;;  %v868_v21 = vld [vmem:[%s1335_s0 + $0x58] sm:$0xff]  ;;  %v861_v24 = vld [vmem:[%s1335_s0 + $0x20] sm:$0xff]  ;;  %v862_v28 = vld [vmem:[%s1335_s0 + $0x28] sm:$0xff] }
   0x8   :  { %894 = vmatpush.bf16.msra.mxu2 %v378_v3  ;;  %895 = vmatpush.bf16.msra.mxu3 %v378_v3  ;;  %v876_v22 = vld [vmem:[%s1335_s0 + $0x98] sm:$0xff]  ;;  %v869_v25 = vld [vmem:[%s1335_s0 + $0x60] sm:$0xff]  ;;  %v870_v29 = vld [vmem:[%s1335_s0 + $0x68] sm:$0xff] }
   0x9   :  { %v884_v23 = vld [vmem:[%s1335_s0 + $0xd8] sm:$0xff]  ;;  %v877_v26 = vld [vmem:[%s1335_s0 + $0xa0] sm:$0xff]  ;;  %v878_v30 = vld [vmem:[%s1335_s0 + $0xa8] sm:$0xff] }
   0xa   :  { %v885_v27 = vld [vmem:[%s1335_s0 + $0xe0] sm:$0xff]  ;;  %v886_v31 = vld [vmem:[%s1335_s0 + $0xe8] sm:$0xff]  ;;  %v863_v32 = vld [vmem:[%s1335_s0 + $0x30] sm:$0xff] }
   0xb   :  { %384 = vmatpush.bf16.msra.mxu0 %v892_v4  ;;  %896 = vmatpush.bf16.msra.mxu1 %v892_v4  ;;  %v871_v33 = vld [vmem:[%s1335_s0 + $0x70] sm:$0xff]  ;;  %v864_v36 = vld [vmem:[%s1335_s0 + $0x38] sm:$0xff]  ;;  %v1075_v40 = vld [vmem:[%s1334_s2] ss:$0 sm:$0xff] }
   0xc   :  { %897 = vmatpush.bf16.msra.mxu2 %v892_v4  ;;  %898 = vmatpush.bf16.msra.mxu3 %v892_v4  ;;  %v879_v34 = vld [vmem:[%s1335_s0 + $0xb0] sm:$0xff]  ;;  %v872_v37 = vld [vmem:[%s1335_s0 + $0x78] sm:$0xff] }
   0xd   :  { %v887_v35 = vld [vmem:[%s1335_s0 + $0xf0] sm:$0xff]  ;;  %v880_v38 = vld [vmem:[%s1335_s0 + $0xb8] sm:$0xff] }
   0xe   :  { %v888_v39 = vld [vmem:[%s1335_s0 + $0xf8] sm:$0xff] }
   0xf   :  { %385 = vmatpush.bf16.msra.mxu0 %v891_v5  ;;  %899 = vmatpush.bf16.msra.mxu1 %v891_v5 }
  0x10   :  { %900 = vmatpush.bf16.msra.mxu2 %v891_v5  ;;  %901 = vmatpush.bf16.msra.mxu3 %v891_v5 }
  0x13   :  { %386 = vmatpush.bf16.msra.mxu0 %v890_v6  ;;  %902 = vmatpush.bf16.msra.mxu1 %v890_v6 }
  0x14   :  { %903 = vmatpush.bf16.msra.mxu2 %v890_v6  ;;  %904 = vmatpush.bf16.msra.mxu3 %v890_v6 }
  0x17   :  { %387 = vmatpush.bf16.msra.mxu0 %v889_v7  ;;  %905 = vmatpush.bf16.msra.mxu1 %v889_v7 }
  0x18   :  { %906 = vmatpush.bf16.msra.mxu2 %v889_v7  ;;  %907 = vmatpush.bf16.msra.mxu3 %v889_v7 }
  0x1a   :  { %825 = vmatmul.msk.bf16.vlgmr.msra.gmra.mxu0 %vm279_vm1, %v857_v8  ;;  %833 = vmatmul.msk.bf16.vlgmr.msra.gmra.mxu1 %vm279_vm1, %v865_v9 }
  0x1b   :  { %841 = vmatmul.msk.bf16.vlgmr.msra.gmra.mxu2 %vm279_vm1, %v873_v10  ;;  %849 = vmatmul.msk.bf16.vlgmr.msra.gmra.mxu3 %vm279_vm1, %v881_v11 }
  0x2a   :  { %826 = vmatmul.msk.bf16.gmra.mxu0 %vm279_vm1, %v858_v12  ;;  %834 = vmatmul.msk.bf16.gmra.mxu1 %vm279_vm1, %v866_v13 }
  0x2b   :  { %842 = vmatmul.msk.bf16.gmra.mxu2 %vm279_vm1, %v874_v14  ;;  %850 = vmatmul.msk.bf16.gmra.mxu3 %vm279_vm1, %v882_v15 }
  0x3a   :  { %827 = vmatmul.msk.bf16.gmra.mxu0 %vm279_vm1, %v859_v16  ;;  %835 = vmatmul.msk.bf16.gmra.mxu1 %vm279_vm1, %v867_v17 }
  0x3b   :  { %843 = vmatmul.msk.bf16.gmra.mxu2 %vm279_vm1, %v875_v18  ;;  %851 = vmatmul.msk.bf16.gmra.mxu3 %vm279_vm1, %v883_v19 }
  0x4a   :  { %828 = vmatmul.msk.bf16.gmra.mxu0 %vm279_vm1, %v860_v20  ;;  %836 = vmatmul.msk.bf16.gmra.mxu1 %vm279_vm1, %v868_v21 }
  0x4b   :  { %844 = vmatmul.msk.bf16.gmra.mxu2 %vm279_vm1, %v876_v22  ;;  %852 = vmatmul.msk.bf16.gmra.mxu3 %vm279_vm1, %v884_v23 }
  0x5a   :  { %829 = vmatmul.msk.bf16.gmra.mxu0 %vm279_vm1, %v861_v24  ;;  %837 = vmatmul.msk.bf16.gmra.mxu1 %vm279_vm1, %v869_v25 }
  0x5b   :  { %845 = vmatmul.msk.bf16.gmra.mxu2 %vm279_vm1, %v877_v26  ;;  %853 = vmatmul.msk.bf16.gmra.mxu3 %vm279_vm1, %v885_v27 }
  0x6a   :  { %830 = vmatmul.msk.bf16.gmra.mxu0 %vm279_vm1, %v862_v28  ;;  %838 = vmatmul.msk.bf16.gmra.mxu1 %vm279_vm1, %v870_v29 }
  0x6b   :  { %846 = vmatmul.msk.bf16.gmra.mxu2 %vm279_vm1, %v878_v30  ;;  %854 = vmatmul.msk.bf16.gmra.mxu3 %vm279_vm1, %v886_v31 }
  0x7a   :  { %831 = vmatmul.msk.bf16.gmra.mxu0 %vm279_vm1, %v863_v32  ;;  %839 = vmatmul.msk.bf16.gmra.mxu1 %vm279_vm1, %v871_v33 }
  0x7b   :  { %847 = vmatmul.msk.bf16.gmra.mxu2 %vm279_vm1, %v879_v34  ;;  %855 = vmatmul.msk.bf16.gmra.mxu3 %vm279_vm1, %v887_v35 }
  0x8a   :  { %832 = vmatmul.msk.bf16.gmra.mxu0 %vm279_vm1, %v864_v36  ;;  %840 = vmatmul.msk.bf16.gmra.mxu1 %vm279_vm1, %v872_v37 }
  0x8b   :  { %848 = vmatmul.msk.bf16.gmra.mxu2 %vm279_vm1, %v880_v38  ;;  %856 = vmatmul.msk.bf16.gmra.mxu3 %vm279_vm1, %v888_v39 }
  0x97   :  { %v389_v41 = vpop.f32.mrf.mxu0  ;;  %v429_v42 = vpop.f32.mrf.mxu1 }
  0x98   :  { %v390_v43 = vadd.f32 %v1075_v40, %v389_v41  ;;  %v430_v44 = vadd.f32 %v1075_v40, %v429_v42 }
  0x9a   :  { %v549_v45 = vmax.f32 %v390_v43, 0.0  ;;  %v565_v46 = vmax.f32 %v430_v44, 0.0 }
  0x9c   :  { %613 = vst [vmem:[%s1336_s3] sm:$0xff] %v549_v45 }
  0x9d   :  { %629 = vst [vmem:[%s1336_s3 + $0x80] sm:$0xff] %v565_v46 }
  0x9e   :  { %v469_v47 = vpop.f32.mrf.mxu2  ;;  %v509_v48 = vpop.f32.mrf.mxu3 }
  0x9f   :  { %v470_v49 = vadd.f32 %v1075_v40, %v469_v47  ;;  %v510_v50 = vadd.f32 %v1075_v40, %v509_v48  ;;  %v391_v51 = vpop.f32.mrf.mxu0  ;;  %v431_v52 = vpop.f32.mrf.mxu1 }
  0xa0   :  { %v392_v53 = vadd.f32 %v1075_v40, %v391_v51  ;;  %v432_v54 = vadd.f32 %v1075_v40, %v431_v52 }
  0xa1   :  { %v581_v55 = vmax.f32 %v470_v49, 0.0  ;;  %v597_v56 = vmax.f32 %v510_v50, 0.0 }
  0xa2   :  { %v550_v57 = vmax.f32 %v392_v53, 0.0  ;;  %v566_v58 = vmax.f32 %v432_v54, 0.0 }
  0xa3   :  { %645 = vst [vmem:[%s1336_s3 + $0x100] sm:$0xff] %v581_v55 }
  0xa4   :  { %661 = vst [vmem:[%s1336_s3 + $0x180] sm:$0xff] %v597_v56 }
  0xa5   :  { %614 = vst [vmem:[%s1336_s3 + $0x8] sm:$0xff] %v550_v57 }
  0xa6   :  { %630 = vst [vmem:[%s1336_s3 + $0x88] sm:$0xff] %v566_v58  ;;  %v471_v59 = vpop.f32.mrf.mxu2  ;;  %v511_v60 = vpop.f32.mrf.mxu3 }
  0xa7   :  { %v472_v61 = vadd.f32 %v1075_v40, %v471_v59  ;;  %v512_v62 = vadd.f32 %v1075_v40, %v511_v60  ;;  %v394_v63 = vpop.f32.mrf.mxu0  ;;  %v434_v0 = vpop.f32.mrf.mxu1 }
  0xa8   :  { %v395_v1 = vadd.f32 %v1075_v40, %v394_v63  ;;  %v435_v2 = vadd.f32 %v1075_v40, %v434_v0 }
  0xa9   :  { %v582_v3 = vmax.f32 %v472_v61, 0.0  ;;  %v598_v4 = vmax.f32 %v512_v62, 0.0 }
  0xaa   :  { %v551_v5 = vmax.f32 %v395_v1, 0.0  ;;  %v567_v6 = vmax.f32 %v435_v2, 0.0 }
  0xab   :  { %646 = vst [vmem:[%s1336_s3 + $0x108] sm:$0xff] %v582_v3 }
  0xac   :  { %662 = vst [vmem:[%s1336_s3 + $0x188] sm:$0xff] %v598_v4 }
  0xad   :  { %615 = vst [vmem:[%s1336_s3 + $0x10] sm:$0xff] %v551_v5 }
  0xae   :  { %631 = vst [vmem:[%s1336_s3 + $0x90] sm:$0xff] %v567_v6  ;;  %v474_v7 = vpop.f32.mrf.mxu2  ;;  %v514_v8 = vpop.f32.mrf.mxu3 }
  0xaf   :  { %v475_v9 = vadd.f32 %v1075_v40, %v474_v7  ;;  %v515_v10 = vadd.f32 %v1075_v40, %v514_v8  ;;  %v396_v11 = vpop.f32.mrf.mxu0  ;;  %v436_v12 = vpop.f32.mrf.mxu1 }
  0xb0   :  { %v397_v13 = vadd.f32 %v1075_v40, %v396_v11  ;;  %v437_v14 = vadd.f32 %v1075_v40, %v436_v12 }
  0xb1   :  { %v583_v15 = vmax.f32 %v475_v9, 0.0  ;;  %v599_v16 = vmax.f32 %v515_v10, 0.0 }
  0xb2   :  { %v552_v17 = vmax.f32 %v397_v13, 0.0  ;;  %v568_v18 = vmax.f32 %v437_v14, 0.0 }
  0xb3   :  { %647 = vst [vmem:[%s1336_s3 + $0x110] sm:$0xff] %v583_v15 }
  0xb4   :  { %663 = vst [vmem:[%s1336_s3 + $0x190] sm:$0xff] %v599_v16 }
  0xb5   :  { %616 = vst [vmem:[%s1336_s3 + $0x18] sm:$0xff] %v552_v17 }
  0xb6   :  { %632 = vst [vmem:[%s1336_s3 + $0x98] sm:$0xff] %v568_v18  ;;  %v476_v19 = vpop.f32.mrf.mxu2  ;;  %v516_v20 = vpop.f32.mrf.mxu3 }
  0xb7   :  { %v477_v21 = vadd.f32 %v1075_v40, %v476_v19  ;;  %v517_v22 = vadd.f32 %v1075_v40, %v516_v20  ;;  %v399_v23 = vpop.f32.mrf.mxu0  ;;  %v439_v24 = vpop.f32.mrf.mxu1 }
  0xb8   :  { %v400_v25 = vadd.f32 %v1075_v40, %v399_v23  ;;  %v440_v26 = vadd.f32 %v1075_v40, %v439_v24 }
  0xb9   :  { %v584_v27 = vmax.f32 %v477_v21, 0.0  ;;  %v600_v28 = vmax.f32 %v517_v22, 0.0 }
  0xba   :  { %v553_v29 = vmax.f32 %v400_v25, 0.0  ;;  %v569_v30 = vmax.f32 %v440_v26, 0.0 }
  0xbb   :  { %648 = vst [vmem:[%s1336_s3 + $0x118] sm:$0xff] %v584_v27 }
  0xbc   :  { %664 = vst [vmem:[%s1336_s3 + $0x198] sm:$0xff] %v600_v28 }
  0xbd   :  { %617 = vst [vmem:[%s1336_s3 + $0x20] sm:$0xff] %v553_v29 }
  0xbe   :  { %633 = vst [vmem:[%s1336_s3 + $0xa0] sm:$0xff] %v569_v30  ;;  %v479_v31 = vpop.f32.mrf.mxu2  ;;  %v519_v32 = vpop.f32.mrf.mxu3 }
  0xbf   :  { %v480_v33 = vadd.f32 %v1075_v40, %v479_v31  ;;  %v520_v34 = vadd.f32 %v1075_v40, %v519_v32  ;;  %v401_v35 = vpop.f32.mrf.mxu0  ;;  %v441_v36 = vpop.f32.mrf.mxu1 }
  0xc0   :  { %v402_v37 = vadd.f32 %v1075_v40, %v401_v35  ;;  %v442_v38 = vadd.f32 %v1075_v40, %v441_v36 }
  0xc1   :  { %v585_v39 = vmax.f32 %v480_v33, 0.0  ;;  %v601_v41 = vmax.f32 %v520_v34, 0.0 }
  0xc2   :  { %v554_v42 = vmax.f32 %v402_v37, 0.0  ;;  %v570_v43 = vmax.f32 %v442_v38, 0.0 }
  0xc3   :  { %649 = vst [vmem:[%s1336_s3 + $0x120] sm:$0xff] %v585_v39 }
  0xc4   :  { %665 = vst [vmem:[%s1336_s3 + $0x1a0] sm:$0xff] %v601_v41 }
  0xc5   :  { %618 = vst [vmem:[%s1336_s3 + $0x28] sm:$0xff] %v554_v42 }
  0xc6   :  { %634 = vst [vmem:[%s1336_s3 + $0xa8] sm:$0xff] %v570_v43  ;;  %v481_v44 = vpop.f32.mrf.mxu2  ;;  %v521_v45 = vpop.f32.mrf.mxu3 }
  0xc7   :  { %v482_v46 = vadd.f32 %v1075_v40, %v481_v44  ;;  %v522_v47 = vadd.f32 %v1075_v40, %v521_v45  ;;  %v404_v48 = vpop.f32.mrf.mxu0  ;;  %v444_v49 = vpop.f32.mrf.mxu1 }
  0xc8   :  { %v405_v50 = vadd.f32 %v1075_v40, %v404_v48  ;;  %v445_v51 = vadd.f32 %v1075_v40, %v444_v49 }
  0xc9   :  { %v586_v52 = vmax.f32 %v482_v46, 0.0  ;;  %v602_v53 = vmax.f32 %v522_v47, 0.0 }
  0xca   :  { %v555_v54 = vmax.f32 %v405_v50, 0.0  ;;  %v571_v55 = vmax.f32 %v445_v51, 0.0 }
  0xcb   :  { %650 = vst [vmem:[%s1336_s3 + $0x128] sm:$0xff] %v586_v52 }
  0xcc   :  { %666 = vst [vmem:[%s1336_s3 + $0x1a8] sm:$0xff] %v602_v53 }
  0xcd   :  { %619 = vst [vmem:[%s1336_s3 + $0x30] sm:$0xff] %v555_v54 }
  0xce   :  { %635 = vst [vmem:[%s1336_s3 + $0xb0] sm:$0xff] %v571_v55  ;;  %v484_v56 = vpop.f32.mrf.mxu2  ;;  %v524_v57 = vpop.f32.mrf.mxu3 }
  0xcf   :  { %v485_v58 = vadd.f32 %v1075_v40, %v484_v56  ;;  %v525_v59 = vadd.f32 %v1075_v40, %v524_v57  ;;  %v406_v60 = vpop.f32.mrf.mxu0  ;;  %v446_v61 = vpop.f32.mrf.mxu1 }
  0xd0   :  { %v407_v62 = vadd.f32 %v1075_v40, %v406_v60  ;;  %v447_v63 = vadd.f32 %v1075_v40, %v446_v61 }
  0xd1   :  { %v587_v0 = vmax.f32 %v485_v58, 0.0  ;;  %v603_v1 = vmax.f32 %v525_v59, 0.0 }
  0xd2   :  { %v556_v2 = vmax.f32 %v407_v62, 0.0  ;;  %v572_v3 = vmax.f32 %v447_v63, 0.0 }
  0xd3   :  { %651 = vst [vmem:[%s1336_s3 + $0x130] sm:$0xff] %v587_v0 }
  0xd4   :  { %667 = vst [vmem:[%s1336_s3 + $0x1b0] sm:$0xff] %v603_v1 }
  0xd5   :  { %620 = vst [vmem:[%s1336_s3 + $0x38] sm:$0xff] %v556_v2 }
  0xd6   :  { %636 = vst [vmem:[%s1336_s3 + $0xb8] sm:$0xff] %v572_v3  ;;  %v486_v4 = vpop.f32.mrf.mxu2  ;;  %v526_v5 = vpop.f32.mrf.mxu3 }
  0xd7   :  { %v487_v6 = vadd.f32 %v1075_v40, %v486_v4  ;;  %v527_v7 = vadd.f32 %v1075_v40, %v526_v5  ;;  %v409_v8 = vpop.f32.mrf.mxu0  ;;  %v449_v9 = vpop.f32.mrf.mxu1 }
  0xd8   :  { %v410_v10 = vadd.f32 %v1075_v40, %v409_v8  ;;  %v450_v11 = vadd.f32 %v1075_v40, %v449_v9 }
  0xd9   :  { %v588_v12 = vmax.f32 %v487_v6, 0.0  ;;  %v604_v13 = vmax.f32 %v527_v7, 0.0 }
  0xda   :  { %v557_v14 = vmax.f32 %v410_v10, 0.0  ;;  %v573_v15 = vmax.f32 %v450_v11, 0.0 }
  0xdb   :  { %652 = vst [vmem:[%s1336_s3 + $0x138] sm:$0xff] %v588_v12 }
  0xdc   :  { %668 = vst [vmem:[%s1336_s3 + $0x1b8] sm:$0xff] %v604_v13 }
  0xdd   :  { %621 = vst [vmem:[%s1336_s3 + $0x40] sm:$0xff] %v557_v14 }
  0xde   :  { %637 = vst [vmem:[%s1336_s3 + $0xc0] sm:$0xff] %v573_v15  ;;  %v489_v16 = vpop.f32.mrf.mxu2  ;;  %v529_v17 = vpop.f32.mrf.mxu3 }
  0xdf   :  { %v490_v18 = vadd.f32 %v1075_v40, %v489_v16  ;;  %v530_v19 = vadd.f32 %v1075_v40, %v529_v17  ;;  %v411_v20 = vpop.f32.mrf.mxu0  ;;  %v451_v21 = vpop.f32.mrf.mxu1 }
  0xe0   :  { %v412_v22 = vadd.f32 %v1075_v40, %v411_v20  ;;  %v452_v23 = vadd.f32 %v1075_v40, %v451_v21 }
  0xe1   :  { %v589_v24 = vmax.f32 %v490_v18, 0.0  ;;  %v605_v25 = vmax.f32 %v530_v19, 0.0 }
  0xe2   :  { %v558_v26 = vmax.f32 %v412_v22, 0.0  ;;  %v574_v27 = vmax.f32 %v452_v23, 0.0 }
  0xe3   :  { %653 = vst [vmem:[%s1336_s3 + $0x140] sm:$0xff] %v589_v24 }
  0xe4   :  { %669 = vst [vmem:[%s1336_s3 + $0x1c0] sm:$0xff] %v605_v25 }
  0xe5   :  { %622 = vst [vmem:[%s1336_s3 + $0x48] sm:$0xff] %v558_v26 }
  0xe6   :  { %638 = vst [vmem:[%s1336_s3 + $0xc8] sm:$0xff] %v574_v27  ;;  %v491_v28 = vpop.f32.mrf.mxu2  ;;  %v531_v29 = vpop.f32.mrf.mxu3 }
  0xe7   :  { %v492_v30 = vadd.f32 %v1075_v40, %v491_v28  ;;  %v532_v31 = vadd.f32 %v1075_v40, %v531_v29  ;;  %v414_v32 = vpop.f32.mrf.mxu0  ;;  %v454_v33 = vpop.f32.mrf.mxu1 }
  0xe8   :  { %v415_v34 = vadd.f32 %v1075_v40, %v414_v32  ;;  %v455_v35 = vadd.f32 %v1075_v40, %v454_v33 }
  0xe9   :  { %v590_v36 = vmax.f32 %v492_v30, 0.0  ;;  %v606_v37 = vmax.f32 %v532_v31, 0.0 }
  0xea   :  { %v559_v38 = vmax.f32 %v415_v34, 0.0  ;;  %v575_v39 = vmax.f32 %v455_v35, 0.0 }
  0xeb   :  { %654 = vst [vmem:[%s1336_s3 + $0x148] sm:$0xff] %v590_v36 }
  0xec   :  { %670 = vst [vmem:[%s1336_s3 + $0x1c8] sm:$0xff] %v606_v37 }
  0xed   :  { %623 = vst [vmem:[%s1336_s3 + $0x50] sm:$0xff] %v559_v38 }
  0xee   :  { %639 = vst [vmem:[%s1336_s3 + $0xd0] sm:$0xff] %v575_v39  ;;  %v494_v41 = vpop.f32.mrf.mxu2  ;;  %v534_v42 = vpop.f32.mrf.mxu3 }
  0xef   :  { %v495_v43 = vadd.f32 %v1075_v40, %v494_v41  ;;  %v535_v44 = vadd.f32 %v1075_v40, %v534_v42  ;;  %v416_v45 = vpop.f32.mrf.mxu0  ;;  %v456_v46 = vpop.f32.mrf.mxu1 }
  0xf0   :  { %v417_v47 = vadd.f32 %v1075_v40, %v416_v45  ;;  %v457_v48 = vadd.f32 %v1075_v40, %v456_v46 }
  0xf1   :  { %v591_v49 = vmax.f32 %v495_v43, 0.0  ;;  %v607_v50 = vmax.f32 %v535_v44, 0.0 }
  0xf2   :  { %v560_v51 = vmax.f32 %v417_v47, 0.0  ;;  %v576_v52 = vmax.f32 %v457_v48, 0.0 }
  0xf3   :  { %655 = vst [vmem:[%s1336_s3 + $0x150] sm:$0xff] %v591_v49 }
  0xf4   :  { %671 = vst [vmem:[%s1336_s3 + $0x1d0] sm:$0xff] %v607_v50 }
  0xf5   :  { %624 = vst [vmem:[%s1336_s3 + $0x58] sm:$0xff] %v560_v51 }
  0xf6   :  { %640 = vst [vmem:[%s1336_s3 + $0xd8] sm:$0xff] %v576_v52  ;;  %v496_v53 = vpop.f32.mrf.mxu2  ;;  %v536_v54 = vpop.f32.mrf.mxu3 }
  0xf7   :  { %v497_v55 = vadd.f32 %v1075_v40, %v496_v53  ;;  %v537_v56 = vadd.f32 %v1075_v40, %v536_v54  ;;  %v419_v57 = vpop.f32.mrf.mxu0  ;;  %v459_v58 = vpop.f32.mrf.mxu1 }
  0xf8   :  { %v420_v59 = vadd.f32 %v1075_v40, %v419_v57  ;;  %v460_v60 = vadd.f32 %v1075_v40, %v459_v58 }
  0xf9   :  { %v592_v61 = vmax.f32 %v497_v55, 0.0  ;;  %v608_v62 = vmax.f32 %v537_v56, 0.0 }
  0xfa   :  { %v561_v63 = vmax.f32 %v420_v59, 0.0  ;;  %v577_v0 = vmax.f32 %v460_v60, 0.0 }
  0xfb   :  { %656 = vst [vmem:[%s1336_s3 + $0x158] sm:$0xff] %v592_v61 }
  0xfc   :  { %672 = vst [vmem:[%s1336_s3 + $0x1d8] sm:$0xff] %v608_v62 }
  0xfd   :  { %625 = vst [vmem:[%s1336_s3 + $0x60] sm:$0xff] %v561_v63 }
  0xfe   :  { %641 = vst [vmem:[%s1336_s3 + $0xe0] sm:$0xff] %v577_v0  ;;  %v499_v1 = vpop.f32.mrf.mxu2  ;;  %v539_v2 = vpop.f32.mrf.mxu3 }
  0xff   :  { %v500_v3 = vadd.f32 %v1075_v40, %v499_v1  ;;  %v540_v4 = vadd.f32 %v1075_v40, %v539_v2  ;;  %v421_v5 = vpop.f32.mrf.mxu0  ;;  %v461_v6 = vpop.f32.mrf.mxu1 }
 0x100   :  { %v422_v7 = vadd.f32 %v1075_v40, %v421_v5  ;;  %v462_v8 = vadd.f32 %v1075_v40, %v461_v6 }
 0x101   :  { %v593_v9 = vmax.f32 %v500_v3, 0.0  ;;  %v609_v10 = vmax.f32 %v540_v4, 0.0 }
 0x102   :  { %v562_v11 = vmax.f32 %v422_v7, 0.0  ;;  %v578_v12 = vmax.f32 %v462_v8, 0.0 }
 0x103   :  { %657 = vst [vmem:[%s1336_s3 + $0x160] sm:$0xff] %v593_v9 }
 0x104   :  { %673 = vst [vmem:[%s1336_s3 + $0x1e0] sm:$0xff] %v609_v10 }
 0x105   :  { %626 = vst [vmem:[%s1336_s3 + $0x68] sm:$0xff] %v562_v11 }
 0x106   :  { %642 = vst [vmem:[%s1336_s3 + $0xe8] sm:$0xff] %v578_v12  ;;  %v501_v13 = vpop.f32.mrf.mxu2  ;;  %v541_v14 = vpop.f32.mrf.mxu3 }
 0x107   :  { %v502_v15 = vadd.f32 %v1075_v40, %v501_v13  ;;  %v542_v16 = vadd.f32 %v1075_v40, %v541_v14  ;;  %v424_v17 = vpop.f32.mrf.mxu0  ;;  %v464_v18 = vpop.f32.mrf.mxu1 }
 0x108   :  { %v425_v19 = vadd.f32 %v1075_v40, %v424_v17  ;;  %v465_v20 = vadd.f32 %v1075_v40, %v464_v18 }
 0x109   :  { %v594_v21 = vmax.f32 %v502_v15, 0.0  ;;  %v610_v22 = vmax.f32 %v542_v16, 0.0 }
 0x10a   :  { %v563_v23 = vmax.f32 %v425_v19, 0.0  ;;  %v579_v24 = vmax.f32 %v465_v20, 0.0 }
 0x10b   :  { %658 = vst [vmem:[%s1336_s3 + $0x168] sm:$0xff] %v594_v21 }
 0x10c   :  { %674 = vst [vmem:[%s1336_s3 + $0x1e8] sm:$0xff] %v610_v22 }
 0x10d   :  { %627 = vst [vmem:[%s1336_s3 + $0x70] sm:$0xff] %v563_v23 }
 0x10e   :  { %643 = vst [vmem:[%s1336_s3 + $0xf0] sm:$0xff] %v579_v24  ;;  %v504_v25 = vpop.f32.mrf.mxu2  ;;  %v544_v26 = vpop.f32.mrf.mxu3 }
 0x10f   :  { %v505_v27 = vadd.f32 %v1075_v40, %v504_v25  ;;  %v545_v28 = vadd.f32 %v1075_v40, %v544_v26  ;;  %v426_v29 = vpop.f32.mrf.mxu0  ;;  %v466_v30 = vpop.f32.mrf.mxu1 }
 0x110   :  { %v427_v31 = vadd.f32 %v1075_v40, %v426_v29  ;;  %v467_v32 = vadd.f32 %v1075_v40, %v466_v30 }
 0x111   :  { %v595_v33 = vmax.f32 %v505_v27, 0.0  ;;  %v611_v34 = vmax.f32 %v545_v28, 0.0 }
 0x112   :  { %v564_v35 = vmax.f32 %v427_v31, 0.0  ;;  %v580_v36 = vmax.f32 %v467_v32, 0.0 }
 0x113   :  { %659 = vst [vmem:[%s1336_s3 + $0x170] sm:$0xff] %v595_v33 }
 0x114   :  { %675 = vst [vmem:[%s1336_s3 + $0x1f0] sm:$0xff] %v611_v34 }
 0x115   :  { %628 = vst [vmem:[%s1336_s3 + $0x78] sm:$0xff] %v564_v35 }
 0x116   :  { %644 = vst [vmem:[%s1336_s3 + $0xf8] sm:$0xff] %v580_v36  ;;  %v506_v37 = vpop.f32.mrf.mxu2  ;;  %v546_v38 = vpop.f32.mrf.mxu3 }
 0x117   :  { %v507_v39 = vadd.f32 %v1075_v40, %v506_v37  ;;  %v547_v41 = vadd.f32 %v1075_v40, %v546_v38 }
 0x119   :  { %v596_v42 = vmax.f32 %v507_v39, 0.0  ;;  %v612_v43 = vmax.f32 %v547_v41, 0.0 }
 0x11b   :  { %660 = vst [vmem:[%s1336_s3 + $0x178] sm:$0xff] %v596_v42 }
 0x11c   :  { %676 = vst [vmem:[%s1336_s3 + $0x1f8] sm:$0xff] %v612_v43 }

// kernel: xfeat_forward.25
= control target key start
LH: loop header
LB: loop body
LE: loop exit
PB: predicated region body
PF: predicated region fallthrough
CT: control target
= control target key end

     0   :  { %vm136_vm0 = vcmask 1043456   ;;  %vm111_vm1 = vcmask 588800   ;;  %s427_s1 = inlined_call_operand.vmem [shape: bf16[72,128], index: 1, kind: input, shape index: {}]   ;;  %s428_s2 = inlined_call_operand.vmem [shape: f32[1,128], index: 2, kind: input, shape index: {}]   ;;  %s429_s0 = inlined_call_operand.vmem [shape: bf16[128,72], index: 0, kind: input, shape index: {}]   ;;  %s430_s3 = inlined_call_operand.vmem [shape: f32[128,128], index: 3, kind: output, shape index: {}]  }
   0x1   :  { %v39_v0 = vld [vmem:[%s427_s1 + $0x20] sm:$0xf]  ;;  %v292_v4 = vld [vmem:[%s427_s1 + $0x18] sm:$0xff]  ;;  %v291_v5 = vld [vmem:[%s427_s1 + $0x10] sm:$0xff] }
   0x2   :  { %v101_v1 = vunpack.c.l.b16 %v39_v0  ;;  %v290_v6 = vld [vmem:[%s427_s1 + $0x8] sm:$0xff]  ;;  %v289_v7 = vld [vmem:[%s427_s1] sm:$0xff]  ;;  %v283_v9 = vld [vmem:[%s429_s0 + $0x10] sm:$0xff] }
   0x3   :  { %v281_v8 = vld [vmem:[%s429_s0] sm:$0xff]  ;;  %v287_v11 = vld [vmem:[%s429_s0 + $0x30] sm:$0xff]  ;;  %v282_v12 = vld [vmem:[%s429_s0 + $0x8] sm:$0xff] }
   0x4   :  { %v106_v2 = vpack.c.b16 %v101_v1, %v101_v1  ;;  %v285_v10 = vld [vmem:[%s429_s0 + $0x20] sm:$0xff]  ;;  %v284_v13 = vld [vmem:[%s429_s0 + $0x18] sm:$0xff]  ;;  %v286_v14 = vld [vmem:[%s429_s0 + $0x28] sm:$0xff] }
   0x5   :  { %v288_v15 = vld [vmem:[%s429_s0 + $0x38] sm:$0xff]  ;;  %v308_v16 = vld [vmem:[%s428_s2] ss:$0 sm:$0xff] }
   0x6   :  { %v138_v3 = vsel %vm136_vm0, %v106_v2, 0 }
   0x7   :  { %143 = vmatpush.bf16.msra.mxu0 %v138_v3  ;;  %293 = vmatpush.bf16.msra.mxu1 %v138_v3 }
   0x8   :  { %294 = vmatpush.bf16.msra.mxu2 %v138_v3  ;;  %295 = vmatpush.bf16.msra.mxu3 %v138_v3 }
   0xb   :  { %144 = vmatpush.bf16.msra.mxu0 %v292_v4  ;;  %296 = vmatpush.bf16.msra.mxu1 %v292_v4 }
   0xc   :  { %297 = vmatpush.bf16.msra.mxu2 %v292_v4  ;;  %298 = vmatpush.bf16.msra.mxu3 %v292_v4 }
   0xf   :  { %145 = vmatpush.bf16.msra.mxu0 %v291_v5  ;;  %299 = vmatpush.bf16.msra.mxu1 %v291_v5 }
  0x10   :  { %300 = vmatpush.bf16.msra.mxu2 %v291_v5  ;;  %301 = vmatpush.bf16.msra.mxu3 %v291_v5 }
  0x13   :  { %146 = vmatpush.bf16.msra.mxu0 %v290_v6  ;;  %302 = vmatpush.bf16.msra.mxu1 %v290_v6 }
  0x14   :  { %303 = vmatpush.bf16.msra.mxu2 %v290_v6  ;;  %304 = vmatpush.bf16.msra.mxu3 %v290_v6 }
  0x17   :  { %147 = vmatpush.bf16.msra.mxu0 %v289_v7  ;;  %305 = vmatpush.bf16.msra.mxu1 %v289_v7 }
  0x18   :  { %306 = vmatpush.bf16.msra.mxu2 %v289_v7  ;;  %307 = vmatpush.bf16.msra.mxu3 %v289_v7 }
  0x1a   :  { %273 = vmatmul.msk.bf16.vlgmr.msra.gmra.mxu0 %vm111_vm1, %v281_v8  ;;  %275 = vmatmul.msk.bf16.vlgmr.msra.gmra.mxu1 %vm111_vm1, %v283_v9 }
  0x1b   :  { %277 = vmatmul.msk.bf16.vlgmr.msra.gmra.mxu2 %vm111_vm1, %v285_v10  ;;  %279 = vmatmul.msk.bf16.vlgmr.msra.gmra.mxu3 %vm111_vm1, %v287_v11 }
  0x2a   :  { %274 = vmatmul.msk.bf16.gmra.mxu0 %vm111_vm1, %v282_v12  ;;  %276 = vmatmul.msk.bf16.gmra.mxu1 %vm111_vm1, %v284_v13 }
  0x2b   :  { %278 = vmatmul.msk.bf16.gmra.mxu2 %vm111_vm1, %v286_v14  ;;  %280 = vmatmul.msk.bf16.gmra.mxu3 %vm111_vm1, %v288_v15 }
  0x97   :  { %v149_v17 = vpop.f32.mrf.mxu0  ;;  %v159_v18 = vpop.f32.mrf.mxu1 }
  0x98   :  { %v150_v19 = vadd.f32 %v308_v16, %v149_v17  ;;  %v160_v20 = vadd.f32 %v308_v16, %v159_v18 }
  0x9a   :  { %v189_v21 = vmax.f32 %v150_v19, 0.0  ;;  %v193_v22 = vmax.f32 %v160_v20, 0.0 }
  0x9c   :  { %205 = vst [vmem:[%s430_s3] sm:$0xff] %v189_v21 }
  0x9d   :  { %209 = vst [vmem:[%s430_s3 + $0x20] sm:$0xff] %v193_v22 }
  0x9e   :  { %v169_v23 = vpop.f32.mrf.mxu2  ;;  %v179_v24 = vpop.f32.mrf.mxu3 }
  0x9f   :  { %v170_v25 = vadd.f32 %v308_v16, %v169_v23  ;;  %v180_v26 = vadd.f32 %v308_v16, %v179_v24  ;;  %v151_v27 = vpop.f32.mrf.mxu0  ;;  %v161_v28 = vpop.f32.mrf.mxu1 }
  0xa0   :  { %v152_v29 = vadd.f32 %v308_v16, %v151_v27  ;;  %v162_v30 = vadd.f32 %v308_v16, %v161_v28 }
  0xa1   :  { %v197_v31 = vmax.f32 %v170_v25, 0.0  ;;  %v201_v32 = vmax.f32 %v180_v26, 0.0 }
  0xa2   :  { %v190_v33 = vmax.f32 %v152_v29, 0.0  ;;  %v194_v34 = vmax.f32 %v162_v30, 0.0 }
  0xa3   :  { %213 = vst [vmem:[%s430_s3 + $0x40] sm:$0xff] %v197_v31 }
  0xa4   :  { %217 = vst [vmem:[%s430_s3 + $0x60] sm:$0xff] %v201_v32 }
  0xa5   :  { %206 = vst [vmem:[%s430_s3 + $0x8] sm:$0xff] %v190_v33 }
  0xa6   :  { %210 = vst [vmem:[%s430_s3 + $0x28] sm:$0xff] %v194_v34  ;;  %v171_v35 = vpop.f32.mrf.mxu2  ;;  %v181_v36 = vpop.f32.mrf.mxu3 }
  0xa7   :  { %v172_v37 = vadd.f32 %v308_v16, %v171_v35  ;;  %v182_v38 = vadd.f32 %v308_v16, %v181_v36  ;;  %v154_v39 = vpop.f32.mrf.mxu0  ;;  %v164_v40 = vpop.f32.mrf.mxu1 }
  0xa8   :  { %v155_v41 = vadd.f32 %v308_v16, %v154_v39  ;;  %v165_v42 = vadd.f32 %v308_v16, %v164_v40 }
  0xa9   :  { %v198_v43 = vmax.f32 %v172_v37, 0.0  ;;  %v202_v44 = vmax.f32 %v182_v38, 0.0 }
  0xaa   :  { %v191_v45 = vmax.f32 %v155_v41, 0.0  ;;  %v195_v46 = vmax.f32 %v165_v42, 0.0 }
  0xab   :  { %214 = vst [vmem:[%s430_s3 + $0x48] sm:$0xff] %v198_v43 }
  0xac   :  { %218 = vst [vmem:[%s430_s3 + $0x68] sm:$0xff] %v202_v44 }
  0xad   :  { %207 = vst [vmem:[%s430_s3 + $0x10] sm:$0xff] %v191_v45 }
  0xae   :  { %211 = vst [vmem:[%s430_s3 + $0x30] sm:$0xff] %v195_v46  ;;  %v174_v47 = vpop.f32.mrf.mxu2  ;;  %v184_v48 = vpop.f32.mrf.mxu3 }
  0xaf   :  { %v175_v49 = vadd.f32 %v308_v16, %v174_v47  ;;  %v185_v50 = vadd.f32 %v308_v16, %v184_v48  ;;  %v156_v51 = vpop.f32.mrf.mxu0  ;;  %v166_v52 = vpop.f32.mrf.mxu1 }
  0xb0   :  { %v157_v53 = vadd.f32 %v308_v16, %v156_v51  ;;  %v167_v54 = vadd.f32 %v308_v16, %v166_v52 }
  0xb1   :  { %v199_v55 = vmax.f32 %v175_v49, 0.0  ;;  %v203_v56 = vmax.f32 %v185_v50, 0.0 }
  0xb2   :  { %v192_v57 = vmax.f32 %v157_v53, 0.0  ;;  %v196_v58 = vmax.f32 %v167_v54, 0.0 }
  0xb3   :  { %215 = vst [vmem:[%s430_s3 + $0x50] sm:$0xff] %v199_v55 }
  0xb4   :  { %219 = vst [vmem:[%s430_s3 + $0x70] sm:$0xff] %v203_v56 }
  0xb5   :  { %208 = vst [vmem:[%s430_s3 + $0x18] sm:$0xff] %v192_v57 }
  0xb6   :  { %212 = vst [vmem:[%s430_s3 + $0x38] sm:$0xff] %v196_v58  ;;  %v176_v59 = vpop.f32.mrf.mxu2  ;;  %v186_v60 = vpop.f32.mrf.mxu3 }
  0xb7   :  { %v177_v61 = vadd.f32 %v308_v16, %v176_v59  ;;  %v187_v62 = vadd.f32 %v308_v16, %v186_v60 }
  0xb9   :  { %v200_v63 = vmax.f32 %v177_v61, 0.0  ;;  %v204_v0 = vmax.f32 %v187_v62, 0.0 }
  0xbb   :  { %216 = vst [vmem:[%s430_s3 + $0x58] sm:$0xff] %v200_v63 }
  0xbc   :  { %220 = vst [vmem:[%s430_s3 + $0x78] sm:$0xff] %v204_v0 }

// kernel: xfeat_forward.26
= control target key start
LH: loop header
LB: loop body
LE: loop exit
PB: predicated region body
PF: predicated region fallthrough
CT: control target
= control target key end

     0   :  { %vm101_vm0 = vcmask 1043456   ;;  %vm76_vm1 = vcmask 64512   ;;  %s332_s1 = inlined_call_operand.vmem [shape: bf16[8,128], index: 1, kind: input, shape index: {}]   ;;  %s333_s0 = inlined_call_operand.vmem [shape: bf16[128,8], index: 0, kind: input, shape index: {}]   ;;  %s334_s2 = inlined_call_operand.vmem [shape: f32[1,128], index: 2, kind: input, shape index: {}]   ;;  %s335_s3 = inlined_call_operand.vmem [shape: f32[128,128], index: 3, kind: output, shape index: {}]  }
   0x1   :  { %v31_v0 = vld [vmem:[%s332_s1] sm:$0xf]  ;;  %v216_v3 = vld [vmem:[%s333_s0 + $0x10] sm:$0xff]  ;;  %v215_v6 = vld [vmem:[%s333_s0 + $0x8] sm:$0xff] }
   0x2   :  { %v103_v1 = vsel %vm101_vm0, %v31_v0, 0  ;;  %v214_v2 = vld [vmem:[%s333_s0] sm:$0xff]  ;;  %v220_v5 = vld [vmem:[%s333_s0 + $0x30] sm:$0xff]  ;;  %v217_v7 = vld [vmem:[%s333_s0 + $0x18] sm:$0xff] }
   0x3   :  { %112 = vmatpush.bf16.msra.mxu0 %v103_v1  ;;  %222 = vmatpush.bf16.msra.mxu1 %v103_v1  ;;  %v218_v4 = vld [vmem:[%s333_s0 + $0x20] sm:$0xff]  ;;  %v219_v8 = vld [vmem:[%s333_s0 + $0x28] sm:$0xff]  ;;  %v221_v9 = vld [vmem:[%s333_s0 + $0x38] sm:$0xff] }
   0x4   :  { %223 = vmatpush.bf16.msra.mxu2 %v103_v1  ;;  %224 = vmatpush.bf16.msra.mxu3 %v103_v1  ;;  %v225_v10 = vld [vmem:[%s334_s2] ss:$0 sm:$0xff] }
   0x6   :  { %206 = vmatmul.msk.bf16.vlgmr.msra.gmra.mxu0 %vm76_vm1, %v214_v2  ;;  %208 = vmatmul.msk.bf16.vlgmr.msra.gmra.mxu1 %vm76_vm1, %v216_v3 }
   0x7   :  { %210 = vmatmul.msk.bf16.vlgmr.msra.gmra.mxu2 %vm76_vm1, %v218_v4  ;;  %212 = vmatmul.msk.bf16.vlgmr.msra.gmra.mxu3 %vm76_vm1, %v220_v5 }
  0x16   :  { %207 = vmatmul.msk.bf16.gmra.mxu0 %vm76_vm1, %v215_v6  ;;  %209 = vmatmul.msk.bf16.gmra.mxu1 %vm76_vm1, %v217_v7 }
  0x17   :  { %211 = vmatmul.msk.bf16.gmra.mxu2 %vm76_vm1, %v219_v8  ;;  %213 = vmatmul.msk.bf16.gmra.mxu3 %vm76_vm1, %v221_v9 }
  0x83   :  { %v114_v11 = vpop.f32.mrf.mxu0  ;;  %v124_v12 = vpop.f32.mrf.mxu1 }
  0x84   :  { %v115_v13 = vadd.f32 %v225_v10, %v114_v11  ;;  %v125_v14 = vadd.f32 %v225_v10, %v124_v12 }
  0x86   :  { %154 = vst [vmem:[%s335_s3] sm:$0xff] %v115_v13 }
  0x87   :  { %158 = vst [vmem:[%s335_s3 + $0x20] sm:$0xff] %v125_v14 }
  0x8a   :  { %v134_v15 = vpop.f32.mrf.mxu2  ;;  %v144_v16 = vpop.f32.mrf.mxu3 }
  0x8b   :  { %v135_v17 = vadd.f32 %v225_v10, %v134_v15  ;;  %v145_v18 = vadd.f32 %v225_v10, %v144_v16  ;;  %v116_v19 = vpop.f32.mrf.mxu0  ;;  %v126_v20 = vpop.f32.mrf.mxu1 }
  0x8c   :  { %v117_v21 = vadd.f32 %v225_v10, %v116_v19  ;;  %v127_v22 = vadd.f32 %v225_v10, %v126_v20 }
  0x8d   :  { %162 = vst [vmem:[%s335_s3 + $0x40] sm:$0xff] %v135_v17 }
  0x8e   :  { %166 = vst [vmem:[%s335_s3 + $0x60] sm:$0xff] %v145_v18 }
  0x8f   :  { %155 = vst [vmem:[%s335_s3 + $0x8] sm:$0xff] %v117_v21 }
  0x90   :  { %159 = vst [vmem:[%s335_s3 + $0x28] sm:$0xff] %v127_v22 }
  0x92   :  { %v136_v23 = vpop.f32.mrf.mxu2  ;;  %v146_v24 = vpop.f32.mrf.mxu3 }
  0x93   :  { %v137_v25 = vadd.f32 %v225_v10, %v136_v23  ;;  %v147_v26 = vadd.f32 %v225_v10, %v146_v24  ;;  %v119_v27 = vpop.f32.mrf.mxu0  ;;  %v129_v28 = vpop.f32.mrf.mxu1 }
  0x94   :  { %v120_v29 = vadd.f32 %v225_v10, %v119_v27  ;;  %v130_v30 = vadd.f32 %v225_v10, %v129_v28 }
  0x95   :  { %163 = vst [vmem:[%s335_s3 + $0x48] sm:$0xff] %v137_v25 }
  0x96   :  { %167 = vst [vmem:[%s335_s3 + $0x68] sm:$0xff] %v147_v26 }
  0x97   :  { %156 = vst [vmem:[%s335_s3 + $0x10] sm:$0xff] %v120_v29 }
  0x98   :  { %160 = vst [vmem:[%s335_s3 + $0x30] sm:$0xff] %v130_v30 }
  0x9a   :  { %v139_v31 = vpop.f32.mrf.mxu2  ;;  %v149_v32 = vpop.f32.mrf.mxu3 }
  0x9b   :  { %v140_v33 = vadd.f32 %v225_v10, %v139_v31  ;;  %v150_v34 = vadd.f32 %v225_v10, %v149_v32  ;;  %v121_v35 = vpop.f32.mrf.mxu0  ;;  %v131_v36 = vpop.f32.mrf.mxu1 }
  0x9c   :  { %v122_v37 = vadd.f32 %v225_v10, %v121_v35  ;;  %v132_v38 = vadd.f32 %v225_v10, %v131_v36 }
  0x9d   :  { %164 = vst [vmem:[%s335_s3 + $0x50] sm:$0xff] %v140_v33 }
  0x9e   :  { %168 = vst [vmem:[%s335_s3 + $0x70] sm:$0xff] %v150_v34 }
  0x9f   :  { %157 = vst [vmem:[%s335_s3 + $0x18] sm:$0xff] %v122_v37 }
  0xa0   :  { %161 = vst [vmem:[%s335_s3 + $0x38] sm:$0xff] %v132_v38 }
  0xa2   :  { %v141_v39 = vpop.f32.mrf.mxu2  ;;  %v151_v40 = vpop.f32.mrf.mxu3 }
  0xa3   :  { %v142_v41 = vadd.f32 %v225_v10, %v141_v39  ;;  %v152_v42 = vadd.f32 %v225_v10, %v151_v40 }
  0xa5   :  { %165 = vst [vmem:[%s335_s3 + $0x58] sm:$0xff] %v142_v41 }
  0xa6   :  { %169 = vst [vmem:[%s335_s3 + $0x78] sm:$0xff] %v152_v42 }

// kernel: xfeat_forward.27
= control target key start
LH: loop header
LB: loop body
LE: loop exit
PB: predicated region body
PF: predicated region fallthrough
CT: control target
= control target key end

     0   :  { %vm240_vm0 = vcmask 1043456   ;;  %vm215_vm1 = vcmask 719872   ;;  %s787_s1 = inlined_call_operand.vmem [shape: bf16[216,128], index: 1, kind: input, shape index: {}]   ;;  %s788_s0 = inlined_call_operand.vmem [shape: bf16[128,216], index: 0, kind: input, shape index: {}]   ;;  %s789_s2 = inlined_call_operand.vmem [shape: f32[1,128], index: 2, kind: input, shape index: {}]   ;;  %s790_s3 = inlined_call_operand.vmem [shape: f32[128,128], index: 3, kind: output, shape index: {}]  }
   0x1   :  { %v525_v0 = vld [vmem:[%s787_s1 + $0x38] sm:$0xff]  ;;  %v57_v1 = vld [vmem:[%s787_s1 + $0x68] sm:$0xf]  ;;  %v524_v3 = vld [vmem:[%s787_s1 + $0x30] sm:$0xff] }
   0x2   :  { %v187_v2 = vunpack.c.l.b16 %v57_v1  ;;  %244 = vmatpush.bf16.msra.mxu0 %v525_v0  ;;  %531 = vmatpush.bf16.msra.mxu2 %v525_v0  ;;  %v530_v6 = vld [vmem:[%s787_s1 + $0x60] sm:$0xff]  ;;  %v523_v7 = vld [vmem:[%s787_s1 + $0x28] sm:$0xff]  ;;  %v529_v8 = vld [vmem:[%s787_s1 + $0x58] sm:$0xff] }
   0x3   :  { %v522_v9 = vld [vmem:[%s787_s1 + $0x20] sm:$0xff]  ;;  %v528_v10 = vld [vmem:[%s787_s1 + $0x50] sm:$0xff]  ;;  %v521_v11 = vld [vmem:[%s787_s1 + $0x18] sm:$0xff] }
   0x4   :  { %v201_v4 = vpack.c.b16 %v187_v2, %v187_v2  ;;  %v527_v12 = vld [vmem:[%s787_s1 + $0x48] sm:$0xff]  ;;  %v520_v13 = vld [vmem:[%s787_s1 + $0x10] sm:$0xff]  ;;  %v526_v14 = vld [vmem:[%s787_s1 + $0x40] sm:$0xff] }
   0x5   :  { %v519_v15 = vld [vmem:[%s787_s1 + $0x8] sm:$0xff]  ;;  %v502_v16 = vld [vmem:[%s788_s0 + $0x4] sm:$0xf]  ;;  %v512_v18 = vld [vmem:[%s788_s0 + $0x54] sm:$0xf] }
   0x6   :  { %v242_v5 = vsel %vm240_vm0, %v201_v4, 0  ;;  %245 = vmatpush.bf16.msra.mxu0 %v524_v3  ;;  %532 = vmatpush.bf16.msra.mxu2 %v524_v3  ;;  %v382_v17 = vld [vmem:[%s788_s0 + $0x8] sm:$0xf0]  ;;  %v422_v19 = vld [vmem:[%s788_s0 + $0x58] sm:$0xf0]  ;;  %v518_v21 = vld [vmem:[%s787_s1] sm:$0xff] }
   0x7   :  { %295 = vmatpush.bf16.msra.mxu1 %v242_v5  ;;  %539 = vmatpush.bf16.msra.mxu3 %v242_v5  ;;  %v385_v20 = vor.u32 %v502_v16, %v382_v17  ;;  %v380_v22 = vld [vmem:[%s788_s0] sm:$0xf]  ;;  %v503_v23 = vld [vmem:[%s788_s0 + $0x4] sm:$0xf0]  ;;  %v425_v24 = vor.u32 %v512_v18, %v422_v19  ;;  %v504_v29 = vld [vmem:[%s788_s0 + $0x14] sm:$0xf] }
   0x8   :  { %v412_v25 = vld [vmem:[%s788_s0 + $0x40] sm:$0xf]  ;;  %v511_v26 = vld [vmem:[%s788_s0 + $0x44] sm:$0xf0]  ;;  %v381_v27 = vor.u32 %v503_v23, %v380_v22  ;;  %v390_v30 = vld [vmem:[%s788_s0 + $0x18] sm:$0xf0] }
   0x9   :  { %v413_v28 = vor.u32 %v511_v26, %v412_v25  ;;  %v514_v31 = vld [vmem:[%s788_s0 + $0x64] sm:$0xf]  ;;  %v430_v32 = vld [vmem:[%s788_s0 + $0x68] sm:$0xf0]  ;;  %v393_v33 = vor.u32 %v504_v29, %v390_v30  ;;  %v388_v34 = vld [vmem:[%s788_s0 + $0x10] sm:$0xf] }
   0xa   :  { %246 = vmatpush.bf16.msra.mxu0 %v523_v7  ;;  %533 = vmatpush.bf16.msra.mxu2 %v523_v7  ;;  %v505_v35 = vld [vmem:[%s788_s0 + $0x14] sm:$0xf0]  ;;  %v433_v36 = vor.u32 %v514_v31, %v430_v32  ;;  %v420_v37 = vld [vmem:[%s788_s0 + $0x50] sm:$0xf]  ;;  %v506_v41 = vld [vmem:[%s788_s0 + $0x24] sm:$0xf] }
   0xb   :  { %296 = vmatpush.bf16.msra.mxu1 %v530_v6  ;;  %540 = vmatpush.bf16.msra.mxu3 %v530_v6  ;;  %v513_v38 = vld [vmem:[%s788_s0 + $0x54] sm:$0xf0]  ;;  %v389_v39 = vor.u32 %v505_v35, %v388_v34  ;;  %v398_v42 = vld [vmem:[%s788_s0 + $0x28] sm:$0xf0]  ;;  %v516_v43 = vld [vmem:[%s788_s0 + $0x74] sm:$0xf] }
   0xc   :  { %v421_v40 = vor.u32 %v513_v38, %v420_v37  ;;  %v438_v44 = vld [vmem:[%s788_s0 + $0x78] sm:$0xf0]  ;;  %v401_v45 = vor.u32 %v506_v41, %v398_v42  ;;  %v396_v46 = vld [vmem:[%s788_s0 + $0x20] sm:$0xf]  ;;  %v507_v47 = vld [vmem:[%s788_s0 + $0x24] sm:$0xf0] }
   0xd   :  { %v441_v48 = vor.u32 %v516_v43, %v438_v44  ;;  %v428_v49 = vld [vmem:[%s788_s0 + $0x60] sm:$0xf]  ;;  %v515_v50 = vld [vmem:[%s788_s0 + $0x64] sm:$0xf0]  ;;  %v397_v51 = vor.u32 %v507_v47, %v396_v46  ;;  %v508_v53 = vld [vmem:[%s788_s0 + $0x34] sm:$0xf] }
   0xe   :  { %247 = vmatpush.bf16.msra.mxu0 %v522_v9  ;;  %534 = vmatpush.bf16.msra.mxu2 %v522_v9  ;;  %v429_v52 = vor.u32 %v515_v50, %v428_v49  ;;  %v406_v54 = vld [vmem:[%s788_s0 + $0x38] sm:$0xf0]  ;;  %v404_v56 = vld [vmem:[%s788_s0 + $0x30] sm:$0xf]  ;;  %v509_v57 = vld [vmem:[%s788_s0 + $0x34] sm:$0xf0] }
   0xf   :  { %297 = vmatpush.bf16.msra.mxu1 %v529_v8  ;;  %541 = vmatpush.bf16.msra.mxu3 %v529_v8  ;;  %v409_v55 = vor.u32 %v508_v53, %v406_v54  ;;  %v436_v58 = vld [vmem:[%s788_s0 + $0x70] sm:$0xf]  ;;  %v517_v59 = vld [vmem:[%s788_s0 + $0x74] sm:$0xf0]  ;;  %v405_v60 = vor.u32 %v509_v57, %v404_v56  ;;  %v510_v62 = vld [vmem:[%s788_s0 + $0x44] sm:$0xf] }
  0x10   :  { %v437_v61 = vor.u32 %v517_v59, %v436_v58  ;;  %v414_v63 = vld [vmem:[%s788_s0 + $0x48] sm:$0xf0]  ;;  %v715_v2 = vld [vmem:[%s789_s2] ss:$0 sm:$0xff] }
  0x11   :  { %v417_v0 = vor.u32 %v510_v62, %v414_v63 }
  0x12   :  { %248 = vmatpush.bf16.msra.mxu0 %v521_v11  ;;  %535 = vmatpush.bf16.msra.mxu2 %v521_v11 }
  0x13   :  { %298 = vmatpush.bf16.msra.mxu1 %v528_v10  ;;  %542 = vmatpush.bf16.msra.mxu3 %v528_v10 }
  0x16   :  { %249 = vmatpush.bf16.msra.mxu0 %v520_v13  ;;  %536 = vmatpush.bf16.msra.mxu2 %v520_v13 }
  0x17   :  { %299 = vmatpush.bf16.msra.mxu1 %v527_v12  ;;  %543 = vmatpush.bf16.msra.mxu3 %v527_v12 }
  0x1a   :  { %250 = vmatpush.bf16.msra.mxu0 %v519_v15  ;;  %537 = vmatpush.bf16.msra.mxu2 %v519_v15 }
  0x1b   :  { %300 = vmatpush.bf16.msra.mxu1 %v526_v14  ;;  %544 = vmatpush.bf16.msra.mxu3 %v526_v14 }
  0x1e   :  { %494 = vmatmul.msk.bf16.vlgmr.msra.gmra.mxu1 %vm215_vm1, %v385_v20  ;;  %251 = vmatpush.bf16.msra.mxu0 %v518_v21 }
  0x1f   :  { %499 = vmatmul.msk.bf16.vlgmr.msra.gmra.mxu3 %vm215_vm1, %v425_v24  ;;  %538 = vmatpush.bf16.msra.mxu2 %v518_v21 }
  0x21   :  { %252 = vmatmul.bf16.vlgmr.msra.gmra.mxu0 %v381_v27 }
  0x22   :  { %272 = vmatmul.bf16.vlgmr.msra.gmra.mxu2 %v413_v28 }
  0x2e   :  { %495 = vmatmul.msk.bf16.gmra.mxu1 %vm215_vm1, %v393_v33 }
  0x2f   :  { %500 = vmatmul.msk.bf16.gmra.mxu3 %vm215_vm1, %v433_v36 }
  0x31   :  { %257 = vmatmul.bf16.gmra.mxu0 %v389_v39 }
  0x32   :  { %277 = vmatmul.bf16.gmra.mxu2 %v421_v40 }
  0x3e   :  { %496 = vmatmul.msk.bf16.gmra.mxu1 %vm215_vm1, %v401_v45 }
  0x3f   :  { %501 = vmatmul.msk.bf16.gmra.mxu3 %vm215_vm1, %v441_v48 }
  0x41   :  { %262 = vmatmul.bf16.gmra.mxu0 %v397_v51 }
  0x42   :  { %282 = vmatmul.bf16.gmra.mxu2 %v429_v52 }
  0x4e   :  { %497 = vmatmul.msk.bf16.gmra.mxu1 %vm215_vm1, %v409_v55 }
  0x51   :  { %267 = vmatmul.bf16.gmra.mxu0 %v405_v60 }
  0x52   :  { %287 = vmatmul.bf16.gmra.mxu2 %v437_v61 }
  0x5e   :  { %498 = vmatmul.msk.bf16.gmra.mxu1 %vm215_vm1, %v417_v0 }
  0x9b   :  { %v302_v1 = vpop.f32.mrf.mxu1 }
  0x9e   :  { %v253_v3 = vpop.f32.mrf.mxu0 }
  0x9f   :  { %v254_v4 = vadd.f32 %v715_v2, %v253_v3 }
  0xa1   :  { %v303_v5 = vadd.f32 %v302_v1, %v254_v4 }
  0xa2   :  { %v327_v15 = vpop.f32.mrf.mxu3 }
  0xa3   :  { %v304_v6 = vpop.f32.mrf.mxu1  ;;  %v342_v7 = vmax.f32 %v303_v5, 0.0 }
  0xa5   :  { %358 = vst [vmem:[%s790_s3] sm:$0xff] %v342_v7  ;;  %v721_v8 = vpop.f32.mrf.mxu2 }
  0xa6   :  { %v255_v9 = vpop.f32.mrf.mxu0  ;;  %v274_v3 = vadd.f32 %v715_v2, %v721_v8 }
  0xa7   :  { %v256_v10 = vadd.f32 %v715_v2, %v255_v9 }
  0xa9   :  { %v305_v11 = vadd.f32 %v304_v6, %v256_v10 }
  0xaa   :  { %v329_v25 = vpop.f32.mrf.mxu3 }
  0xab   :  { %v307_v12 = vpop.f32.mrf.mxu1  ;;  %v343_v13 = vmax.f32 %v305_v11, 0.0 }
  0xad   :  { %359 = vst [vmem:[%s790_s3 + $0x8] sm:$0xff] %v343_v13  ;;  %v727_v14 = vpop.f32.mrf.mxu2 }
  0xae   :  { %v258_v16 = vpop.f32.mrf.mxu0 }
  0xaf   :  { %v259_v17 = vadd.f32 %v715_v2, %v258_v16 }
  0xb1   :  { %v308_v18 = vadd.f32 %v307_v12, %v259_v17 }
  0xb2   :  { %v332_v37 = vpop.f32.mrf.mxu3 }
  0xb3   :  { %v309_v19 = vpop.f32.mrf.mxu1  ;;  %v344_v20 = vmax.f32 %v308_v18, 0.0 }
  0xb5   :  { %360 = vst [vmem:[%s790_s3 + $0x10] sm:$0xff] %v344_v20  ;;  %v278_v21 = vpop.f32.mrf.mxu2 }
  0xb6   :  { %v279_v22 = vadd.f32 %v715_v2, %v278_v21  ;;  %v260_v23 = vpop.f32.mrf.mxu0 }
  0xb7   :  { %v261_v24 = vadd.f32 %v715_v2, %v260_v23 }
  0xb8   :  { %v328_v26 = vadd.f32 %v327_v15, %v279_v22  ;;  %v276_v15 = vadd.f32 %v715_v2, %v727_v14 }
  0xb9   :  { %v310_v27 = vadd.f32 %v309_v19, %v261_v24 }
  0xba   :  { %v352_v28 = vmax.f32 %v328_v26, 0.0  ;;  %v334_v50 = vpop.f32.mrf.mxu3 }
  0xbb   :  { %v312_v29 = vpop.f32.mrf.mxu1  ;;  %v345_v30 = vmax.f32 %v310_v27, 0.0 }
  0xbc   :  { %368 = vst [vmem:[%s790_s3 + $0x50] sm:$0xff] %v352_v28 }
  0xbd   :  { %361 = vst [vmem:[%s790_s3 + $0x18] sm:$0xff] %v345_v30  ;;  %v280_v31 = vpop.f32.mrf.mxu2 }
  0xbe   :  { %v281_v32 = vadd.f32 %v715_v2, %v280_v31  ;;  %v263_v33 = vpop.f32.mrf.mxu0 }
  0xbf   :  { %v264_v34 = vadd.f32 %v715_v2, %v263_v33 }
  0xc0   :  { %v330_v35 = vadd.f32 %v329_v25, %v281_v32 }
  0xc1   :  { %v313_v36 = vadd.f32 %v312_v29, %v264_v34 }
  0xc2   :  { %v353_v38 = vmax.f32 %v330_v35, 0.0  ;;  %v337_v60 = vpop.f32.mrf.mxu3 }
  0xc3   :  { %v314_v39 = vpop.f32.mrf.mxu1  ;;  %v346_v40 = vmax.f32 %v313_v36, 0.0 }
  0xc4   :  { %369 = vst [vmem:[%s790_s3 + $0x58] sm:$0xff] %v353_v38 }
  0xc5   :  { %362 = vst [vmem:[%s790_s3 + $0x20] sm:$0xff] %v346_v40  ;;  %v283_v41 = vpop.f32.mrf.mxu2 }
  0xc6   :  { %v284_v42 = vadd.f32 %v715_v2, %v283_v41  ;;  %v265_v43 = vpop.f32.mrf.mxu0 }
  0xc7   :  { %v266_v44 = vadd.f32 %v715_v2, %v265_v43 }
  0xc8   :  { %v333_v45 = vadd.f32 %v332_v37, %v284_v42 }
  0xc9   :  { %v315_v46 = vadd.f32 %v314_v39, %v266_v44 }
  0xca   :  { %v354_v47 = vmax.f32 %v333_v45, 0.0  ;;  %v339_v8 = vpop.f32.mrf.mxu3 }
  0xcb   :  { %v317_v48 = vpop.f32.mrf.mxu1  ;;  %v347_v49 = vmax.f32 %v315_v46, 0.0 }
  0xcc   :  { %370 = vst [vmem:[%s790_s3 + $0x60] sm:$0xff] %v354_v47 }
  0xcd   :  { %363 = vst [vmem:[%s790_s3 + $0x28] sm:$0xff] %v347_v49  ;;  %v285_v51 = vpop.f32.mrf.mxu2 }
  0xce   :  { %v286_v52 = vadd.f32 %v715_v2, %v285_v51  ;;  %v268_v53 = vpop.f32.mrf.mxu0 }
  0xcf   :  { %v269_v54 = vadd.f32 %v715_v2, %v268_v53 }
  0xd0   :  { %v335_v55 = vadd.f32 %v334_v50, %v286_v52 }
  0xd1   :  { %v318_v56 = vadd.f32 %v317_v48, %v269_v54 }
  0xd2   :  { %v355_v57 = vmax.f32 %v335_v55, 0.0 }
  0xd3   :  { %v319_v58 = vpop.f32.mrf.mxu1  ;;  %v348_v59 = vmax.f32 %v318_v56, 0.0 }
  0xd4   :  { %371 = vst [vmem:[%s790_s3 + $0x68] sm:$0xff] %v355_v57 }
  0xd5   :  { %364 = vst [vmem:[%s790_s3 + $0x30] sm:$0xff] %v348_v59  ;;  %v288_v61 = vpop.f32.mrf.mxu2 }
  0xd6   :  { %v289_v62 = vadd.f32 %v715_v2, %v288_v61  ;;  %v270_v63 = vpop.f32.mrf.mxu0 }
  0xd7   :  { %v271_v0 = vadd.f32 %v715_v2, %v270_v63 }
  0xd8   :  { %v338_v1 = vadd.f32 %v337_v60, %v289_v62 }
  0xd9   :  { %v320_v4 = vadd.f32 %v319_v58, %v271_v0 }
  0xda   :  { %v356_v5 = vmax.f32 %v338_v1, 0.0 }
  0xdb   :  { %v322_v6 = vpop.f32.mrf.mxu1  ;;  %v349_v7 = vmax.f32 %v320_v4, 0.0 }
  0xdc   :  { %v323_v9 = vadd.f32 %v322_v6, %v274_v3  ;;  %372 = vst [vmem:[%s790_s3 + $0x70] sm:$0xff] %v356_v5 }
  0xdd   :  { %365 = vst [vmem:[%s790_s3 + $0x38] sm:$0xff] %v349_v7  ;;  %v290_v11 = vpop.f32.mrf.mxu2 }
  0xde   :  { %v350_v10 = vmax.f32 %v323_v9, 0.0  ;;  %v291_v12 = vadd.f32 %v715_v2, %v290_v11 }
  0xe0   :  { %366 = vst [vmem:[%s790_s3 + $0x40] sm:$0xff] %v350_v10  ;;  %v340_v13 = vadd.f32 %v339_v8, %v291_v12 }
  0xe2   :  { %v357_v16 = vmax.f32 %v340_v13, 0.0 }
  0xe3   :  { %v324_v17 = vpop.f32.mrf.mxu1 }
  0xe4   :  { %v325_v18 = vadd.f32 %v324_v17, %v276_v15  ;;  %373 = vst [vmem:[%s790_s3 + $0x78] sm:$0xff] %v357_v16 }
  0xe6   :  { %v351_v19 = vmax.f32 %v325_v18, 0.0 }
  0xe8   :  { %367 = vst [vmem:[%s790_s3 + $0x48] sm:$0xff] %v351_v19 }

// kernel: xfeat_forward.29
= control target key start
LH: loop header
LB: loop body
LE: loop exit
PB: predicated region body
PF: predicated region fallthrough
CT: control target
= control target key end

     0   :  { %vm156_vm0 = vcmask 1043456   ;;  %vm149_vm1 = vcmask 719872   ;;  %vm202_vm2 = vcmask 523264   ;;  %s418_s1 = inlined_call_operand.vmem [shape: bf16[216,64], index: 1, kind: input, shape index: {}]   ;;  %s419_s2 = inlined_call_operand.vmem [shape: f32[1,64], index: 2, kind: input, shape index: {}]   ;;  %s420_s0 = inlined_call_operand.vmem [shape: bf16[32,216], index: 0, kind: input, shape index: {}]   ;;  %s421_s3 = inlined_call_operand.vmem [shape: f32[32,64], index: 3, kind: output, shape index: {}]  }
   0x1   :  { %v292_v0 = vld [vmem:[%s418_s1 + $0x38] sm:$0xff]  ;;  %v45_v1 = vld [vmem:[%s418_s1 + $0x68] sm:$0xf]  ;;  %v291_v3 = vld [vmem:[%s418_s1 + $0x30] sm:$0xff] }
   0x2   :  { %v121_v2 = vunpack.c.l.b16 %v45_v1  ;;  %160 = vmatpush.bf16.msra.mxu0 %v292_v0  ;;  %298 = vmatpush.bf16.msra.mxu2 %v292_v0  ;;  %v297_v6 = vld [vmem:[%s418_s1 + $0x60] sm:$0xff]  ;;  %v290_v7 = vld [vmem:[%s418_s1 + $0x28] sm:$0xff]  ;;  %v296_v8 = vld [vmem:[%s418_s1 + $0x58] sm:$0xff] }
   0x3   :  { %v289_v9 = vld [vmem:[%s418_s1 + $0x20] sm:$0xff]  ;;  %v295_v10 = vld [vmem:[%s418_s1 + $0x50] sm:$0xff]  ;;  %v288_v11 = vld [vmem:[%s418_s1 + $0x18] sm:$0xff] }
   0x4   :  { %v135_v4 = vpack.c.b16 %v121_v2, %v121_v2  ;;  %v294_v12 = vld [vmem:[%s418_s1 + $0x48] sm:$0xff]  ;;  %v287_v13 = vld [vmem:[%s418_s1 + $0x10] sm:$0xff]  ;;  %v293_v14 = vld [vmem:[%s418_s1 + $0x40] sm:$0xff] }
   0x5   :  { %v286_v15 = vld [vmem:[%s418_s1 + $0x8] sm:$0xff]  ;;  %v283_v16 = vld [vmem:[%s420_s0 + $0x14] sm:$0xf]  ;;  %v223_v17 = vld [vmem:[%s420_s0 + $0x18] sm:$0xf0] }
   0x6   :  { %v158_v5 = vsel %vm156_vm0, %v135_v4, 0  ;;  %161 = vmatpush.bf16.msra.mxu0 %v291_v3  ;;  %299 = vmatpush.bf16.msra.mxu2 %v291_v3  ;;  %v281_v18 = vld [vmem:[%s420_s0 + $0x4] sm:$0xf]  ;;  %v215_v19 = vld [vmem:[%s420_s0 + $0x8] sm:$0xf0]  ;;  %v226_v20 = vor.u32 %v283_v16, %v223_v17 }
   0x7   :  { %306 = vmatpush.bf16.msra.mxu3 %v158_v5  ;;  %181 = vmatpush.bf16.msra.mxu1 %v158_v5  ;;  %v285_v21 = vld [vmem:[%s418_s1] sm:$0xff]  ;;  %v282_v23 = vld [vmem:[%s420_s0 + $0x4] sm:$0xf0]  ;;  %v218_v24 = vor.u32 %v281_v18, %v215_v19  ;;  %v221_v25 = vld [vmem:[%s420_s0 + $0x10] sm:$0xf] }
   0x8   :  { %v213_v22 = vld [vmem:[%s420_s0] sm:$0xf]  ;;  %v284_v26 = vld [vmem:[%s420_s0 + $0x14] sm:$0xf0] }
   0x9   :  { %v214_v27 = vor.u32 %v282_v23, %v213_v22  ;;  %v222_v28 = vor.u32 %v284_v26, %v221_v25  ;;  %v312_v29 = vld [vmem:[%s419_s2] ss:$0 sm:$0xff] }
   0xa   :  { %162 = vmatpush.bf16.msra.mxu0 %v290_v7  ;;  %300 = vmatpush.bf16.msra.mxu2 %v290_v7 }
   0xb   :  { %307 = vmatpush.bf16.msra.mxu3 %v297_v6  ;;  %182 = vmatpush.bf16.msra.mxu1 %v297_v6 }
   0xe   :  { %163 = vmatpush.bf16.msra.mxu0 %v289_v9  ;;  %301 = vmatpush.bf16.msra.mxu2 %v289_v9 }
   0xf   :  { %308 = vmatpush.bf16.msra.mxu3 %v296_v8  ;;  %183 = vmatpush.bf16.msra.mxu1 %v296_v8 }
  0x12   :  { %164 = vmatpush.bf16.msra.mxu0 %v288_v11  ;;  %302 = vmatpush.bf16.msra.mxu2 %v288_v11 }
  0x13   :  { %309 = vmatpush.bf16.msra.mxu3 %v295_v10  ;;  %184 = vmatpush.bf16.msra.mxu1 %v295_v10 }
  0x16   :  { %165 = vmatpush.bf16.msra.mxu0 %v287_v13  ;;  %303 = vmatpush.bf16.msra.mxu2 %v287_v13 }
  0x17   :  { %310 = vmatpush.bf16.msra.mxu3 %v294_v12  ;;  %185 = vmatpush.bf16.msra.mxu1 %v294_v12 }
  0x1a   :  { %166 = vmatpush.bf16.msra.mxu0 %v286_v15  ;;  %304 = vmatpush.bf16.msra.mxu2 %v286_v15 }
  0x1b   :  { %311 = vmatpush.bf16.msra.mxu3 %v293_v14  ;;  %186 = vmatpush.bf16.msra.mxu1 %v293_v14 }
  0x1e   :  { %280 = vmatmul.msk.bf16.vlgmr.msra.gmra.mxu3 %vm149_vm1, %v226_v20  ;;  %167 = vmatpush.bf16.msra.mxu0 %v285_v21 }
  0x1f   :  { %279 = vmatmul.msk.bf16.vlgmr.msra.gmra.mxu1 %vm149_vm1, %v218_v24  ;;  %305 = vmatpush.bf16.msra.mxu2 %v285_v21 }
  0x21   :  { %168 = vmatmul.bf16.vlgmr.msra.gmra.mxu0 %v214_v27 }
  0x22   :  { %173 = vmatmul.bf16.vlgmr.msra.gmra.mxu2 %v222_v28 }
  0x9c   :  { %v188_v31 = vpop.f32.mrf.mxu1 }
  0x9e   :  { %v169_v30 = vpop.f32.mrf.mxu0 }
  0x9f   :  { %v170_v32 = vadd.f32 %v312_v29, %v169_v30 }
  0xa1   :  { %v189_v33 = vadd.f32 %v188_v31, %v170_v32  ;;  %v193_v35 = vpop.f32.mrf.mxu3 }
  0xa3   :  { %v198_v34 = vmax.f32 %v189_v33, 0.0 }
  0xa4   :  { %v190_v41 = vpop.f32.mrf.mxu1 }
  0xa5   :  { %203 = vst.msk [vmem:[%s421_s3] sm:$0xff] %vm202_vm2, %v198_v34  ;;  %v174_v36 = vpop.f32.mrf.mxu2 }
  0xa6   :  { %v175_v37 = vadd.f32 %v312_v29, %v174_v36  ;;  %v171_v38 = vpop.f32.mrf.mxu0 }
  0xa7   :  { %v172_v39 = vadd.f32 %v312_v29, %v171_v38 }
  0xa8   :  { %v194_v40 = vadd.f32 %v193_v35, %v175_v37 }
  0xa9   :  { %v191_v42 = vadd.f32 %v190_v41, %v172_v39  ;;  %v195_v47 = vpop.f32.mrf.mxu3 }
  0xaa   :  { %v200_v43 = vmax.f32 %v194_v40, 0.0 }
  0xab   :  { %v199_v44 = vmax.f32 %v191_v42, 0.0 }
  0xac   :  { %205 = vst.msk [vmem:[%s421_s3 + $0x10] sm:$0xff] %vm202_vm2, %v200_v43 }
  0xad   :  { %204 = vst.msk [vmem:[%s421_s3 + $0x8] sm:$0xff] %vm202_vm2, %v199_v44  ;;  %v176_v45 = vpop.f32.mrf.mxu2 }
  0xae   :  { %v177_v46 = vadd.f32 %v312_v29, %v176_v45 }
  0xb0   :  { %v196_v48 = vadd.f32 %v195_v47, %v177_v46 }
  0xb2   :  { %v201_v49 = vmax.f32 %v196_v48, 0.0 }
  0xb4   :  { %206 = vst.msk [vmem:[%s421_s3 + $0x18] sm:$0xff] %vm202_vm2, %v201_v49 }

// kernel: xfeat_forward.30
= control target key start
LH: loop header
LB: loop body
LE: loop exit
PB: predicated region body
PF: predicated region fallthrough
CT: control target
= control target key end

     0   :  { %vm369_vm0 = vcmask 523264   ;;  %s929_s1 = inlined_call_operand.vmem [shape: bf16[576,64], index: 1, kind: input, shape index: {}]   ;;  %s930_s2 = inlined_call_operand.vmem [shape: f32[1,64], index: 2, kind: input, shape index: {}]   ;;  %s931_s0 = inlined_call_operand.vmem [shape: bf16[32,576], index: 0, kind: input, shape index: {}]   ;;  %s932_s3 = inlined_call_operand.vmem [shape: f32[32,64], index: 3, kind: output, shape index: {}]  }
   0x1   :  { %v686_v0 = vld [vmem:[%s929_s1 + $0x38] sm:$0xff]  ;;  %v685_v4 = vld [vmem:[%s929_s1 + $0x30] sm:$0xff]  ;;  %v684_v8 = vld [vmem:[%s929_s1 + $0x28] sm:$0xff] }
   0x2   :  { %v694_v1 = vld [vmem:[%s929_s1 + $0x78] sm:$0xff]  ;;  %376 = vmatpush.bf16.msra.mxu0 %v686_v0  ;;  %v693_v5 = vld [vmem:[%s929_s1 + $0x70] sm:$0xff]  ;;  %v692_v9 = vld [vmem:[%s929_s1 + $0x68] sm:$0xff] }
   0x3   :  { %v702_v2 = vld [vmem:[%s929_s1 + $0xb8] sm:$0xff]  ;;  %395 = vmatpush.bf16.msra.mxu1 %v694_v1  ;;  %v701_v6 = vld [vmem:[%s929_s1 + $0xb0] sm:$0xff]  ;;  %v700_v10 = vld [vmem:[%s929_s1 + $0xa8] sm:$0xff] }
   0x4   :  { %v710_v3 = vld [vmem:[%s929_s1 + $0xf8] sm:$0xff]  ;;  %414 = vmatpush.bf16.msra.mxu2 %v702_v2  ;;  %v709_v7 = vld [vmem:[%s929_s1 + $0xf0] sm:$0xff]  ;;  %v708_v11 = vld [vmem:[%s929_s1 + $0xe8] sm:$0xff] }
   0x5   :  { %433 = vmatpush.bf16.msra.mxu3 %v710_v3  ;;  %v683_v12 = vld [vmem:[%s929_s1 + $0x20] sm:$0xff]  ;;  %v682_v16 = vld [vmem:[%s929_s1 + $0x18] sm:$0xff]  ;;  %v681_v20 = vld [vmem:[%s929_s1 + $0x10] sm:$0xff] }
   0x6   :  { %377 = vmatpush.bf16.msra.mxu0 %v685_v4  ;;  %v691_v13 = vld [vmem:[%s929_s1 + $0x60] sm:$0xff]  ;;  %v690_v17 = vld [vmem:[%s929_s1 + $0x58] sm:$0xff]  ;;  %v689_v21 = vld [vmem:[%s929_s1 + $0x50] sm:$0xff] }
   0x7   :  { %396 = vmatpush.bf16.msra.mxu1 %v693_v5  ;;  %v699_v14 = vld [vmem:[%s929_s1 + $0xa0] sm:$0xff]  ;;  %v698_v18 = vld [vmem:[%s929_s1 + $0x98] sm:$0xff]  ;;  %v697_v22 = vld [vmem:[%s929_s1 + $0x90] sm:$0xff] }
   0x8   :  { %415 = vmatpush.bf16.msra.mxu2 %v701_v6  ;;  %v707_v15 = vld [vmem:[%s929_s1 + $0xe0] sm:$0xff]  ;;  %v706_v19 = vld [vmem:[%s929_s1 + $0xd8] sm:$0xff]  ;;  %v705_v23 = vld [vmem:[%s929_s1 + $0xd0] sm:$0xff] }
   0x9   :  { %434 = vmatpush.bf16.msra.mxu3 %v709_v7  ;;  %v680_v24 = vld [vmem:[%s929_s1 + $0x8] sm:$0xff]  ;;  %v679_v28 = vld [vmem:[%s929_s1] sm:$0xff]  ;;  %v671_v33 = vld [vmem:[%s931_s0 + $0x10] sm:$0xf0] }
   0xa   :  { %378 = vmatpush.bf16.msra.mxu0 %v684_v8  ;;  %v688_v25 = vld [vmem:[%s929_s1 + $0x48] sm:$0xff]  ;;  %v687_v29 = vld [vmem:[%s929_s1 + $0x40] sm:$0xff]  ;;  %v487_v35 = vld [vmem:[%s931_s0 + $0x14] sm:$0xf0] }
   0xb   :  { %397 = vmatpush.bf16.msra.mxu1 %v692_v9  ;;  %v696_v26 = vld [vmem:[%s929_s1 + $0x88] sm:$0xff]  ;;  %v695_v30 = vld [vmem:[%s929_s1 + $0x80] sm:$0xff]  ;;  %v672_v37 = vld [vmem:[%s931_s0 + $0x18] sm:$0xf0] }
   0xc   :  { %416 = vmatpush.bf16.msra.mxu2 %v700_v10  ;;  %v704_v27 = vld [vmem:[%s929_s1 + $0xc8] sm:$0xff]  ;;  %v703_v31 = vld [vmem:[%s929_s1 + $0xc0] sm:$0xff]  ;;  %v714_v40 = vld [vmem:[%s929_s1 + $0x118] sm:$0xff] }
   0xd   :  { %435 = vmatpush.bf16.msra.mxu3 %v708_v11  ;;  %v485_v32 = vld [vmem:[%s931_s0] sm:$0xf]  ;;  %v669_v34 = vld [vmem:[%s931_s0 + $0x4] sm:$0xf]  ;;  %v493_v36 = vld [vmem:[%s931_s0 + $0x8] sm:$0xf] }
   0xe   :  { %379 = vmatpush.bf16.msra.mxu0 %v683_v12  ;;  %v670_v38 = vld [vmem:[%s931_s0 + $0xc] sm:$0xf]  ;;  %v495_v39 = vld [vmem:[%s931_s0 + $0x1c] sm:$0xf0]  ;;  %v486_v41 = vor.u32 %v671_v33, %v485_v32  ;;  %v490_v42 = vor.u32 %v669_v34, %v487_v35  ;;  %v494_v43 = vor.u32 %v672_v37, %v493_v36  ;;  %v713_v45 = vld [vmem:[%s929_s1 + $0x110] sm:$0xff] }
   0xf   :  { %398 = vmatpush.bf16.msra.mxu1 %v691_v13  ;;  %v498_v44 = vor.u32 %v670_v38, %v495_v39  ;;  %v712_v46 = vld [vmem:[%s929_s1 + $0x108] sm:$0xff]  ;;  %v711_v47 = vld [vmem:[%s929_s1 + $0x100] sm:$0xff]  ;;  %v676_v49 = vld [vmem:[%s931_s0 + $0x38] sm:$0xf0] }
  0x10   :  { %417 = vmatpush.bf16.msra.mxu2 %v699_v14  ;;  %v505_v48 = vld [vmem:[%s931_s0 + $0x28] sm:$0xf]  ;;  %v674_v50 = vld [vmem:[%s931_s0 + $0x2c] sm:$0xf]  ;;  %v507_v51 = vld [vmem:[%s931_s0 + $0x3c] sm:$0xf0] }
  0x11   :  { %436 = vmatpush.bf16.msra.mxu3 %v707_v15  ;;  %v513_v52 = vld [vmem:[%s931_s0 + $0x30] sm:$0xf]  ;;  %v677_v53 = vld [vmem:[%s931_s0 + $0x40] sm:$0xf0]  ;;  %v675_v54 = vld [vmem:[%s931_s0 + $0x34] sm:$0xf]  ;;  %v506_v56 = vor.u32 %v676_v49, %v505_v48  ;;  %v510_v57 = vor.u32 %v674_v50, %v507_v51 }
  0x12   :  { %380 = vmatpush.bf16.msra.mxu0 %v682_v16  ;;  %v515_v55 = vld [vmem:[%s931_s0 + $0x44] sm:$0xf0]  ;;  %v514_v58 = vor.u32 %v677_v53, %v513_v52  ;;  %v501_v60 = vld [vmem:[%s931_s0 + $0x10] sm:$0xf]  ;;  %v673_v61 = vld [vmem:[%s931_s0 + $0x20] sm:$0xf0] }
  0x13   :  { %399 = vmatpush.bf16.msra.mxu1 %v690_v17  ;;  %v518_v59 = vor.u32 %v675_v54, %v515_v55  ;;  %v521_v62 = vld [vmem:[%s931_s0 + $0x38] sm:$0xf]  ;;  %v678_v63 = vld [vmem:[%s931_s0 + $0x48] sm:$0xf0]  ;;  %v502_v0 = vor.u32 %v673_v61, %v501_v60  ;;  %v719_v11 = vld [vmem:[%s930_s2] ss:$0 sm:$0xff] }
  0x14   :  { %418 = vmatpush.bf16.msra.mxu2 %v698_v18  ;;  %v522_v1 = vor.u32 %v678_v63, %v521_v62 }
  0x15   :  { %437 = vmatpush.bf16.msra.mxu3 %v706_v19 }
  0x16   :  { %381 = vmatpush.bf16.msra.mxu0 %v681_v20 }
  0x17   :  { %400 = vmatpush.bf16.msra.mxu1 %v689_v21 }
  0x18   :  { %419 = vmatpush.bf16.msra.mxu2 %v697_v22 }
  0x19   :  { %438 = vmatpush.bf16.msra.mxu3 %v705_v23 }
  0x1a   :  { %382 = vmatpush.bf16.msra.mxu0 %v680_v24 }
  0x1b   :  { %401 = vmatpush.bf16.msra.mxu1 %v688_v25 }
  0x1c   :  { %420 = vmatpush.bf16.msra.mxu2 %v696_v26 }
  0x1d   :  { %439 = vmatpush.bf16.msra.mxu3 %v704_v27 }
  0x1e   :  { %383 = vmatpush.bf16.msra.mxu0 %v679_v28 }
  0x1f   :  { %402 = vmatpush.bf16.msra.mxu1 %v687_v29 }
  0x20   :  { %421 = vmatpush.bf16.msra.mxu2 %v695_v30 }
  0x21   :  { %440 = vmatpush.bf16.msra.mxu3 %v703_v31  ;;  %384 = vmatmul.bf16.vlgmr.msra.gmra.mxu0 %v486_v41 }
  0x22   :  { %456 = vmatpush.bf16.msrb.mxu0 %v714_v40  ;;  %403 = vmatmul.bf16.vlgmr.msra.gmra.mxu1 %v490_v42 }
  0x23   :  { %715 = vmatpush.bf16.msrb.mxu1 %v714_v40  ;;  %422 = vmatmul.bf16.vlgmr.msra.gmra.mxu2 %v494_v43 }
  0x24   :  { %441 = vmatmul.bf16.vlgmr.msra.gmra.mxu3 %v498_v44 }
  0x26   :  { %457 = vmatpush.bf16.msrb.mxu0 %v713_v45 }
  0x27   :  { %716 = vmatpush.bf16.msrb.mxu1 %v713_v45 }
  0x2a   :  { %458 = vmatpush.bf16.msrb.mxu0 %v712_v46 }
  0x2b   :  { %717 = vmatpush.bf16.msrb.mxu1 %v712_v46 }
  0x2e   :  { %459 = vmatpush.bf16.msrb.mxu0 %v711_v47 }
  0x2f   :  { %718 = vmatpush.bf16.msrb.mxu1 %v711_v47 }
  0x31   :  { %389 = vmatmul.bf16.gmra.mxu0 %v506_v56 }
  0x32   :  { %408 = vmatmul.bf16.gmra.mxu1 %v510_v57 }
  0x33   :  { %427 = vmatmul.bf16.gmra.mxu2 %v514_v58 }
  0x34   :  { %446 = vmatmul.bf16.gmra.mxu3 %v518_v59 }
  0x41   :  { %667 = vmatmul.msk.bf16.vlgmr.msrb.gmra.mxu0 %vm369_vm0, %v502_v0 }
  0x42   :  { %668 = vmatmul.msk.bf16.vlgmr.msrb.gmra.mxu1 %vm369_vm0, %v522_v1 }
  0x9e   :  { %v385_v2 = vpop.f32.mrf.mxu0 }
  0x9f   :  { %v404_v3 = vpop.f32.mrf.mxu1  ;;  %v386_v13 = vadd.f32 %v719_v11, %v385_v2 }
  0xa1   :  { %v405_v18 = vadd.f32 %v404_v3, %v386_v13 }
  0xa6   :  { %v423_v4 = vpop.f32.mrf.mxu2  ;;  %v387_v6 = vpop.f32.mrf.mxu0 }
  0xa7   :  { %v442_v5 = vpop.f32.mrf.mxu3  ;;  %v406_v7 = vpop.f32.mrf.mxu1  ;;  %v424_v20 = vadd.f32 %v423_v4, %v405_v18  ;;  %v388_v23 = vadd.f32 %v719_v11, %v387_v6 }
  0xa9   :  { %v443_v25 = vadd.f32 %v442_v5, %v424_v20  ;;  %v407_v30 = vadd.f32 %v406_v7, %v388_v23 }
  0xae   :  { %v425_v8 = vpop.f32.mrf.mxu2  ;;  %v390_v9 = vpop.f32.mrf.mxu0 }
  0xaf   :  { %v409_v10 = vpop.f32.mrf.mxu1  ;;  %v444_v12 = vpop.f32.mrf.mxu3  ;;  %v391_v14 = vadd.f32 %v719_v11, %v390_v9  ;;  %v426_v34 = vadd.f32 %v425_v8, %v407_v30 }
  0xb1   :  { %v410_v19 = vadd.f32 %v409_v10, %v391_v14  ;;  %v445_v39 = vadd.f32 %v444_v12, %v426_v34 }
  0xb6   :  { %v428_v15 = vpop.f32.mrf.mxu2  ;;  %v392_v16 = vpop.f32.mrf.mxu0 }
  0xb7   :  { %v411_v17 = vpop.f32.mrf.mxu1  ;;  %v429_v21 = vadd.f32 %v428_v15, %v410_v19  ;;  %v447_v22 = vpop.f32.mrf.mxu3  ;;  %v393_v24 = vadd.f32 %v719_v11, %v392_v16 }
  0xb9   :  { %v448_v26 = vadd.f32 %v447_v22, %v429_v21  ;;  %v412_v31 = vadd.f32 %v411_v17, %v393_v24 }
  0xbe   :  { %v430_v27 = vpop.f32.mrf.mxu2  ;;  %v461_v28 = vpop.f32.mrf.mxu0 }
  0xbf   :  { %v466_v29 = vpop.f32.mrf.mxu1  ;;  %v462_v32 = vadd.f32 %v461_v28, %v443_v25  ;;  %v431_v35 = vadd.f32 %v430_v27, %v412_v31  ;;  %v449_v38 = vpop.f32.mrf.mxu3 }
  0xc0   :  { %v467_v33 = vadd.f32 %v466_v29, %v448_v26 }
  0xc1   :  { %v471_v36 = vmax.f32 %v462_v32, 0.0  ;;  %v450_v40 = vadd.f32 %v449_v38, %v431_v35 }
  0xc2   :  { %v473_v37 = vmax.f32 %v467_v33, 0.0 }
  0xc3   :  { %475 = vst.msk [vmem:[%s932_s3] sm:$0xff] %vm369_vm0, %v471_v36 }
  0xc4   :  { %477 = vst.msk [vmem:[%s932_s3 + $0x10] sm:$0xff] %vm369_vm0, %v473_v37 }
  0xc6   :  { %v463_v41 = vpop.f32.mrf.mxu0 }
  0xc7   :  { %v468_v42 = vpop.f32.mrf.mxu1  ;;  %v464_v43 = vadd.f32 %v463_v41, %v445_v39 }
  0xc8   :  { %v469_v44 = vadd.f32 %v468_v42, %v450_v40 }
  0xc9   :  { %v472_v45 = vmax.f32 %v464_v43, 0.0 }
  0xca   :  { %v474_v46 = vmax.f32 %v469_v44, 0.0 }
  0xcb   :  { %476 = vst.msk [vmem:[%s932_s3 + $0x8] sm:$0xff] %vm369_vm0, %v472_v45 }
  0xcc   :  { %478 = vst.msk [vmem:[%s932_s3 + $0x18] sm:$0xff] %vm369_vm0, %v474_v46 }

// kernel: xfeat_forward.31
= control target key start
LH: loop header
LB: loop body
LE: loop exit
PB: predicated region body
PF: predicated region fallthrough
CT: control target
= control target key end

     0   :  { %vm65_vm0 = vcmask 523264   ;;  %s199_s1 = inlined_call_operand.vmem [shape: bf16[64,64], index: 1, kind: input, shape index: {}]   ;;  %s200_s2 = inlined_call_operand.vmem [shape: f32[1,64], index: 2, kind: input, shape index: {}]   ;;  %s201_s0 = inlined_call_operand.vmem [shape: bf16[32,64], index: 0, kind: input, shape index: {}]   ;;  %s202_s3 = inlined_call_operand.vmem [shape: f32[32,64], index: 3, kind: output, shape index: {}]  }
   0x1   :  { %v134_v0 = vld [vmem:[%s199_s1 + $0x18] sm:$0xff]  ;;  %v133_v1 = vld [vmem:[%s199_s1 + $0x10] sm:$0xff]  ;;  %v132_v2 = vld [vmem:[%s199_s1 + $0x8] sm:$0xff] }
   0x2   :  { %76 = vmatpush.bf16.msra.mxu0 %v134_v0  ;;  %135 = vmatpush.bf16.msra.mxu1 %v134_v0  ;;  %v131_v3 = vld [vmem:[%s199_s1] sm:$0xff]  ;;  %v130_v5 = vld [vmem:[%s201_s0 + $0x8] sm:$0xff] }
   0x3   :  { %v129_v4 = vld [vmem:[%s201_s0] sm:$0xff] }
   0x4   :  { %v139_v6 = vld [vmem:[%s200_s2] ss:$0 sm:$0xff] }
   0x6   :  { %77 = vmatpush.bf16.msra.mxu0 %v133_v1  ;;  %136 = vmatpush.bf16.msra.mxu1 %v133_v1 }
   0xa   :  { %78 = vmatpush.bf16.msra.mxu0 %v132_v2  ;;  %137 = vmatpush.bf16.msra.mxu1 %v132_v2 }
   0xe   :  { %79 = vmatpush.bf16.msra.mxu0 %v131_v3  ;;  %138 = vmatpush.bf16.msra.mxu1 %v131_v3 }
  0x11   :  { %127 = vmatmul.msk.bf16.vlgmr.msra.gmra.mxu0 %vm65_vm0, %v129_v4  ;;  %128 = vmatmul.msk.bf16.vlgmr.msra.gmra.mxu1 %vm65_vm0, %v130_v5 }
  0x8e   :  { %v81_v7 = vpop.f32.mrf.mxu0  ;;  %v86_v8 = vpop.f32.mrf.mxu1 }
  0x8f   :  { %v82_v9 = vadd.f32 %v139_v6, %v81_v7  ;;  %v87_v10 = vadd.f32 %v139_v6, %v86_v8 }
  0x91   :  { %v91_v11 = vmax.f32 %v82_v9, 0.0  ;;  %v93_v12 = vmax.f32 %v87_v10, 0.0 }
  0x93   :  { %95 = vst.msk [vmem:[%s202_s3] sm:$0xff] %vm65_vm0, %v91_v11 }
  0x94   :  { %97 = vst.msk [vmem:[%s202_s3 + $0x10] sm:$0xff] %vm65_vm0, %v93_v12 }
  0x96   :  { %v83_v13 = vpop.f32.mrf.mxu0  ;;  %v88_v14 = vpop.f32.mrf.mxu1 }
  0x97   :  { %v84_v15 = vadd.f32 %v139_v6, %v83_v13  ;;  %v89_v16 = vadd.f32 %v139_v6, %v88_v14 }
  0x99   :  { %v92_v17 = vmax.f32 %v84_v15, 0.0  ;;  %v94_v18 = vmax.f32 %v89_v16, 0.0 }
  0x9b   :  { %96 = vst.msk [vmem:[%s202_s3 + $0x8] sm:$0xff] %vm65_vm0, %v92_v17 }
  0x9c   :  { %98 = vst.msk [vmem:[%s202_s3 + $0x18] sm:$0xff] %vm65_vm0, %v94_v18 }

// kernel: xfeat_forward.32
= control target key start
LH: loop header
LB: loop body
LE: loop exit
PB: predicated region body
PF: predicated region fallthrough
CT: control target
= control target key end

     0   :  { %vm327_vm0 = vcmask 523264   ;;  %s729_s1 = inlined_call_operand.vmem [shape: bf16[576,64], index: 1, kind: input, shape index: {}]   ;;  %s730_s2 = inlined_call_operand.vmem [shape: f32[1,64], index: 2, kind: input, shape index: {}]   ;;  %s731_s0 = inlined_call_operand.vmem [shape: bf16[8,576], index: 0, kind: input, shape index: {}]   ;;  %s732_s3 = inlined_call_operand.vmem [shape: f32[8,64], index: 3, kind: output, shape index: {}]  }
   0x1   :  { %v554_v0 = vld [vmem:[%s729_s1 + $0x38] sm:$0xff]  ;;  %v553_v4 = vld [vmem:[%s729_s1 + $0x30] sm:$0xff]  ;;  %v552_v8 = vld [vmem:[%s729_s1 + $0x28] sm:$0xff] }
   0x2   :  { %v570_v1 = vld [vmem:[%s729_s1 + $0xb8] sm:$0xff]  ;;  %331 = vmatpush.bf16.msra.mxu0 %v554_v0  ;;  %v569_v5 = vld [vmem:[%s729_s1 + $0xb0] sm:$0xff]  ;;  %v568_v9 = vld [vmem:[%s729_s1 + $0xa8] sm:$0xff] }
   0x3   :  { %v562_v2 = vld [vmem:[%s729_s1 + $0x78] sm:$0xff]  ;;  %357 = vmatpush.bf16.msra.mxu2 %v570_v1  ;;  %v561_v6 = vld [vmem:[%s729_s1 + $0x70] sm:$0xff]  ;;  %v560_v10 = vld [vmem:[%s729_s1 + $0x68] sm:$0xff] }
   0x4   :  { %v578_v3 = vld [vmem:[%s729_s1 + $0xf8] sm:$0xff]  ;;  %344 = vmatpush.bf16.msra.mxu1 %v562_v2  ;;  %v577_v7 = vld [vmem:[%s729_s1 + $0xf0] sm:$0xff]  ;;  %v576_v11 = vld [vmem:[%s729_s1 + $0xe8] sm:$0xff] }
   0x5   :  { %370 = vmatpush.bf16.msra.mxu3 %v578_v3  ;;  %v551_v12 = vld [vmem:[%s729_s1 + $0x20] sm:$0xff]  ;;  %v550_v16 = vld [vmem:[%s729_s1 + $0x18] sm:$0xff]  ;;  %v549_v20 = vld [vmem:[%s729_s1 + $0x10] sm:$0xff] }
   0x6   :  { %332 = vmatpush.bf16.msra.mxu0 %v553_v4  ;;  %v567_v13 = vld [vmem:[%s729_s1 + $0xa0] sm:$0xff]  ;;  %v566_v17 = vld [vmem:[%s729_s1 + $0x98] sm:$0xff]  ;;  %v565_v21 = vld [vmem:[%s729_s1 + $0x90] sm:$0xff] }
   0x7   :  { %358 = vmatpush.bf16.msra.mxu2 %v569_v5  ;;  %v559_v14 = vld [vmem:[%s729_s1 + $0x60] sm:$0xff]  ;;  %v558_v18 = vld [vmem:[%s729_s1 + $0x58] sm:$0xff]  ;;  %v557_v22 = vld [vmem:[%s729_s1 + $0x50] sm:$0xff] }
   0x8   :  { %345 = vmatpush.bf16.msra.mxu1 %v561_v6  ;;  %v575_v15 = vld [vmem:[%s729_s1 + $0xe0] sm:$0xff]  ;;  %v574_v19 = vld [vmem:[%s729_s1 + $0xd8] sm:$0xff]  ;;  %v573_v23 = vld [vmem:[%s729_s1 + $0xd0] sm:$0xff] }
   0x9   :  { %371 = vmatpush.bf16.msra.mxu3 %v577_v7  ;;  %v548_v24 = vld [vmem:[%s729_s1 + $0x8] sm:$0xff]  ;;  %v15_v26 = vld [vmem:[%s731_s0] sm:$0xff]  ;;  %v582_v38 = vld [vmem:[%s729_s1 + $0x118] sm:$0xff] }
   0xa   :  { %333 = vmatpush.bf16.msra.mxu0 %v552_v8  ;;  %v564_v25 = vld [vmem:[%s729_s1 + $0x88] sm:$0xff]  ;;  %v97_v30 = vunpack.c.l.b16 %v15_v26  ;;  %v547_v32 = vld [vmem:[%s729_s1] sm:$0xff]  ;;  %v98_v34 = vunpack.c.h.b16 %v15_v26  ;;  %v581_v43 = vld [vmem:[%s729_s1 + $0x110] sm:$0xff] }
   0xb   :  { %359 = vmatpush.bf16.msra.mxu2 %v568_v9  ;;  %v16_v27 = vld [vmem:[%s731_s0 + $0x8] sm:$0xff]  ;;  %v563_v33 = vld [vmem:[%s729_s1 + $0x80] sm:$0xff]  ;;  %v17_v45 = vld [vmem:[%s731_s0 + $0x10] sm:$0xf] }
   0xc   :  { %346 = vmatpush.bf16.msra.mxu1 %v560_v10  ;;  %v556_v28 = vld [vmem:[%s729_s1 + $0x48] sm:$0xff]  ;;  %v99_v31 = vunpack.c.l.b16 %v16_v27  ;;  %v100_v35 = vunpack.c.h.b16 %v16_v27  ;;  %v555_v36 = vld [vmem:[%s729_s1 + $0x40] sm:$0xff]  ;;  %v102_v39 = vpack.c.b16 %v97_v30, %v97_v30  ;;  %v103_v41 = vpack.c.b16 %v98_v34, %v98_v34 }
   0xd   :  { %372 = vmatpush.bf16.msra.mxu3 %v576_v11  ;;  %v572_v29 = vld [vmem:[%s729_s1 + $0xc8] sm:$0xff]  ;;  %v571_v37 = vld [vmem:[%s729_s1 + $0xc0] sm:$0xff]  ;;  %v101_v47 = vunpack.c.l.b16 %v17_v45 }
   0xe   :  { %334 = vmatpush.bf16.msra.mxu0 %v551_v12  ;;  %v104_v40 = vpack.c.b16 %v99_v31, %v99_v31  ;;  %v105_v42 = vpack.c.b16 %v100_v35, %v100_v35  ;;  %v580_v44 = vld [vmem:[%s729_s1 + $0x108] sm:$0xff]  ;;  %v579_v46 = vld [vmem:[%s729_s1 + $0x100] sm:$0xff] }
   0xf   :  { %360 = vmatpush.bf16.msra.mxu2 %v567_v13  ;;  %v106_v48 = vpack.c.b16 %v101_v47, %v101_v47  ;;  %v583_v50 = vld [vmem:[%s730_s2] ss:$0 sm:$0xff] }
  0x10   :  { %347 = vmatpush.bf16.msra.mxu1 %v559_v14 }
  0x11   :  { %373 = vmatpush.bf16.msra.mxu3 %v575_v15 }
  0x12   :  { %335 = vmatpush.bf16.msra.mxu0 %v550_v16 }
  0x13   :  { %361 = vmatpush.bf16.msra.mxu2 %v566_v17 }
  0x14   :  { %348 = vmatpush.bf16.msra.mxu1 %v558_v18 }
  0x15   :  { %374 = vmatpush.bf16.msra.mxu3 %v574_v19 }
  0x16   :  { %336 = vmatpush.bf16.msra.mxu0 %v549_v20 }
  0x17   :  { %362 = vmatpush.bf16.msra.mxu2 %v565_v21 }
  0x18   :  { %349 = vmatpush.bf16.msra.mxu1 %v557_v22 }
  0x19   :  { %375 = vmatpush.bf16.msra.mxu3 %v573_v23 }
  0x1a   :  { %337 = vmatpush.bf16.msra.mxu0 %v548_v24 }
  0x1b   :  { %363 = vmatpush.bf16.msra.mxu2 %v564_v25 }
  0x1c   :  { %350 = vmatpush.bf16.msra.mxu1 %v556_v28 }
  0x1d   :  { %376 = vmatpush.bf16.msra.mxu3 %v572_v29 }
  0x1e   :  { %338 = vmatpush.bf16.msra.mxu0 %v547_v32 }
  0x1f   :  { %364 = vmatpush.bf16.msra.mxu2 %v563_v33 }
  0x20   :  { %351 = vmatpush.bf16.msra.mxu1 %v555_v36 }
  0x21   :  { %377 = vmatpush.bf16.msra.mxu3 %v571_v37  ;;  %339 = vmatmul.bf16.vlgmr.msra.gmra.mxu0 %v102_v39 }
  0x22   :  { %387 = vmatpush.bf16.msrb.mxu0 %v582_v38  ;;  %365 = vmatmul.bf16.vlgmr.msra.gmra.mxu2 %v104_v40 }
  0x23   :  { %352 = vmatmul.bf16.vlgmr.msra.gmra.mxu1 %v103_v41 }
  0x24   :  { %378 = vmatmul.bf16.vlgmr.msra.gmra.mxu3 %v105_v42 }
  0x26   :  { %388 = vmatpush.bf16.msrb.mxu0 %v581_v43 }
  0x2a   :  { %389 = vmatpush.bf16.msrb.mxu0 %v580_v44 }
  0x2e   :  { %390 = vmatpush.bf16.msrb.mxu0 %v579_v46 }
  0x31   :  { %546 = vmatmul.msk.bf16.vlgmr.msrb.gmra.mxu0 %vm327_vm0, %v106_v48 }
  0x9e   :  { %v340_v49 = vpop.f32.mrf.mxu0 }
  0x9f   :  { %v341_v52 = vadd.f32 %v583_v50, %v340_v49 }
  0xa0   :  { %v353_v51 = vpop.f32.mrf.mxu1 }
  0xa1   :  { %v354_v56 = vadd.f32 %v353_v51, %v341_v52 }
  0xa5   :  { %v366_v53 = vpop.f32.mrf.mxu2 }
  0xa6   :  { %v342_v55 = vpop.f32.mrf.mxu0  ;;  %v367_v58 = vadd.f32 %v366_v53, %v354_v56 }
  0xa7   :  { %v379_v54 = vpop.f32.mrf.mxu3 }
  0xa8   :  { %v355_v57 = vpop.f32.mrf.mxu1  ;;  %v380_v60 = vadd.f32 %v379_v54, %v367_v58 }
  0xad   :  { %v368_v59 = vpop.f32.mrf.mxu2 }
  0xae   :  { %v392_v62 = vpop.f32.mrf.mxu0 }
  0xaf   :  { %v381_v61 = vpop.f32.mrf.mxu3  ;;  %v393_v63 = vadd.f32 %v392_v62, %v380_v60 }
  0xb1   :  { %v396_v0 = vmax.f32 %v393_v63, 0.0 }
  0xb3   :  { %397 = vst.msk [vmem:[%s732_s3] sm:$0xff] %vm327_vm0, %v396_v0 }
  0xb6   :  { %v394_v1 = vpop.f32.mrf.mxu0 }

// kernel: xfeat_forward.35
= control target key start
LH: loop header
LB: loop body
LE: loop exit
PB: predicated region body
PF: predicated region fallthrough
CT: control target
= control target key end

     0   :  { %vm327_vm0 = vcmask 523264   ;;  %s727_s1 = inlined_call_operand.vmem [shape: bf16[576,128], index: 1, kind: input, shape index: {}]   ;;  %s728_s2 = inlined_call_operand.vmem [shape: f32[1,128], index: 2, kind: input, shape index: {}]   ;;  %s729_s0 = inlined_call_operand.vmem [shape: bf16[8,576], index: 0, kind: input, shape index: {}]   ;;  %s730_s3 = inlined_call_operand.vmem [shape: f32[8,128], index: 3, kind: output, shape index: {}]  }
   0x1   :  { %v554_v0 = vld [vmem:[%s727_s1 + $0x38] sm:$0xff]  ;;  %v553_v4 = vld [vmem:[%s727_s1 + $0x30] sm:$0xff]  ;;  %v552_v8 = vld [vmem:[%s727_s1 + $0x28] sm:$0xff] }
   0x2   :  { %v570_v1 = vld [vmem:[%s727_s1 + $0xb8] sm:$0xff]  ;;  %331 = vmatpush.bf16.msra.mxu0 %v554_v0  ;;  %v569_v5 = vld [vmem:[%s727_s1 + $0xb0] sm:$0xff]  ;;  %v568_v9 = vld [vmem:[%s727_s1 + $0xa8] sm:$0xff] }
   0x3   :  { %v562_v2 = vld [vmem:[%s727_s1 + $0x78] sm:$0xff]  ;;  %357 = vmatpush.bf16.msra.mxu2 %v570_v1  ;;  %v561_v6 = vld [vmem:[%s727_s1 + $0x70] sm:$0xff]  ;;  %v560_v10 = vld [vmem:[%s727_s1 + $0x68] sm:$0xff] }
   0x4   :  { %v578_v3 = vld [vmem:[%s727_s1 + $0xf8] sm:$0xff]  ;;  %344 = vmatpush.bf16.msra.mxu1 %v562_v2  ;;  %v577_v7 = vld [vmem:[%s727_s1 + $0xf0] sm:$0xff]  ;;  %v576_v11 = vld [vmem:[%s727_s1 + $0xe8] sm:$0xff] }
   0x5   :  { %370 = vmatpush.bf16.msra.mxu3 %v578_v3  ;;  %v551_v12 = vld [vmem:[%s727_s1 + $0x20] sm:$0xff]  ;;  %v550_v16 = vld [vmem:[%s727_s1 + $0x18] sm:$0xff]  ;;  %v549_v20 = vld [vmem:[%s727_s1 + $0x10] sm:$0xff] }
   0x6   :  { %332 = vmatpush.bf16.msra.mxu0 %v553_v4  ;;  %v567_v13 = vld [vmem:[%s727_s1 + $0xa0] sm:$0xff]  ;;  %v566_v17 = vld [vmem:[%s727_s1 + $0x98] sm:$0xff]  ;;  %v565_v21 = vld [vmem:[%s727_s1 + $0x90] sm:$0xff] }
   0x7   :  { %358 = vmatpush.bf16.msra.mxu2 %v569_v5  ;;  %v559_v14 = vld [vmem:[%s727_s1 + $0x60] sm:$0xff]  ;;  %v558_v18 = vld [vmem:[%s727_s1 + $0x58] sm:$0xff]  ;;  %v557_v22 = vld [vmem:[%s727_s1 + $0x50] sm:$0xff] }
   0x8   :  { %345 = vmatpush.bf16.msra.mxu1 %v561_v6  ;;  %v575_v15 = vld [vmem:[%s727_s1 + $0xe0] sm:$0xff]  ;;  %v574_v19 = vld [vmem:[%s727_s1 + $0xd8] sm:$0xff]  ;;  %v573_v23 = vld [vmem:[%s727_s1 + $0xd0] sm:$0xff] }
   0x9   :  { %371 = vmatpush.bf16.msra.mxu3 %v577_v7  ;;  %v548_v24 = vld [vmem:[%s727_s1 + $0x8] sm:$0xff]  ;;  %v15_v26 = vld [vmem:[%s729_s0] sm:$0xff]  ;;  %v582_v38 = vld [vmem:[%s727_s1 + $0x118] sm:$0xff] }
   0xa   :  { %333 = vmatpush.bf16.msra.mxu0 %v552_v8  ;;  %v564_v25 = vld [vmem:[%s727_s1 + $0x88] sm:$0xff]  ;;  %v97_v30 = vunpack.c.l.b16 %v15_v26  ;;  %v547_v32 = vld [vmem:[%s727_s1] sm:$0xff]  ;;  %v98_v34 = vunpack.c.h.b16 %v15_v26  ;;  %v581_v43 = vld [vmem:[%s727_s1 + $0x110] sm:$0xff] }
   0xb   :  { %359 = vmatpush.bf16.msra.mxu2 %v568_v9  ;;  %v16_v27 = vld [vmem:[%s729_s0 + $0x8] sm:$0xff]  ;;  %v563_v33 = vld [vmem:[%s727_s1 + $0x80] sm:$0xff]  ;;  %v17_v45 = vld [vmem:[%s729_s0 + $0x10] sm:$0xf] }
   0xc   :  { %346 = vmatpush.bf16.msra.mxu1 %v560_v10  ;;  %v556_v28 = vld [vmem:[%s727_s1 + $0x48] sm:$0xff]  ;;  %v99_v31 = vunpack.c.l.b16 %v16_v27  ;;  %v100_v35 = vunpack.c.h.b16 %v16_v27  ;;  %v555_v36 = vld [vmem:[%s727_s1 + $0x40] sm:$0xff]  ;;  %v102_v39 = vpack.c.b16 %v97_v30, %v97_v30  ;;  %v103_v41 = vpack.c.b16 %v98_v34, %v98_v34 }
   0xd   :  { %372 = vmatpush.bf16.msra.mxu3 %v576_v11  ;;  %v572_v29 = vld [vmem:[%s727_s1 + $0xc8] sm:$0xff]  ;;  %v571_v37 = vld [vmem:[%s727_s1 + $0xc0] sm:$0xff]  ;;  %v101_v47 = vunpack.c.l.b16 %v17_v45 }
   0xe   :  { %334 = vmatpush.bf16.msra.mxu0 %v551_v12  ;;  %v104_v40 = vpack.c.b16 %v99_v31, %v99_v31  ;;  %v105_v42 = vpack.c.b16 %v100_v35, %v100_v35  ;;  %v580_v44 = vld [vmem:[%s727_s1 + $0x108] sm:$0xff]  ;;  %v579_v46 = vld [vmem:[%s727_s1 + $0x100] sm:$0xff] }
   0xf   :  { %360 = vmatpush.bf16.msra.mxu2 %v567_v13  ;;  %v106_v48 = vpack.c.b16 %v101_v47, %v101_v47  ;;  %v583_v50 = vld [vmem:[%s728_s2] ss:$0 sm:$0xff] }
  0x10   :  { %347 = vmatpush.bf16.msra.mxu1 %v559_v14 }
  0x11   :  { %373 = vmatpush.bf16.msra.mxu3 %v575_v15 }
  0x12   :  { %335 = vmatpush.bf16.msra.mxu0 %v550_v16 }
  0x13   :  { %361 = vmatpush.bf16.msra.mxu2 %v566_v17 }
  0x14   :  { %348 = vmatpush.bf16.msra.mxu1 %v558_v18 }
  0x15   :  { %374 = vmatpush.bf16.msra.mxu3 %v574_v19 }
  0x16   :  { %336 = vmatpush.bf16.msra.mxu0 %v549_v20 }
  0x17   :  { %362 = vmatpush.bf16.msra.mxu2 %v565_v21 }
  0x18   :  { %349 = vmatpush.bf16.msra.mxu1 %v557_v22 }
  0x19   :  { %375 = vmatpush.bf16.msra.mxu3 %v573_v23 }
  0x1a   :  { %337 = vmatpush.bf16.msra.mxu0 %v548_v24 }
  0x1b   :  { %363 = vmatpush.bf16.msra.mxu2 %v564_v25 }
  0x1c   :  { %350 = vmatpush.bf16.msra.mxu1 %v556_v28 }
  0x1d   :  { %376 = vmatpush.bf16.msra.mxu3 %v572_v29 }
  0x1e   :  { %338 = vmatpush.bf16.msra.mxu0 %v547_v32 }
  0x1f   :  { %364 = vmatpush.bf16.msra.mxu2 %v563_v33 }
  0x20   :  { %351 = vmatpush.bf16.msra.mxu1 %v555_v36 }
  0x21   :  { %377 = vmatpush.bf16.msra.mxu3 %v571_v37  ;;  %339 = vmatmul.bf16.vlgmr.msra.gmra.mxu0 %v102_v39 }
  0x22   :  { %387 = vmatpush.bf16.msrb.mxu0 %v582_v38  ;;  %365 = vmatmul.bf16.vlgmr.msra.gmra.mxu2 %v104_v40 }
  0x23   :  { %352 = vmatmul.bf16.vlgmr.msra.gmra.mxu1 %v103_v41 }
  0x24   :  { %378 = vmatmul.bf16.vlgmr.msra.gmra.mxu3 %v105_v42 }
  0x26   :  { %388 = vmatpush.bf16.msrb.mxu0 %v581_v43 }
  0x2a   :  { %389 = vmatpush.bf16.msrb.mxu0 %v580_v44 }
  0x2e   :  { %390 = vmatpush.bf16.msrb.mxu0 %v579_v46 }
  0x31   :  { %546 = vmatmul.msk.bf16.vlgmr.msrb.gmra.mxu0 %vm327_vm0, %v106_v48 }
  0x9e   :  { %v340_v49 = vpop.f32.mrf.mxu0 }
  0x9f   :  { %v341_v52 = vadd.f32 %v583_v50, %v340_v49 }
  0xa0   :  { %v353_v51 = vpop.f32.mrf.mxu1 }
  0xa1   :  { %v354_v56 = vadd.f32 %v353_v51, %v341_v52 }
  0xa5   :  { %v366_v53 = vpop.f32.mrf.mxu2 }
  0xa6   :  { %v342_v55 = vpop.f32.mrf.mxu0  ;;  %v367_v58 = vadd.f32 %v366_v53, %v354_v56 }
  0xa7   :  { %v379_v54 = vpop.f32.mrf.mxu3 }
  0xa8   :  { %v355_v57 = vpop.f32.mrf.mxu1  ;;  %v380_v60 = vadd.f32 %v379_v54, %v367_v58 }
  0xad   :  { %v368_v59 = vpop.f32.mrf.mxu2 }
  0xae   :  { %v392_v62 = vpop.f32.mrf.mxu0 }
  0xaf   :  { %v381_v61 = vpop.f32.mrf.mxu3  ;;  %v393_v63 = vadd.f32 %v392_v62, %v380_v60 }
  0xb1   :  { %v396_v0 = vmax.f32 %v393_v63, 0.0 }
  0xb3   :  { %397 = vst [vmem:[%s730_s3] sm:$0xff] %v396_v0 }
  0xb6   :  { %v394_v1 = vpop.f32.mrf.mxu0 }

// kernel: xfeat_forward.36
= control target key start
LH: loop header
LB: loop body
LE: loop exit
PB: predicated region body
PF: predicated region fallthrough
CT: control target
= control target key end

     0   :  { %s1372_s1 = inlined_call_operand.vmem [shape: bf16[1152,128], index: 1, kind: input, shape index: {}]   ;;  %s1373_s2 = inlined_call_operand.vmem [shape: f32[1,128], index: 2, kind: input, shape index: {}]   ;;  %s1374_s0 = inlined_call_operand.vmem [shape: bf16[8,1152], index: 0, kind: input, shape index: {}]   ;;  %s1375_s3 = inlined_call_operand.vmem [shape: f32[8,128], index: 3, kind: output, shape index: {}]  }
   0x1   :  { %v1049_v0 = vld [vmem:[%s1372_s1 + $0x38] sm:$0xff]  ;;  %v1048_v4 = vld [vmem:[%s1372_s1 + $0x30] sm:$0xff]  ;;  %v1047_v8 = vld [vmem:[%s1372_s1 + $0x28] sm:$0xff] }
   0x2   :  { %v1065_v1 = vld [vmem:[%s1372_s1 + $0xb8] sm:$0xff]  ;;  %631 = vmatpush.bf16.msra.mxu0 %v1049_v0  ;;  %v1064_v5 = vld [vmem:[%s1372_s1 + $0xb0] sm:$0xff]  ;;  %v1063_v9 = vld [vmem:[%s1372_s1 + $0xa8] sm:$0xff] }
   0x3   :  { %v1073_v2 = vld [vmem:[%s1372_s1 + $0xf8] sm:$0xff]  ;;  %657 = vmatpush.bf16.msra.mxu2 %v1065_v1  ;;  %v1072_v6 = vld [vmem:[%s1372_s1 + $0xf0] sm:$0xff]  ;;  %v1071_v10 = vld [vmem:[%s1372_s1 + $0xe8] sm:$0xff] }
   0x4   :  { %v1057_v3 = vld [vmem:[%s1372_s1 + $0x78] sm:$0xff]  ;;  %670 = vmatpush.bf16.msra.mxu3 %v1073_v2  ;;  %v1056_v7 = vld [vmem:[%s1372_s1 + $0x70] sm:$0xff]  ;;  %v1055_v11 = vld [vmem:[%s1372_s1 + $0x68] sm:$0xff] }
   0x5   :  { %644 = vmatpush.bf16.msra.mxu1 %v1057_v3  ;;  %v1046_v12 = vld [vmem:[%s1372_s1 + $0x20] sm:$0xff]  ;;  %v1045_v16 = vld [vmem:[%s1372_s1 + $0x18] sm:$0xff]  ;;  %v1044_v20 = vld [vmem:[%s1372_s1 + $0x10] sm:$0xff] }
   0x6   :  { %632 = vmatpush.bf16.msra.mxu0 %v1048_v4  ;;  %v1062_v13 = vld [vmem:[%s1372_s1 + $0xa0] sm:$0xff]  ;;  %v1061_v17 = vld [vmem:[%s1372_s1 + $0x98] sm:$0xff]  ;;  %v1060_v21 = vld [vmem:[%s1372_s1 + $0x90] sm:$0xff] }
   0x7   :  { %658 = vmatpush.bf16.msra.mxu2 %v1064_v5  ;;  %v1070_v14 = vld [vmem:[%s1372_s1 + $0xe0] sm:$0xff]  ;;  %v1069_v18 = vld [vmem:[%s1372_s1 + $0xd8] sm:$0xff]  ;;  %v1068_v22 = vld [vmem:[%s1372_s1 + $0xd0] sm:$0xff] }
   0x8   :  { %671 = vmatpush.bf16.msra.mxu3 %v1072_v6  ;;  %v1054_v15 = vld [vmem:[%s1372_s1 + $0x60] sm:$0xff]  ;;  %v1053_v19 = vld [vmem:[%s1372_s1 + $0x58] sm:$0xff]  ;;  %v1052_v23 = vld [vmem:[%s1372_s1 + $0x50] sm:$0xff] }
   0x9   :  { %645 = vmatpush.bf16.msra.mxu1 %v1056_v7  ;;  %v1043_v24 = vld [vmem:[%s1372_s1 + $0x8] sm:$0xff]  ;;  %v14_v29 = vld [vmem:[%s1374_s0] sm:$0xff]  ;;  %v1081_v34 = vld [vmem:[%s1372_s1 + $0x138] sm:$0xff] }
   0xa   :  { %633 = vmatpush.bf16.msra.mxu0 %v1047_v8  ;;  %v1059_v25 = vld [vmem:[%s1372_s1 + $0x88] sm:$0xff]  ;;  %v1042_v30 = vld [vmem:[%s1372_s1] sm:$0xff]  ;;  %v172_v33 = vunpack.c.l.b16 %v14_v29  ;;  %v1097_v35 = vld [vmem:[%s1372_s1 + $0x1b8] sm:$0xff]  ;;  %v173_v39 = vunpack.c.h.b16 %v14_v29 }
   0xb   :  { %659 = vmatpush.bf16.msra.mxu2 %v1063_v9  ;;  %v1067_v26 = vld [vmem:[%s1372_s1 + $0xc8] sm:$0xff]  ;;  %v1058_v31 = vld [vmem:[%s1372_s1 + $0x80] sm:$0xff]  ;;  %v1105_v40 = vld [vmem:[%s1372_s1 + $0x1f8] sm:$0xff] }
   0xc   :  { %672 = vmatpush.bf16.msra.mxu3 %v1071_v10  ;;  %v1051_v27 = vld [vmem:[%s1372_s1 + $0x48] sm:$0xff]  ;;  %v1066_v36 = vld [vmem:[%s1372_s1 + $0xc0] sm:$0xff]  ;;  %v1089_v41 = vld [vmem:[%s1372_s1 + $0x178] sm:$0xff]  ;;  %v181_v43 = vpack.c.b16 %v172_v33, %v172_v33  ;;  %v182_v47 = vpack.c.b16 %v173_v39, %v173_v39 }
   0xd   :  { %646 = vmatpush.bf16.msra.mxu1 %v1055_v11  ;;  %v15_v28 = vld [vmem:[%s1374_s0 + $0x8] sm:$0xff]  ;;  %v1050_v37 = vld [vmem:[%s1372_s1 + $0x40] sm:$0xff]  ;;  %v1080_v44 = vld [vmem:[%s1372_s1 + $0x130] sm:$0xff] }
   0xe   :  { %634 = vmatpush.bf16.msra.mxu0 %v1046_v12  ;;  %v174_v32 = vunpack.c.l.b16 %v15_v28  ;;  %v175_v38 = vunpack.c.h.b16 %v15_v28  ;;  %v1096_v45 = vld [vmem:[%s1372_s1 + $0x1b0] sm:$0xff]  ;;  %v1079_v50 = vld [vmem:[%s1372_s1 + $0x128] sm:$0xff]  ;;  %v1078_v54 = vld [vmem:[%s1372_s1 + $0x120] sm:$0xff] }
   0xf   :  { %660 = vmatpush.bf16.msra.mxu2 %v1062_v13  ;;  %v1104_v48 = vld [vmem:[%s1372_s1 + $0x1f0] sm:$0xff]  ;;  %v1095_v51 = vld [vmem:[%s1372_s1 + $0x1a8] sm:$0xff]  ;;  %v1094_v55 = vld [vmem:[%s1372_s1 + $0x1a0] sm:$0xff] }
  0x10   :  { %673 = vmatpush.bf16.msra.mxu3 %v1070_v14  ;;  %v183_v42 = vpack.c.b16 %v174_v32, %v174_v32  ;;  %v184_v46 = vpack.c.b16 %v175_v38, %v175_v38  ;;  %v1088_v49 = vld [vmem:[%s1372_s1 + $0x170] sm:$0xff]  ;;  %v1103_v52 = vld [vmem:[%s1372_s1 + $0x1e8] sm:$0xff]  ;;  %v1102_v56 = vld [vmem:[%s1372_s1 + $0x1e0] sm:$0xff] }
  0x11   :  { %647 = vmatpush.bf16.msra.mxu1 %v1054_v15  ;;  %v1087_v53 = vld [vmem:[%s1372_s1 + $0x168] sm:$0xff]  ;;  %v1086_v57 = vld [vmem:[%s1372_s1 + $0x160] sm:$0xff]  ;;  %v1077_v58 = vld [vmem:[%s1372_s1 + $0x118] sm:$0xff] }
  0x12   :  { %635 = vmatpush.bf16.msra.mxu0 %v1045_v16  ;;  %v1093_v59 = vld [vmem:[%s1372_s1 + $0x198] sm:$0xff]  ;;  %v1076_v62 = vld [vmem:[%s1372_s1 + $0x110] sm:$0xff]  ;;  %v1075_v2 = vld [vmem:[%s1372_s1 + $0x108] sm:$0xff] }
  0x13   :  { %661 = vmatpush.bf16.msra.mxu2 %v1061_v17  ;;  %v1101_v60 = vld [vmem:[%s1372_s1 + $0x1d8] sm:$0xff]  ;;  %v1092_v63 = vld [vmem:[%s1372_s1 + $0x190] sm:$0xff]  ;;  %v1091_v3 = vld [vmem:[%s1372_s1 + $0x188] sm:$0xff] }
  0x14   :  { %674 = vmatpush.bf16.msra.mxu3 %v1069_v18  ;;  %v1085_v61 = vld [vmem:[%s1372_s1 + $0x158] sm:$0xff]  ;;  %v1100_v0 = vld [vmem:[%s1372_s1 + $0x1d0] sm:$0xff]  ;;  %v1099_v6 = vld [vmem:[%s1372_s1 + $0x1c8] sm:$0xff] }
  0x15   :  { %648 = vmatpush.bf16.msra.mxu1 %v1053_v19  ;;  %v1084_v1 = vld [vmem:[%s1372_s1 + $0x150] sm:$0xff]  ;;  %v17_v4 = vld [vmem:[%s1374_s0 + $0x18] sm:$0xff]  ;;  %v1083_v7 = vld [vmem:[%s1372_s1 + $0x148] sm:$0xff] }
  0x16   :  { %636 = vmatpush.bf16.msra.mxu0 %v1044_v20  ;;  %v16_v5 = vld [vmem:[%s1374_s0 + $0x10] sm:$0xff]  ;;  %v178_v8 = vunpack.c.l.b16 %v17_v4  ;;  %v1074_v10 = vld [vmem:[%s1372_s1 + $0x100] sm:$0xff]  ;;  %v1113_v12 = vld [vmem:[%s1372_s1 + $0x238] sm:$0xff]  ;;  %v179_v13 = vunpack.c.h.b16 %v17_v4 }
  0x17   :  { %662 = vmatpush.bf16.msra.mxu2 %v1060_v21  ;;  %v176_v9 = vunpack.c.l.b16 %v16_v5  ;;  %v1090_v11 = vld [vmem:[%s1372_s1 + $0x180] sm:$0xff]  ;;  %v177_v16 = vunpack.c.h.b16 %v16_v5  ;;  %v1112_v19 = vld [vmem:[%s1372_s1 + $0x230] sm:$0xff] }
  0x18   :  { %675 = vmatpush.bf16.msra.mxu3 %v1068_v22  ;;  %v1098_v14 = vld [vmem:[%s1372_s1 + $0x1c0] sm:$0xff]  ;;  %v187_v17 = vpack.c.b16 %v178_v8, %v178_v8  ;;  %v188_v20 = vpack.c.b16 %v179_v13, %v179_v13  ;;  %v1111_v22 = vld [vmem:[%s1372_s1 + $0x228] sm:$0xff] }
  0x19   :  { %649 = vmatpush.bf16.msra.mxu1 %v1052_v23  ;;  %v1082_v15 = vld [vmem:[%s1372_s1 + $0x140] sm:$0xff]  ;;  %v185_v18 = vpack.c.b16 %v176_v9, %v176_v9  ;;  %v186_v21 = vpack.c.b16 %v177_v16, %v177_v16 }
  0x1a   :  { %637 = vmatpush.bf16.msra.mxu0 %v1043_v24  ;;  %v1110_v23 = vld [vmem:[%s1372_s1 + $0x220] sm:$0xff]  ;;  %v1109_v24 = vld [vmem:[%s1372_s1 + $0x218] sm:$0xff] }
  0x1b   :  { %663 = vmatpush.bf16.msra.mxu2 %v1059_v25  ;;  %v1108_v25 = vld [vmem:[%s1372_s1 + $0x210] sm:$0xff]  ;;  %v1106_v29 = vld [vmem:[%s1372_s1 + $0x200] sm:$0xff] }
  0x1c   :  { %676 = vmatpush.bf16.msra.mxu3 %v1067_v26  ;;  %v1107_v26 = vld [vmem:[%s1372_s1 + $0x208] sm:$0xff]  ;;  %v1114_v39 = vld [vmem:[%s1373_s2] ss:$0 sm:$0xff] }
  0x1d   :  { %650 = vmatpush.bf16.msra.mxu1 %v1051_v27  ;;  %v18_v27 = vld [vmem:[%s1374_s0 + $0x20] sm:$0xf] }
  0x1e   :  { %638 = vmatpush.bf16.msra.mxu0 %v1042_v30  ;;  %v180_v28 = vunpack.c.l.b16 %v18_v27 }
  0x1f   :  { %664 = vmatpush.bf16.msra.mxu2 %v1058_v31 }
  0x20   :  { %677 = vmatpush.bf16.msra.mxu3 %v1066_v36  ;;  %v189_v30 = vpack.c.b16 %v180_v28, %v180_v28 }
  0x21   :  { %651 = vmatpush.bf16.msra.mxu1 %v1050_v37  ;;  %639 = vmatmul.bf16.vlgmr.msra.gmra.mxu0 %v181_v43 }
  0x22   :  { %683 = vmatpush.bf16.msrb.mxu0 %v1081_v34  ;;  %665 = vmatmul.bf16.vlgmr.msra.gmra.mxu2 %v183_v42 }
  0x23   :  { %709 = vmatpush.bf16.msrb.mxu2 %v1097_v35  ;;  %678 = vmatmul.bf16.vlgmr.msra.gmra.mxu3 %v184_v46 }
  0x24   :  { %722 = vmatpush.bf16.msrb.mxu3 %v1105_v40  ;;  %652 = vmatmul.bf16.vlgmr.msra.gmra.mxu1 %v182_v47 }
  0x25   :  { %696 = vmatpush.bf16.msrb.mxu1 %v1089_v41 }
  0x26   :  { %684 = vmatpush.bf16.msrb.mxu0 %v1080_v44 }
  0x27   :  { %710 = vmatpush.bf16.msrb.mxu2 %v1096_v45 }
  0x28   :  { %723 = vmatpush.bf16.msrb.mxu3 %v1104_v48 }
  0x29   :  { %697 = vmatpush.bf16.msrb.mxu1 %v1088_v49 }
  0x2a   :  { %685 = vmatpush.bf16.msrb.mxu0 %v1079_v50 }
  0x2b   :  { %711 = vmatpush.bf16.msrb.mxu2 %v1095_v51 }
  0x2c   :  { %724 = vmatpush.bf16.msrb.mxu3 %v1103_v52 }
  0x2d   :  { %698 = vmatpush.bf16.msrb.mxu1 %v1087_v53 }
  0x2e   :  { %686 = vmatpush.bf16.msrb.mxu0 %v1078_v54 }
  0x2f   :  { %712 = vmatpush.bf16.msrb.mxu2 %v1094_v55 }
  0x30   :  { %725 = vmatpush.bf16.msrb.mxu3 %v1102_v56 }
  0x31   :  { %699 = vmatpush.bf16.msrb.mxu1 %v1086_v57 }
  0x32   :  { %687 = vmatpush.bf16.msrb.mxu0 %v1077_v58 }
  0x33   :  { %713 = vmatpush.bf16.msrb.mxu2 %v1093_v59 }
  0x34   :  { %726 = vmatpush.bf16.msrb.mxu3 %v1101_v60 }
  0x35   :  { %700 = vmatpush.bf16.msrb.mxu1 %v1085_v61 }
  0x36   :  { %688 = vmatpush.bf16.msrb.mxu0 %v1076_v62 }
  0x37   :  { %714 = vmatpush.bf16.msrb.mxu2 %v1092_v63 }
  0x38   :  { %727 = vmatpush.bf16.msrb.mxu3 %v1100_v0 }
  0x39   :  { %701 = vmatpush.bf16.msrb.mxu1 %v1084_v1 }
  0x3a   :  { %689 = vmatpush.bf16.msrb.mxu0 %v1075_v2 }
  0x3b   :  { %715 = vmatpush.bf16.msrb.mxu2 %v1091_v3 }
  0x3c   :  { %728 = vmatpush.bf16.msrb.mxu3 %v1099_v6 }
  0x3d   :  { %702 = vmatpush.bf16.msrb.mxu1 %v1083_v7 }
  0x3e   :  { %690 = vmatpush.bf16.msrb.mxu0 %v1074_v10 }
  0x3f   :  { %716 = vmatpush.bf16.msrb.mxu2 %v1090_v11 }
  0x40   :  { %729 = vmatpush.bf16.msrb.mxu3 %v1098_v14 }
  0x41   :  { %703 = vmatpush.bf16.msrb.mxu1 %v1082_v15  ;;  %691 = vmatmul.bf16.vlgmr.msrb.gmra.mxu0 %v185_v18 }
  0x42   :  { %735 = vmatpush.bf16.msra.mxu0 %v1113_v12  ;;  %717 = vmatmul.bf16.vlgmr.msrb.gmra.mxu2 %v187_v17 }
  0x43   :  { %730 = vmatmul.bf16.vlgmr.msrb.gmra.mxu3 %v188_v20 }
  0x44   :  { %704 = vmatmul.bf16.vlgmr.msrb.gmra.mxu1 %v186_v21 }
  0x46   :  { %736 = vmatpush.bf16.msra.mxu0 %v1112_v19 }
  0x4a   :  { %737 = vmatpush.bf16.msra.mxu0 %v1111_v22 }
  0x4e   :  { %738 = vmatpush.bf16.msra.mxu0 %v1110_v23 }
  0x52   :  { %739 = vmatpush.bf16.msra.mxu0 %v1109_v24 }
  0x56   :  { %740 = vmatpush.bf16.msra.mxu0 %v1108_v25 }
  0x5a   :  { %741 = vmatpush.bf16.msra.mxu0 %v1107_v26 }
  0x5e   :  { %742 = vmatpush.bf16.msra.mxu0 %v1106_v29 }
  0x61   :  { %743 = vmatmul.bf16.vlgmr.msra.gmra.mxu0 %v189_v30 }
  0x9e   :  { %v640_v31 = vpop.f32.mrf.mxu0 }
  0x9f   :  { %v641_v40 = vadd.f32 %v1114_v39, %v640_v31 }
  0xa1   :  { %v653_v32 = vpop.f32.mrf.mxu1 }
  0xa2   :  { %v654_v43 = vadd.f32 %v653_v32, %v641_v40 }
  0xa5   :  { %v666_v33 = vpop.f32.mrf.mxu2 }
  0xa6   :  { %v679_v34 = vpop.f32.mrf.mxu3  ;;  %v642_v35 = vpop.f32.mrf.mxu0  ;;  %v667_v45 = vadd.f32 %v666_v33, %v654_v43 }
  0xa8   :  { %v680_v49 = vadd.f32 %v679_v34, %v667_v45 }
  0xa9   :  { %v655_v36 = vpop.f32.mrf.mxu1 }
  0xad   :  { %v668_v37 = vpop.f32.mrf.mxu2 }
  0xae   :  { %v681_v38 = vpop.f32.mrf.mxu3 }
  0xbe   :  { %v692_v41 = vpop.f32.mrf.mxu0 }
  0xbf   :  { %v693_v51 = vadd.f32 %v692_v41, %v680_v49 }
  0xc1   :  { %v705_v42 = vpop.f32.mrf.mxu1 }
  0xc2   :  { %v706_v53 = vadd.f32 %v705_v42, %v693_v51 }
  0xc5   :  { %v718_v44 = vpop.f32.mrf.mxu2 }
  0xc6   :  { %v731_v46 = vpop.f32.mrf.mxu3  ;;  %v694_v47 = vpop.f32.mrf.mxu0  ;;  %v719_v54 = vadd.f32 %v718_v44, %v706_v53 }
  0xc8   :  { %v732_v55 = vadd.f32 %v731_v46, %v719_v54 }
  0xc9   :  { %v707_v48 = vpop.f32.mrf.mxu1 }
  0xcd   :  { %v720_v50 = vpop.f32.mrf.mxu2 }
  0xce   :  { %v733_v52 = vpop.f32.mrf.mxu3 }
  0xde   :  { %v744_v56 = vpop.f32.mrf.mxu0 }
  0xdf   :  { %v745_v57 = vadd.f32 %v744_v56, %v732_v55 }
  0xe1   :  { %v748_v58 = vmax.f32 %v745_v57, 0.0 }
  0xe3   :  { %749 = vst [vmem:[%s1375_s3] sm:$0xff] %v748_v58 }
  0xe6   :  { %v746_v59 = vpop.f32.mrf.mxu0 }

// kernel: xfeat_forward.38
= control target key start
LH: loop header
LB: loop body
LE: loop exit
PB: predicated region body
PF: predicated region fallthrough
CT: control target
= control target key end

     0   :  { %vm97_vm0 = vcmask 523264   ;;  %s197_s1 = inlined_call_operand.vmem [shape: bf16[128,64], index: 1, kind: input, shape index: {}]   ;;  %s198_s2 = inlined_call_operand.vmem [shape: f32[1,64], index: 2, kind: input, shape index: {}]   ;;  %s199_s0 = inlined_call_operand.vmem [shape: bf16[8,128], index: 0, kind: input, shape index: {}]   ;;  %s200_s3 = inlined_call_operand.vmem [shape: f32[8,64], index: 3, kind: output, shape index: {}]  }
   0x1   :  { %v142_v0 = vld [vmem:[%s197_s1 + $0x38] sm:$0xff]  ;;  %v141_v1 = vld [vmem:[%s197_s1 + $0x30] sm:$0xff]  ;;  %v140_v2 = vld [vmem:[%s197_s1 + $0x28] sm:$0xff] }
   0x2   :  { %83 = vmatpush.bf16.msra.mxu0 %v142_v0  ;;  %v139_v3 = vld [vmem:[%s197_s1 + $0x20] sm:$0xff]  ;;  %v138_v4 = vld [vmem:[%s197_s1 + $0x18] sm:$0xff]  ;;  %v137_v5 = vld [vmem:[%s197_s1 + $0x10] sm:$0xff] }
   0x3   :  { %v136_v6 = vld [vmem:[%s197_s1 + $0x8] sm:$0xff]  ;;  %v135_v7 = vld [vmem:[%s197_s1] sm:$0xff] }
   0x4   :  { %v14_v8 = vld [vmem:[%s199_s0] sm:$0xf] }
   0x5   :  { %v143_v9 = vld [vmem:[%s198_s2] ss:$0 sm:$0xff] }
   0x6   :  { %84 = vmatpush.bf16.msra.mxu0 %v141_v1 }
   0xa   :  { %85 = vmatpush.bf16.msra.mxu0 %v140_v2 }
   0xe   :  { %86 = vmatpush.bf16.msra.mxu0 %v139_v3 }
  0x12   :  { %87 = vmatpush.bf16.msra.mxu0 %v138_v4 }
  0x16   :  { %88 = vmatpush.bf16.msra.mxu0 %v137_v5 }
  0x1a   :  { %89 = vmatpush.bf16.msra.mxu0 %v136_v6 }
  0x1e   :  { %90 = vmatpush.bf16.msra.mxu0 %v135_v7 }
  0x21   :  { %91 = vmatmul.bf16.vlgmr.msra.gmra.mxu0 %v14_v8 }
  0x9e   :  { %v92_v10 = vpop.f32.mrf.mxu0 }
  0x9f   :  { %v93_v11 = vadd.f32 %v143_v9, %v92_v10 }
  0xa1   :  { %v96_v12 = vmax.f32 %v93_v11, 0.0 }
  0xa3   :  { %98 = vst.msk [vmem:[%s200_s3] sm:$0xff] %vm97_vm0, %v96_v12 }
  0xa6   :  { %v94_v13 = vpop.f32.mrf.mxu0 }

// kernel: xfeat_forward.41
= control target key start
LH: loop header
LB: loop body
LE: loop exit
PB: predicated region body
PF: predicated region fallthrough
CT: control target
= control target key end

     0   :  { %vm65_vm0 = vcmask 523264   ;;  %s195_s1 = inlined_call_operand.vmem [shape: bf16[64,64], index: 1, kind: input, shape index: {}]   ;;  %s196_s2 = inlined_call_operand.vmem [shape: f32[1,64], index: 2, kind: input, shape index: {}]   ;;  %s197_s0 = inlined_call_operand.vmem [shape: bf16[32,64], index: 0, kind: input, shape index: {}]   ;;  %s198_s3 = inlined_call_operand.vmem [shape: f32[32,64], index: 3, kind: output, shape index: {}]  }
   0x1   :  { %v130_v0 = vld [vmem:[%s195_s1 + $0x18] sm:$0xff]  ;;  %v129_v1 = vld [vmem:[%s195_s1 + $0x10] sm:$0xff]  ;;  %v128_v2 = vld [vmem:[%s195_s1 + $0x8] sm:$0xff] }
   0x2   :  { %76 = vmatpush.bf16.msra.mxu0 %v130_v0  ;;  %131 = vmatpush.bf16.msra.mxu1 %v130_v0  ;;  %v127_v3 = vld [vmem:[%s195_s1] sm:$0xff]  ;;  %v126_v5 = vld [vmem:[%s197_s0 + $0x8] sm:$0xff] }
   0x3   :  { %v125_v4 = vld [vmem:[%s197_s0] sm:$0xff] }
   0x4   :  { %v135_v6 = vld [vmem:[%s196_s2] ss:$0 sm:$0xff] }
   0x6   :  { %77 = vmatpush.bf16.msra.mxu0 %v129_v1  ;;  %132 = vmatpush.bf16.msra.mxu1 %v129_v1 }
   0xa   :  { %78 = vmatpush.bf16.msra.mxu0 %v128_v2  ;;  %133 = vmatpush.bf16.msra.mxu1 %v128_v2 }
   0xe   :  { %79 = vmatpush.bf16.msra.mxu0 %v127_v3  ;;  %134 = vmatpush.bf16.msra.mxu1 %v127_v3 }
  0x11   :  { %123 = vmatmul.msk.bf16.vlgmr.msra.gmra.mxu0 %vm65_vm0, %v125_v4  ;;  %124 = vmatmul.msk.bf16.vlgmr.msra.gmra.mxu1 %vm65_vm0, %v126_v5 }
  0x8e   :  { %v81_v7 = vpop.f32.mrf.mxu0  ;;  %v86_v8 = vpop.f32.mrf.mxu1 }
  0x8f   :  { %v82_v9 = vadd.f32 %v135_v6, %v81_v7  ;;  %v87_v10 = vadd.f32 %v135_v6, %v86_v8 }
  0x91   :  { %91 = vst.msk [vmem:[%s198_s3] sm:$0xff] %vm65_vm0, %v82_v9 }
  0x92   :  { %93 = vst.msk [vmem:[%s198_s3 + $0x10] sm:$0xff] %vm65_vm0, %v87_v10 }
  0x96   :  { %v83_v11 = vpop.f32.mrf.mxu0  ;;  %v88_v12 = vpop.f32.mrf.mxu1 }
  0x97   :  { %v84_v13 = vadd.f32 %v135_v6, %v83_v11  ;;  %v89_v14 = vadd.f32 %v135_v6, %v88_v12 }
  0x99   :  { %92 = vst.msk [vmem:[%s198_s3 + $0x8] sm:$0xff] %vm65_vm0, %v84_v13 }
  0x9a   :  { %94 = vst.msk [vmem:[%s198_s3 + $0x18] sm:$0xff] %vm65_vm0, %v89_v14 }

// kernel: xfeat_forward.42
= control target key start
LH: loop header
LB: loop body
LE: loop exit
PB: predicated region body
PF: predicated region fallthrough
CT: control target
= control target key end

     0   :  { %vm77_vm0 = vcmask 523264   ;;  %s533_s1 = inlined_call_operand.vmem [shape: bf16[64,64], index: 1, kind: input, shape index: {}]   ;;  %s534_s2 = inlined_call_operand.vmem [shape: f32[1,64], index: 2, kind: input, shape index: {}, may-alias: {2,4}]   ;;  %s535_s0 = inlined_call_operand.vmem [shape: bf16[32,64], index: 0, kind: input, shape index: {}]   ;;  %s536_s4 = inlined_call_operand.vmem [shape: f32[1,64], index: 4, kind: input, shape index: {}, may-alias: {2,4}]   ;;  %s537_s3 = inlined_call_operand.vmem [shape: bf16[64,64], index: 3, kind: input, shape index: {}]   ;;  %s538_s6 = inlined_call_operand.vmem [shape: f32[1,128], index: 6, kind: input, shape index: {}]   ;;  %s539_s5 = inlined_call_operand.vmem [shape: bf16[64,128], index: 5, kind: input, shape index: {}]   ;;  %s540_s7 = inlined_call_operand.vmem [shape: f32[32,128], index: 7, kind: output, shape index: {}]  }
   0x1   :  { %v392_v0 = vld [vmem:[%s533_s1 + $0x18] sm:$0xff]  ;;  %v391_v1 = vld [vmem:[%s533_s1 + $0x10] sm:$0xff]  ;;  %v390_v2 = vld [vmem:[%s533_s1 + $0x8] sm:$0xff] }
   0x2   :  { %88 = vmatpush.bf16.msra.mxu0 %v392_v0  ;;  %401 = vmatpush.bf16.msra.mxu3 %v392_v0  ;;  %v389_v3 = vld [vmem:[%s533_s1] sm:$0xff]  ;;  %v388_v5 = vld [vmem:[%s535_s0 + $0x8] sm:$0xff]  ;;  %v396_v6 = vld [vmem:[%s537_s3 + $0x18] sm:$0xff] }
   0x3   :  { %v387_v4 = vld [vmem:[%s535_s0] sm:$0xff]  ;;  %155 = vmatpush.bf16.msra.mxu1 %v396_v6  ;;  %v395_v7 = vld [vmem:[%s537_s3 + $0x10] sm:$0xff]  ;;  %v394_v8 = vld [vmem:[%s537_s3 + $0x8] sm:$0xff] }
   0x4   :  { %v393_v9 = vld [vmem:[%s537_s3] sm:$0xff]  ;;  %v400_v25 = vld [vmem:[%s539_s5 + $0x18] sm:$0xff]  ;;  %v399_v26 = vld [vmem:[%s539_s5 + $0x10] sm:$0xff] }
   0x5   :  { %v405_v11 = vld [vmem:[%s534_s2] ss:$0 sm:$0xff]  ;;  %222 = vmatpush.bf16.msra.mxu2 %v400_v25  ;;  %v398_v27 = vld [vmem:[%s539_s5 + $0x8] sm:$0xff] }
   0x6   :  { %89 = vmatpush.bf16.msra.mxu0 %v391_v1  ;;  %402 = vmatpush.bf16.msra.mxu3 %v391_v1  ;;  %v397_v28 = vld [vmem:[%s539_s5] sm:$0xff] }
   0x7   :  { %156 = vmatpush.bf16.msra.mxu1 %v395_v7  ;;  %v406_v30 = vld [vmem:[%s536_s4] ss:$0 sm:$0xff] }
   0x8   :  { %v407_v44 = vld [vmem:[%s538_s6] ss:$0 sm:$0xff] }
   0x9   :  { %223 = vmatpush.bf16.msra.mxu2 %v399_v26 }
   0xa   :  { %90 = vmatpush.bf16.msra.mxu0 %v390_v2  ;;  %403 = vmatpush.bf16.msra.mxu3 %v390_v2 }
   0xb   :  { %157 = vmatpush.bf16.msra.mxu1 %v394_v8 }
   0xd   :  { %224 = vmatpush.bf16.msra.mxu2 %v398_v27 }
   0xe   :  { %91 = vmatpush.bf16.msra.mxu0 %v389_v3  ;;  %404 = vmatpush.bf16.msra.mxu3 %v389_v3 }
   0xf   :  { %158 = vmatpush.bf16.msra.mxu1 %v393_v9 }
  0x11   :  { %345 = vmatmul.msk.bf16.vlgmr.msra.gmra.mxu0 %vm77_vm0, %v387_v4  ;;  %346 = vmatmul.msk.bf16.vlgmr.msra.gmra.mxu3 %vm77_vm0, %v388_v5 }
  0x12   :  { %225 = vmatpush.bf16.msra.mxu2 %v397_v28 }
  0x8e   :  { %v93_v10 = vpop.f32.mrf.mxu0 }
  0x8f   :  { %v94_v12 = vadd.f32 %v405_v11, %v93_v10 }
  0x91   :  { %v103_v16 = vmax.f32 %v94_v12, 0.0 }
  0x94   :  { %v98_v14 = vpop.f32.mrf.mxu3 }
  0x95   :  { %v99_v20 = vadd.f32 %v405_v11, %v98_v14 }
  0x96   :  { %v95_v13 = vpop.f32.mrf.mxu0 }
  0x97   :  { %v96_v15 = vadd.f32 %v405_v11, %v95_v13  ;;  %v105_v22 = vmax.f32 %v99_v20, 0.0 }
  0x99   :  { %v104_v17 = vmax.f32 %v96_v15, 0.0 }
  0x9b   :  { %v116_v18 = vpack.c.bf16 %v104_v17, %v103_v16 }
  0x9c   :  { %v100_v19 = vpop.f32.mrf.mxu3 }
  0x9d   :  { %363 = vmatmul.msk.bf16.vlgmr.msra.gmra.mxu1 %vm77_vm0, %v116_v18  ;;  %v101_v21 = vadd.f32 %v405_v11, %v100_v19 }
  0x9f   :  { %v106_v23 = vmax.f32 %v101_v21, 0.0 }
  0xa1   :  { %v117_v24 = vpack.c.bf16 %v106_v23, %v105_v22 }
  0xad   :  { %364 = vmatmul.msk.bf16.gmra.mxu1 %vm77_vm0, %v117_v24 }
 0x11a   :  { %v160_v29 = vpop.f32.mrf.mxu1 }
 0x11b   :  { %v161_v31 = vadd.f32 %v406_v30, %v160_v29 }
 0x11d   :  { %v170_v34 = vmax.f32 %v161_v31, 0.0 }
 0x122   :  { %v162_v32 = vpop.f32.mrf.mxu1 }
 0x123   :  { %v163_v33 = vadd.f32 %v406_v30, %v162_v32 }
 0x125   :  { %v171_v35 = vmax.f32 %v163_v33, 0.0 }
 0x127   :  { %v183_v36 = vpack.c.bf16 %v171_v35, %v170_v34 }
 0x129   :  { %381 = vmatmul.msk.bf16.vlgmr.msra.gmra.mxu2 %vm77_vm0, %v183_v36 }
 0x12a   :  { %v165_v37 = vpop.f32.mrf.mxu1 }
 0x12b   :  { %v166_v38 = vadd.f32 %v406_v30, %v165_v37 }
 0x12d   :  { %v172_v41 = vmax.f32 %v166_v38, 0.0 }
 0x132   :  { %v167_v39 = vpop.f32.mrf.mxu1 }
 0x133   :  { %v168_v40 = vadd.f32 %v406_v30, %v167_v39 }
 0x135   :  { %v173_v42 = vmax.f32 %v168_v40, 0.0 }
 0x137   :  { %v184_v43 = vpack.c.bf16 %v173_v42, %v172_v41 }
 0x139   :  { %382 = vmatmul.msk.bf16.gmra.mxu2 %vm77_vm0, %v184_v43 }
 0x1ac   :  { %v227_v45 = vpop.f32.mrf.mxu2 }
 0x1ad   :  { %v228_v46 = vadd.f32 %v407_v44, %v227_v45 }
 0x1af   :  { %v383_v47 = vmul.f32 -1.442695, %v228_v46 }
 0x1b1   :  { %408 = vpow2.f32 %v383_v47 }
 0x1b4   :  { %v229_v48 = vpop.f32.mrf.mxu2 }
 0x1b5   :  { %v230_v49 = vadd.f32 %v407_v44, %v229_v48 }
 0x1b7   :  { %v409_v50 = vpop.eup %408  ;;  %v384_v51 = vmul.f32 -1.442695, %v230_v49 }
 0x1b8   :  { %v249_v52 = vadd.f32 1.0, %v409_v50 }
 0x1b9   :  { %410 = vpow2.f32 %v384_v51 }
 0x1ba   :  { %412 = vrcp.f32 %v249_v52  ;;  %v264_v61 = vand.u32 2147483648, %v249_v52  ;;  %v262_v0 = vand.u32 2147483647, %v249_v52  ;;  %vm258_vm2 = vweird.f32 %v249_v52 }
 0x1bc   :  { %v232_v53 = vpop.f32.mrf.mxu2  ;;  %v265_v6 = vor.u32 1.1754944e-38, %v264_v61  ;;  %vm263_vm4 = vcmp.eq.f32.partialorder %v262_v0, 8.507059e+37 }
 0x1bd   :  { %v233_v54 = vadd.f32 %v407_v44, %v232_v53 }
 0x1bf   :  { %v411_v55 = vpop.eup %410  ;;  %v385_v56 = vmul.f32 -1.442695, %v233_v54 }
 0x1c0   :  { %v413_v57 = vpop.eup %412  ;;  %v250_v58 = vadd.f32 1.0, %v411_v55 }
 0x1c1   :  { %v254_v59 = vmul.f32 %v413_v57, %v249_v52  ;;  %414 = vpow2.f32 %v385_v56  ;;  %vm259_vm1 = vweird.f32 %v413_v57 }
 0x1c2   :  { %416 = vrcp.f32 %v250_v58  ;;  %vm260_vm3 = vmor %vm258_vm2, %vm259_vm1  ;;  %v279_v12 = vand.u32 2147483648, %v250_v58  ;;  %v277_v14 = vand.u32 2147483647, %v250_v58  ;;  %vm273_vm6 = vweird.f32 %v250_v58 }
 0x1c3   :  { %v255_v60 = vsub.f32 1.0, %v254_v59 }
 0x1c4   :  { %v234_v62 = vpop.f32.mrf.mxu2  ;;  %v280_v18 = vor.u32 1.1754944e-38, %v279_v12  ;;  %vm278_vm8 = vcmp.eq.f32.partialorder %v277_v14, 8.507059e+37 }
 0x1c5   :  { %v256_v63 = vmul.f32 %v413_v57, %v255_v60  ;;  %v235_v1 = vadd.f32 %v407_v44, %v234_v62 }
 0x1c7   :  { %v415_v2 = vpop.eup %414  ;;  %v257_v3 = vadd.f32 %v413_v57, %v256_v63  ;;  %v386_v4 = vmul.f32 -1.442695, %v235_v1 }
 0x1c8   :  { %v417_v5 = vpop.eup %416  ;;  %v251_v7 = vadd.f32 1.0, %v415_v2 }
 0x1c9   :  { %v261_v8 = vsel %vm260_vm3, %v413_v57, %v257_v3  ;;  %v269_v9 = vmul.f32 %v417_v5, %v250_v58  ;;  %418 = vpow2.f32 %v386_v4  ;;  %vm274_vm5 = vweird.f32 %v417_v5 }
 0x1ca   :  { %v266_v10 = vsel %vm263_vm4, %v265_v6, %v261_v8  ;;  %420 = vrcp.f32 %v251_v7  ;;  %vm275_vm7 = vmor %vm273_vm6, %vm274_vm5  ;;  %v294_v24 = vand.u32 2147483648, %v251_v7  ;;  %v292_v26 = vand.u32 2147483647, %v251_v7 }
 0x1cb   :  { %313 = vst [vmem:[%s540_s7] sm:$0xff] %v266_v10  ;;  %v270_v11 = vsub.f32 1.0, %v269_v9  ;;  %vm288_vm10 = vweird.f32 %v251_v7 }
 0x1cc   :  { %v295_v29 = vor.u32 1.1754944e-38, %v294_v24  ;;  %vm293_vm12 = vcmp.eq.f32.partialorder %v292_v26, 8.507059e+37 }
 0x1cd   :  { %v271_v13 = vmul.f32 %v417_v5, %v270_v11 }
 0x1cf   :  { %v419_v15 = vpop.eup %418  ;;  %v272_v16 = vadd.f32 %v417_v5, %v271_v13 }
 0x1d0   :  { %v421_v17 = vpop.eup %420  ;;  %v252_v19 = vadd.f32 1.0, %v419_v15 }
 0x1d1   :  { %v276_v20 = vsel %vm275_vm7, %v417_v5, %v272_v16  ;;  %v284_v21 = vmul.f32 %v421_v17, %v251_v7  ;;  %vm289_vm9 = vweird.f32 %v421_v17 }
 0x1d2   :  { %v281_v22 = vsel %vm278_vm8, %v280_v18, %v276_v20  ;;  %422 = vrcp.f32 %v252_v19  ;;  %vm290_vm11 = vmor %vm288_vm10, %vm289_vm9  ;;  %v309_v34 = vand.u32 2147483648, %v252_v19  ;;  %v307_v36 = vand.u32 2147483647, %v252_v19 }
 0x1d3   :  { %314 = vst [vmem:[%s540_s7 + $0x8] sm:$0xff] %v281_v22  ;;  %v285_v23 = vsub.f32 1.0, %v284_v21  ;;  %vm303_vm14 = vweird.f32 %v252_v19 }
 0x1d4   :  { %v310_v38 = vor.u32 1.1754944e-38, %v309_v34  ;;  %vm308_vm0 = vcmp.eq.f32.partialorder %v307_v36, 8.507059e+37 }
 0x1d5   :  { %v286_v25 = vmul.f32 %v421_v17, %v285_v23 }
 0x1d7   :  { %v287_v27 = vadd.f32 %v421_v17, %v286_v25 }
 0x1d8   :  { %v423_v28 = vpop.eup %422 }
 0x1d9   :  { %v291_v30 = vsel %vm290_vm11, %v421_v17, %v287_v27  ;;  %v299_v31 = vmul.f32 %v423_v28, %v252_v19  ;;  %vm304_vm13 = vweird.f32 %v423_v28 }
 0x1da   :  { %v296_v32 = vsel %vm293_vm12, %v295_v29, %v291_v30  ;;  %vm305_vm15 = vmor %vm303_vm14, %vm304_vm13 }
 0x1db   :  { %315 = vst [vmem:[%s540_s7 + $0x10] sm:$0xff] %v296_v32  ;;  %v300_v33 = vsub.f32 1.0, %v299_v31 }
 0x1dd   :  { %v301_v35 = vmul.f32 %v423_v28, %v300_v33 }
 0x1df   :  { %v302_v37 = vadd.f32 %v423_v28, %v301_v35 }
 0x1e1   :  { %v306_v39 = vsel %vm305_vm15, %v423_v28, %v302_v37 }
 0x1e2   :  { %v311_v40 = vsel %vm308_vm0, %v310_v38, %v306_v39 }
 0x1e3   :  { %316 = vst [vmem:[%s540_s7 + $0x18] sm:$0xff] %v311_v40 }

// kernel: xfeat_forward.43
= control target key start
LH: loop header
LB: loop body
LE: loop exit
PB: predicated region body
PF: predicated region fallthrough
CT: control target
= control target key end

     0   :  { %s594_s0 = inlined_call_operand.vmem [shape: bf16[32,64], index: 0, kind: input, shape index: {}]   ;;  %s595_s1 = inlined_call_operand.vmem [shape: bf16[64,64], index: 1, kind: input, shape index: {}]   ;;  %s596_s2 = inlined_call_operand.vmem [shape: f32[1,64], index: 2, kind: input, shape index: {}, may-alias: {2,4,6}]   ;;  %s597_s3 = inlined_call_operand.vmem [shape: bf16[64,64], index: 3, kind: input, shape index: {}]   ;;  %s598_s4 = inlined_call_operand.vmem [shape: f32[1,64], index: 4, kind: input, shape index: {}, may-alias: {2,4,6}]   ;;  %s599_s5 = inlined_call_operand.vmem [shape: bf16[64,64], index: 5, kind: input, shape index: {}]   ;;  %s600_s6 = inlined_call_operand.vmem [shape: f32[1,64], index: 6, kind: input, shape index: {}, may-alias: {2,4,6}]   ;;  %s601_s7 = inlined_call_operand.vmem [shape: bf16[64,128], index: 7, kind: input, shape index: {}]   ;;  %s602_s8 = inlined_call_operand.vmem [shape: f32[1,128], index: 8, kind: input, shape index: {}]   ;;  %s603_s9 = inlined_call_operand.hbm [shape: f32[32,128], index: 9, kind: output, shape index: {}]  }
   0x1   :  { %v418_v0 = vld [vmem:[%s595_s1 + $0x18] sm:$0xff]  ;;  %v417_v1 = vld [vmem:[%s595_s1 + $0x10] sm:$0xff] }
   0x2   :  { %95 = vmatpush.bf16.msra.mxu0 %v418_v0 }
   0x3   :  { %14 = vsyncpa [#allocation3], 0  ;;  %v416_v2 = vld [vmem:[%s595_s1 + $0x8] sm:$0xff]  ;;  %v415_v3 = vld [vmem:[%s595_s1] sm:$0xff]  ;;  %vm84_vm0 = vcmask 523264   ;;  %s321_s27 = sshll.u32 %s603_s9, 4  ;;  %s322_s27 = int_to_ptr.hbm [resolvable:$true] %s321_s27 }
   0x4   :  { %v413_v4 = vld [vmem:[%s594_s0] sm:$0xff]  ;;  %v414_v5 = vld [vmem:[%s594_s0 + $0x8] sm:$0xff]  ;;  %v422_v6 = vld [vmem:[%s597_s3 + $0x18] sm:$0xff]  ;;  %s466_s0 = smov 8  }
   0x5   :  { %162 = vmatpush.bf16.msra.mxu1 %v422_v6  ;;  %v421_v7 = vld [vmem:[%s597_s3 + $0x10] sm:$0xff]  ;;  %v420_v8 = vld [vmem:[%s597_s3 + $0x8] sm:$0xff]  ;;  %v419_v9 = vld [vmem:[%s597_s3] sm:$0xff] }
   0x6   :  { %96 = vmatpush.bf16.msra.mxu0 %v417_v1  ;;  %v434_v11 = vld [vmem:[%s596_s2] ss:$0 sm:$0xff]  ;;  %v426_v25 = vld [vmem:[%s599_s5 + $0x18] sm:$0xff]  ;;  %v425_v26 = vld [vmem:[%s599_s5 + $0x10] sm:$0xff] }
   0x7   :  { %229 = vmatpush.bf16.msra.mxu2 %v426_v25  ;;  %v424_v27 = vld [vmem:[%s599_s5 + $0x8] sm:$0xff]  ;;  %v423_v28 = vld [vmem:[%s599_s5] sm:$0xff]  ;;  %v430_v44 = vld [vmem:[%s601_s7 + $0x18] sm:$0xff] }
   0x8   :  { %v435_v30 = vld [vmem:[%s598_s4] ss:$0 sm:$0xff]  ;;  %296 = vmatpush.bf16.msra.mxu3 %v430_v44  ;;  %v429_v45 = vld [vmem:[%s601_s7 + $0x10] sm:$0xff]  ;;  %v428_v46 = vld [vmem:[%s601_s7 + $0x8] sm:$0xff] }
   0x9   :  { %163 = vmatpush.bf16.msra.mxu1 %v421_v7  ;;  %v427_v47 = vld [vmem:[%s601_s7] sm:$0xff] }
   0xa   :  { %97 = vmatpush.bf16.msra.mxu0 %v416_v2  ;;  %v436_v49 = vld [vmem:[%s600_s6] ss:$0 sm:$0xff]  ;;  %s464_s6 = smov [#allocation2]  }
   0xb   :  { %230 = vmatpush.bf16.msra.mxu2 %v425_v26  ;;  %v437_v63 = vld [vmem:[%s602_s8] ss:$0 sm:$0xff]  ;;  %s319_s24 = sshll.u32 %s464_s6, 4  ;;  %s465_s8 = smov 128   ;;  %s320_s24 = int_to_ptr.vmem [resolvable:$true] %s319_s24 }
   0xc   :  { %297 = vmatpush.bf16.msra.mxu3 %v429_v45 }
   0xd   :  { %164 = vmatpush.bf16.msra.mxu1 %v420_v8 }
   0xe   :  { %98 = vmatpush.bf16.msra.mxu0 %v415_v3 }
   0xf   :  { %231 = vmatpush.bf16.msra.mxu2 %v424_v27 }
  0x10   :  { %298 = vmatpush.bf16.msra.mxu3 %v428_v46 }
  0x11   :  { %357 = vmatmul.msk.bf16.vlgmr.msra.gmra.mxu0 %vm84_vm0, %v413_v4  ;;  %165 = vmatpush.bf16.msra.mxu1 %v419_v9 }
  0x13   :  { %232 = vmatpush.bf16.msra.mxu2 %v423_v28 }
  0x14   :  { %299 = vmatpush.bf16.msra.mxu3 %v427_v47 }
  0x21   :  { %358 = vmatmul.msk.bf16.gmra.mxu0 %vm84_vm0, %v414_v5 }
  0x8e   :  { %v100_v10 = vpop.f32.mrf.mxu0 }
  0x8f   :  { %v101_v12 = vadd.f32 %v434_v11, %v100_v10 }
  0x91   :  { %v110_v15 = vmax.f32 %v101_v12, 0.0 }
  0x96   :  { %v102_v13 = vpop.f32.mrf.mxu0 }
  0x97   :  { %v103_v14 = vadd.f32 %v434_v11, %v102_v13 }
  0x99   :  { %v111_v16 = vmax.f32 %v103_v14, 0.0 }
  0x9b   :  { %v123_v17 = vpack.c.bf16 %v111_v16, %v110_v15 }
  0x9d   :  { %375 = vmatmul.msk.bf16.vlgmr.msra.gmra.mxu1 %vm84_vm0, %v123_v17 }
  0x9e   :  { %v105_v18 = vpop.f32.mrf.mxu0 }
  0x9f   :  { %v106_v19 = vadd.f32 %v434_v11, %v105_v18 }
  0xa1   :  { %v112_v22 = vmax.f32 %v106_v19, 0.0 }
  0xa6   :  { %v107_v20 = vpop.f32.mrf.mxu0 }
  0xa7   :  { %v108_v21 = vadd.f32 %v434_v11, %v107_v20 }
  0xa9   :  { %v113_v23 = vmax.f32 %v108_v21, 0.0 }
  0xab   :  { %v124_v24 = vpack.c.bf16 %v113_v23, %v112_v22 }
  0xad   :  { %376 = vmatmul.msk.bf16.gmra.mxu1 %vm84_vm0, %v124_v24 }
 0x11a   :  { %v167_v29 = vpop.f32.mrf.mxu1 }
 0x11b   :  { %v168_v31 = vadd.f32 %v435_v30, %v167_v29 }
 0x11d   :  { %v177_v34 = vmax.f32 %v168_v31, 0.0 }
 0x122   :  { %v169_v32 = vpop.f32.mrf.mxu1 }
 0x123   :  { %v170_v33 = vadd.f32 %v435_v30, %v169_v32 }
 0x125   :  { %v178_v35 = vmax.f32 %v170_v33, 0.0 }
 0x127   :  { %v190_v36 = vpack.c.bf16 %v178_v35, %v177_v34 }
 0x129   :  { %393 = vmatmul.msk.bf16.vlgmr.msra.gmra.mxu2 %vm84_vm0, %v190_v36 }
 0x12a   :  { %v172_v37 = vpop.f32.mrf.mxu1 }
 0x12b   :  { %v173_v38 = vadd.f32 %v435_v30, %v172_v37 }
 0x12d   :  { %v179_v41 = vmax.f32 %v173_v38, 0.0 }
 0x132   :  { %v174_v39 = vpop.f32.mrf.mxu1 }
 0x133   :  { %v175_v40 = vadd.f32 %v435_v30, %v174_v39 }
 0x135   :  { %v180_v42 = vmax.f32 %v175_v40, 0.0 }
 0x137   :  { %v191_v43 = vpack.c.bf16 %v180_v42, %v179_v41 }
 0x139   :  { %394 = vmatmul.msk.bf16.gmra.mxu2 %vm84_vm0, %v191_v43 }
 0x1ac   :  { %v234_v48 = vpop.f32.mrf.mxu2 }
 0x1ad   :  { %v235_v50 = vadd.f32 %v436_v49, %v234_v48 }
 0x1af   :  { %v244_v53 = vmax.f32 %v235_v50, 0.0 }
 0x1b4   :  { %v236_v51 = vpop.f32.mrf.mxu2 }
 0x1b5   :  { %v237_v52 = vadd.f32 %v436_v49, %v236_v51 }
 0x1b7   :  { %v245_v54 = vmax.f32 %v237_v52, 0.0 }
 0x1b9   :  { %v257_v55 = vpack.c.bf16 %v245_v54, %v244_v53 }
 0x1bb   :  { %411 = vmatmul.msk.bf16.vlgmr.msra.gmra.mxu3 %vm84_vm0, %v257_v55 }
 0x1bc   :  { %v239_v56 = vpop.f32.mrf.mxu2 }
 0x1bd   :  { %v240_v57 = vadd.f32 %v436_v49, %v239_v56 }
 0x1bf   :  { %v246_v60 = vmax.f32 %v240_v57, 0.0 }
 0x1c4   :  { %v241_v58 = vpop.f32.mrf.mxu2 }
 0x1c5   :  { %v242_v59 = vadd.f32 %v436_v49, %v241_v58 }
 0x1c7   :  { %v247_v61 = vmax.f32 %v242_v59, 0.0 }
 0x1c9   :  { %v258_v62 = vpack.c.bf16 %v247_v61, %v246_v60 }
 0x1cb   :  { %412 = vmatmul.msk.bf16.gmra.mxu3 %vm84_vm0, %v258_v62 }
 0x23e   :  { %v301_v0 = vpop.f32.mrf.mxu3 }
 0x23f   :  { %v302_v1 = vadd.f32 %v437_v63, %v301_v0 }
 0x241   :  { %311 = vst [vmem:[#allocation2] sm:$0xff] %v302_v1 }
 0x246   :  { %v303_v2 = vpop.f32.mrf.mxu3 }
 0x247   :  { %v304_v3 = vadd.f32 %v437_v63, %v303_v2 }
 0x249   :  { %312 = vst [vmem:[#allocation2 + $0x8] sm:$0xff] %v304_v3 }
 0x24e   :  { %v306_v4 = vpop.f32.mrf.mxu3 }
 0x24f   :  { %v307_v5 = vadd.f32 %v437_v63, %v306_v4 }
 0x251   :  { %313 = vst [vmem:[#allocation2 + $0x10] sm:$0xff] %v307_v5 }
 0x256   :  { %v308_v6 = vpop.f32.mrf.mxu3 }
 0x257   :  { %v309_v7 = vadd.f32 %v437_v63, %v308_v6 }
 0x259   :  { %314 = vst [vmem:[#allocation2 + $0x18] sm:$0xff] %v309_v7 }
 0x25a   :  { %327 = dma.vmem_to_hbm [thread:$0]  %s320_s24, 512, %s322_s27, [#allocation3], %s465_s8, %s465_s8, %s466_s0  }
 0x25b   :  { %462 = dma.done.wait [#allocation3], 512  }
 0x25c   :  { %463 = vsyncadd [#allocation3], 4294966784 }
 0x25d   :  { %332 = vsyncpa [#allocation3], 1 }

</bundles_post_ra>
